<compile_context>
chip_gen: v5e
topology: v5e:2x2
jax: 0.10.0
libtpu: 0.0.40
codegen_flags: <defaults>
</compile_context>

<pallas_src>
import numpy as np
import jax
import jax.numpy as jnp
from jax import lax
from jax.experimental import pallas as pl
from jax.experimental.pallas import tpu as pltpu

SEQ_LEN = 200          # forced by fc1: 64 * 50 features -> two /2 pools -> L = 200
C1, C2, HID = 32, 64, 128
TB_MAX = 32            # max samples per grid step (M = 50*TB rows; VMEM-safe on v5e..v7x)


def _pick_tb(batch):
    """Largest multiple of 8 <= TB_MAX, aiming for >= 2 grid steps on small batches."""
    half = (batch + 1) // 2
    tb = ((half + 7) // 8) * 8
    return max(8, min(TB_MAX, tb))


def _fused_kernel(patch_ref, w1_ref, b1_ref, w2_ref, b2_ref,
                  wf1_ref, bf1_ref, wf2_ref, bf2_ref, out_ref):
    """One batch tile, fully resident in VMEM: conv1+pool, conv2+pool, fc1, fc2, sigmoid.

    patch_ref: (50, TB, 10)   patches[q, b, s] = xpad3[b, 4q + s]   (q = final pooled pos)
    w1_ref   : (10, 256)      conv1 for 8 output offsets (even | odd parity halves) x 32 ch
    w2_ref   : (128, 128)     conv2: K = 4 pooled taps x 32 ch, N = even | odd parity x 64 ch
    wf1_ref  : (25, 128, 128) fc1 re-layout: [j, p*64 + c, h] = wf1[h, c*50 + 2j + p]
    out_ref  : (TB, 1)
    """
    tb = patch_ref.shape[1]
    rows = 50 * tb

    # conv1: all 8 needed output offsets in one matmul (M = 50*TB, K = 10, N = 256)
    x = patch_ref[...].reshape(rows, 10)
    y1 = jnp.dot(x, w1_ref[...], preferred_element_type=jnp.float32) + b1_ref[...]

    # ReLU + maxpool-1: even conv1 offsets live in lanes [:128], odd in [128:]
    p1 = jnp.maximum(jnp.maximum(y1[:, :128], y1[:, 128:]), 0.0)

    # halo (= conv2 zero padding): tap p1[2q-1] invalid at q==0  (rows [0,tb),     lanes 0:32),
    #                              tap p1[2q+2] invalid at q==49 (rows [49tb,50tb), lanes 96:128)
    rid = lax.broadcasted_iota(jnp.int32, (rows, 128), 0)
    lid = lax.broadcasted_iota(jnp.int32, (rows, 128), 1)
    halo = ((rid < tb) & (lid < 32)) | ((rid >= 49 * tb) & (lid >= 96))
    p1 = jnp.where(halo, 0.0, p1)

    # conv2: both output parities in one matmul (M = 50*TB, K = 128, N = 128)
    y2 = jnp.dot(p1, w2_ref[...], preferred_element_type=jnp.float32) + b2_ref[...]
    # ReLU + maxpool-2: even conv2 positions in lanes [:64], odd in [64:]
    p2 = jnp.maximum(jnp.maximum(y2[:, :C2], y2[:, C2:]), 0.0)        # (50*TB, 64), q-major

    # fc1, fused: 25 accumulating matmuls with K = 128 (two pooled positions per step,
    # lane-concatenated to match wf1_ref's [p*64 + c] row order)
    acc = jnp.zeros((tb, HID), jnp.float32)
    for j in range(25):
        blk = jnp.concatenate(
            [p2[(2 * j) * tb:(2 * j + 1) * tb],
             p2[(2 * j + 1) * tb:(2 * j + 2) * tb]], axis=1)          # (TB, 128)
        acc = acc + jnp.dot(blk, wf1_ref[j], preferred_element_type=jnp.float32)
    z = jnp.maximum(acc + bf1_ref[...], 0.0)

    # fc2 (128 -> 1) as VPU multiply + lane reduction, then sigmoid
    o = jnp.sum(z * wf2_ref[...], axis=-1, keepdims=True) + bf2_ref[...]
    out_ref[...] = 1.0 / (1.0 + jnp.exp(-o))


def _relayout_params(w1, b1, w2, b2, wf1, bf1, wf2, bf2):
    """Re-layout PyTorch weights into the fused-kernel MXU operands (glue)."""
    # conv1: column block (parity*4 + t)*32 .. +32 produces y1 at l = 4q + 2t - 2 + parity
    w1k = jnp.transpose(w1[:, 0, :], (1, 0))                          # (3, 32)  [k, c_out]
    W1 = jnp.zeros((10, 256), jnp.float32)
    for parity in range(2):
        for t in range(4):
            s0 = 2 * t + parity                                       # patch row of tap k=0
            col0 = parity * 128 + t * 32
            W1 = W1.at[s0:s0 + 3, col0:col0 + 32].set(w1k)
    b1e = jnp.tile(b1, 8).reshape(1, 256)

    # conv2: rows = pooled taps [p1[2q-1] | p1[2q] | p1[2q+1] | p1[2q+2]] x 32 ch,
    #        cols = [even output y2[2q] | odd output y2[2q+1]] x 64 ch
    w2k = jnp.transpose(w2, (2, 1, 0))                                # (3, 32, 64) [k,cin,cout]
    W2 = jnp.zeros((128, 128), jnp.float32)
    for k in range(3):
        W2 = W2.at[k * 32:(k + 1) * 32, 0:C2].set(w2k[k])             # even positions
        W2 = W2.at[(k + 1) * 32:(k + 2) * 32, C2:].set(w2k[k])        # odd positions
    b2e = jnp.concatenate([b2, b2]).reshape(1, 2 * C2)

    # fc1: PyTorch flatten order is c*50 + q ->  wf1_r[j, p*64 + c, h] = wf1[h, c*50 + 2j + p]
    wf1_r = wf1.reshape(HID, C2, 50).transpose(2, 1, 0).reshape(25, 2 * C2, HID)
    return (W1, b1e, W2, b2e, wf1_r,
            bf1.reshape(1, HID), wf2.reshape(1, HID), bf2.reshape(1, 1))


@jax.jit
def protein_cnn_forward(x, params):
    """x: (B, 200) float32 -> (B, 1) float32.  params are in PyTorch layout."""
    B = x.shape[0]
    tb = _pick_tb(B)
    Bp = ((B + tb - 1) // tb) * tb

    ops = _relayout_params(*params)

    # ---- input glue: q-major patch tensor, patches[q, b, s] = xpad3[b, 4q + s] --------
    xb = jnp.pad(x, ((0, Bp - B), (0, 0)))
    xp3 = jnp.pad(xb, ((0, 0), (3, 3)))                                        # (Bp, 206)
    patches = jnp.stack([xp3[:, 4 * q:4 * q + 10] for q in range(50)], axis=0)  # (50,Bp,10)

    out = pl.pallas_call(
        _fused_kernel,
        out_shape=jax.ShapeDtypeStruct((Bp, 1), jnp.float32),
        grid=(Bp // tb,),
        in_specs=[
            pl.BlockSpec((50, tb, 10), lambda i: (0, i, 0)),
            pl.BlockSpec((10, 256), lambda i: (0, 0)),
            pl.BlockSpec((1, 256), lambda i: (0, 0)),
            pl.BlockSpec((128, 128), lambda i: (0, 0)),
            pl.BlockSpec((1, 2 * C2), lambda i: (0, 0)),
            pl.BlockSpec((25, 2 * C2, HID), lambda i: (0, 0, 0)),
            pl.BlockSpec((1, HID), lambda i: (0, 0)),
            pl.BlockSpec((1, HID), lambda i: (0, 0)),
            pl.BlockSpec((1, 1), lambda i: (0, 0)),
        ],
        out_specs=pl.BlockSpec((tb, 1), lambda i: (i, 0)),
        compiler_params=pltpu.CompilerParams(
            dimension_semantics=("parallel",),
            vmem_limit_bytes=32 * 1024 * 1024),
    )(patches, *ops)

    return out[:B]


def reference_forward(x, params):
    """Plain-JAX replica of the PyTorch forward (NCL layout) for validation."""
    w1, b1, w2, b2, wf1, bf1, wf2, bf2 = params
    B = x.shape[0]
    xpad = jnp.pad(x, ((0, 0), (1, 1)))                                      # (B, 202)
    y1 = sum(xpad[:, None, k:k + SEQ_LEN] * w1[None, :, 0, k, None] for k in range(3))
    y1 = y1 + b1[None, :, None]                                              # (B, 32, 200)
    p1 = jnp.max(jnp.maximum(y1, 0.0).reshape(B, C1, 100, 2), axis=-1)       # (B, 32, 100)
    p1pad = jnp.pad(p1, ((0, 0), (0, 0), (1, 1)))                            # (B, 32, 102)
    y2 = sum(jnp.einsum('bil,oi->bol', p1pad[:, :, k:k + 100], w2[:, :, k]) for k in range(3))
    y2 = y2 + b2[None, :, None]                                              # (B, 64, 100)
    p2 = jnp.max(jnp.maximum(y2, 0.0).reshape(B, C2, 50, 2), axis=-1)        # (B, 64, 50)
    feat = p2.reshape(B, C2 * 50)
    z = jnp.maximum(feat @ wf1.T + bf1, 0.0)
    o = z @ wf2.T + bf2
    return 1.0 / (1.0 + jnp.exp(-o))


def make_params(key):
    ks = jax.random.split(key, 8)

    def u(k, shape, fan_in):
        bound = 1.0 / np.sqrt(fan_in)
        return jax.random.uniform(k, shape, jnp.float32, -bound, bound)

    w1 = u(ks[0], (C1, 1, 3), 3)
    b1 = u(ks[1], (C1,), 3)
    w2 = u(ks[2], (C2, C1, 3), C1 * 3)
    b2 = u(ks[3], (C2,), C1 * 3)
    wf1 = u(ks[4], (HID, C2 * 50), C2 * 50)
    bf1 = u(ks[5], (HID,), C2 * 50)
    wf2 = u(ks[6], (1, HID), HID)
    bf2 = u(ks[7], (1,), HID)
    return (w1, b1, w2, b2, wf1, bf1, wf2, bf2)


if __name__ == "__main__":
    B = 16
    key = jax.random.PRNGKey(0)
    pkey, xkey = jax.random.split(key)
    params = make_params(pkey)
    x = jax.random.normal(xkey, (B, SEQ_LEN), jnp.float32)

    out = jax.block_until_ready(protein_cnn_forward(x, params))
    assert out.shape == (B, 1) and out.dtype == jnp.float32

    ref = jax.block_until_ready(reference_forward(x, params))
    np.testing.assert_allclose(np.asarray(out), np.asarray(ref), atol=2e-3, rtol=2e-3)

    print("KERNEL_OK")
</pallas_src>

<mosaic_0001>
module attributes {stable_mosaic.version = 11 : i64} {
  func.func @_fused_kernel(%arg0: i32, %arg1: memref<50x8x10xf32, #tpu.memory_space<vmem>>, %arg2: memref<10x256xf32, #tpu.memory_space<vmem>>, %arg3: memref<1x256xf32, #tpu.memory_space<vmem>>, %arg4: memref<128x128xf32, #tpu.memory_space<vmem>>, %arg5: memref<1x128xf32, #tpu.memory_space<vmem>>, %arg6: memref<25x128x128xf32, #tpu.memory_space<vmem>>, %arg7: memref<1x128xf32, #tpu.memory_space<vmem>>, %arg8: memref<1x128xf32, #tpu.memory_space<vmem>>, %arg9: memref<1x1xf32, #tpu.memory_space<vmem>>, %arg10: memref<8x1xf32, #tpu.memory_space<vmem>>) attributes {dimension_semantics = [#tpu.dimension_semantics<parallel>], iteration_bounds = array<i64: 2>, scalar_prefetch = 0 : i64, scratch_operands = 0 : i64, tpu.core_type = #tpu.core_type<tc>, window_params = [{transform_indices = @transform_0, window_bounds = array<i64: 50, 8, 10>}, {pipeline_mode = #tpu.pipeline_mode<synchronous>, transform_indices = @transform_1, window_bounds = array<i64: 10, 256>}, {pipeline_mode = #tpu.pipeline_mode<synchronous>, transform_indices = @transform_2, window_bounds = array<i64: 1, 256>}, {pipeline_mode = #tpu.pipeline_mode<synchronous>, transform_indices = @transform_3, window_bounds = array<i64: 128, 128>}, {pipeline_mode = #tpu.pipeline_mode<synchronous>, transform_indices = @transform_4, window_bounds = array<i64: 1, 128>}, {pipeline_mode = #tpu.pipeline_mode<synchronous>, transform_indices = @transform_5, window_bounds = array<i64: 25, 128, 128>}, {pipeline_mode = #tpu.pipeline_mode<synchronous>, transform_indices = @transform_6, window_bounds = array<i64: 1, 128>}, {pipeline_mode = #tpu.pipeline_mode<synchronous>, transform_indices = @transform_7, window_bounds = array<i64: 1, 128>}, {pipeline_mode = #tpu.pipeline_mode<synchronous>, transform_indices = @transform_8, window_bounds = array<i64: 1, 1>}, {transform_indices = @transform_9, window_bounds = array<i64: 8, 1>}]} {
    %c0 = arith.constant 0 : index
    %c0_0 = arith.constant 0 : index
    %c0_1 = arith.constant 0 : index
    %0 = vector.load %arg1[%c0, %c0_0, %c0_1] : memref<50x8x10xf32, #tpu.memory_space<vmem>>, vector<50x8x10xf32>
    %1 = vector.shape_cast %0 : vector<50x8x10xf32> to vector<400x10xf32>
    %c0_2 = arith.constant 0 : index
    %c0_3 = arith.constant 0 : index
    %2 = vector.load %arg2[%c0_2, %c0_3] : memref<10x256xf32, #tpu.memory_space<vmem>>, vector<10x256xf32>
    %cst = arith.constant dense<0.000000e+00> : vector<400x256xf32>
    %3 = tpu.matmul %1, %2, %cst {dimension_numbers = #tpu.dot_dimension_numbers<[1], [0], [0], [1], [0, 0, 1, 1], [], []>} : vector<400x10xf32>, vector<10x256xf32>, vector<400x256xf32> -> vector<400x256xf32>
    %c0_4 = arith.constant 0 : index
    %c0_5 = arith.constant 0 : index
    %4 = vector.load %arg3[%c0_4, %c0_5] : memref<1x256xf32, #tpu.memory_space<vmem>>, vector<1x256xf32>
    %5 = vector.broadcast %4 : vector<1x256xf32> to vector<400x256xf32>
    %6 = arith.addf %3, %5 : vector<400x256xf32>
    %7 = vector.extract_strided_slice %6 {offsets = [0, 0], sizes = [400, 128], strides = [1, 1]} : vector<400x256xf32> to vector<400x128xf32>
    %8 = vector.extract_strided_slice %6 {offsets = [0, 128], sizes = [400, 128], strides = [1, 1]} : vector<400x256xf32> to vector<400x128xf32>
    %9 = arith.maximumf %7, %8 : vector<400x128xf32>
    %cst_6 = arith.constant 0.000000e+00 : f32
    %10 = vector.broadcast %cst_6 : f32 to vector<400x128xf32>
    %11 = arith.maximumf %9, %10 : vector<400x128xf32>
    %12 = tpu.iota {dimensions = array<i32: 0>} : vector<400x128xi32>
    %13 = tpu.iota {dimensions = array<i32: 1>} : vector<400x128xi32>
    %c8_i32 = arith.constant 8 : i32
    %14 = vector.broadcast %c8_i32 : i32 to vector<400x128xi32>
    %15 = arith.cmpi slt, %12, %14 : vector<400x128xi32>
    %c32_i32 = arith.constant 32 : i32
    %16 = vector.broadcast %c32_i32 : i32 to vector<400x128xi32>
    %17 = arith.cmpi slt, %13, %16 : vector<400x128xi32>
    %18 = arith.andi %15, %17 : vector<400x128xi1>
    %c392_i32 = arith.constant 392 : i32
    %19 = vector.broadcast %c392_i32 : i32 to vector<400x128xi32>
    %20 = arith.cmpi sge, %12, %19 : vector<400x128xi32>
    %c96_i32 = arith.constant 96 : i32
    %21 = vector.broadcast %c96_i32 : i32 to vector<400x128xi32>
    %22 = arith.cmpi sge, %13, %21 : vector<400x128xi32>
    %23 = arith.andi %20, %22 : vector<400x128xi1>
    %24 = arith.ori %18, %23 : vector<400x128xi1>
    %cst_7 = arith.constant 0.000000e+00 : f32
    %25 = vector.broadcast %cst_7 : f32 to vector<400x128xf32>
    %26 = arith.select %24, %25, %11 : vector<400x128xi1>, vector<400x128xf32>
    %c0_8 = arith.constant 0 : index
    %c0_9 = arith.constant 0 : index
    %27 = vector.load %arg4[%c0_8, %c0_9] : memref<128x128xf32, #tpu.memory_space<vmem>>, vector<128x128xf32>
    %cst_10 = arith.constant dense<0.000000e+00> : vector<400x128xf32>
    %28 = tpu.matmul %26, %27, %cst_10 {dimension_numbers = #tpu.dot_dimension_numbers<[1], [0], [0], [1], [0, 0, 1, 1], [], []>} : vector<400x128xf32>, vector<128x128xf32>, vector<400x128xf32> -> vector<400x128xf32>
    %c0_11 = arith.constant 0 : index
    %c0_12 = arith.constant 0 : index
    %29 = vector.load %arg5[%c0_11, %c0_12] : memref<1x128xf32, #tpu.memory_space<vmem>>, vector<1x128xf32>
    %30 = vector.broadcast %29 : vector<1x128xf32> to vector<400x128xf32>
    %31 = arith.addf %28, %30 : vector<400x128xf32>
    %32 = vector.extract_strided_slice %31 {offsets = [0, 0], sizes = [400, 64], strides = [1, 1]} : vector<400x128xf32> to vector<400x64xf32>
    %33 = vector.extract_strided_slice %31 {offsets = [0, 64], sizes = [400, 64], strides = [1, 1]} : vector<400x128xf32> to vector<400x64xf32>
    %34 = arith.maximumf %32, %33 : vector<400x64xf32>
    %cst_13 = arith.constant 0.000000e+00 : f32
    %35 = vector.broadcast %cst_13 : f32 to vector<400x64xf32>
    %36 = arith.maximumf %34, %35 : vector<400x64xf32>
    %cst_14 = arith.constant 0.000000e+00 : f32
    %37 = vector.broadcast %cst_14 : f32 to vector<8x128xf32>
    %38 = vector.extract_strided_slice %36 {offsets = [0, 0], sizes = [8, 64], strides = [1, 1]} : vector<400x64xf32> to vector<8x64xf32>
    %39 = vector.extract_strided_slice %36 {offsets = [8, 0], sizes = [8, 64], strides = [1, 1]} : vector<400x64xf32> to vector<8x64xf32>
    %40 = tpu.concatenate %38, %39 in 1 : vector<8x64xf32>, vector<8x64xf32> -> vector<8x128xf32>
    %c0_15 = arith.constant 0 : index
    %c0_16 = arith.constant 0 : index
    %c0_17 = arith.constant 0 : index
    %41 = vector.load %arg6[%c0_15, %c0_16, %c0_17] : memref<25x128x128xf32, #tpu.memory_space<vmem>>, vector<1x128x128xf32>
    %42 = vector.shape_cast %41 : vector<1x128x128xf32> to vector<128x128xf32>
    %cst_18 = arith.constant dense<0.000000e+00> : vector<8x128xf32>
    %43 = tpu.matmul %40, %42, %cst_18 {dimension_numbers = #tpu.dot_dimension_numbers<[1], [0], [0], [1], [0, 0, 1, 1], [], []>} : vector<8x128xf32>, vector<128x128xf32>, vector<8x128xf32> -> vector<8x128xf32>
    %44 = arith.addf %37, %43 : vector<8x128xf32>
    %45 = vector.extract_strided_slice %36 {offsets = [16, 0], sizes = [8, 64], strides = [1, 1]} : vector<400x64xf32> to vector<8x64xf32>
    %46 = vector.extract_strided_slice %36 {offsets = [24, 0], sizes = [8, 64], strides = [1, 1]} : vector<400x64xf32> to vector<8x64xf32>
    %47 = tpu.concatenate %45, %46 in 1 : vector<8x64xf32>, vector<8x64xf32> -> vector<8x128xf32>
    %c1 = arith.constant 1 : index
    %c0_19 = arith.constant 0 : index
    %c0_20 = arith.constant 0 : index
    %48 = vector.load %arg6[%c1, %c0_19, %c0_20] : memref<25x128x128xf32, #tpu.memory_space<vmem>>, vector<1x128x128xf32>
    %49 = vector.shape_cast %48 : vector<1x128x128xf32> to vector<128x128xf32>
    %cst_21 = arith.constant dense<0.000000e+00> : vector<8x128xf32>
    %50 = tpu.matmul %47, %49, %cst_21 {dimension_numbers = #tpu.dot_dimension_numbers<[1], [0], [0], [1], [0, 0, 1, 1], [], []>} : vector<8x128xf32>, vector<128x128xf32>, vector<8x128xf32> -> vector<8x128xf32>
    %51 = arith.addf %44, %50 : vector<8x128xf32>
    %52 = vector.extract_strided_slice %36 {offsets = [32, 0], sizes = [8, 64], strides = [1, 1]} : vector<400x64xf32> to vector<8x64xf32>
    %53 = vector.extract_strided_slice %36 {offsets = [40, 0], sizes = [8, 64], strides = [1, 1]} : vector<400x64xf32> to vector<8x64xf32>
    %54 = tpu.concatenate %52, %53 in 1 : vector<8x64xf32>, vector<8x64xf32> -> vector<8x128xf32>
    %c2 = arith.constant 2 : index
    %c0_22 = arith.constant 0 : index
    %c0_23 = arith.constant 0 : index
    %55 = vector.load %arg6[%c2, %c0_22, %c0_23] : memref<25x128x128xf32, #tpu.memory_space<vmem>>, vector<1x128x128xf32>
    %56 = vector.shape_cast %55 : vector<1x128x128xf32> to vector<128x128xf32>
    %cst_24 = arith.constant dense<0.000000e+00> : vector<8x128xf32>
    %57 = tpu.matmul %54, %56, %cst_24 {dimension_numbers = #tpu.dot_dimension_numbers<[1], [0], [0], [1], [0, 0, 1, 1], [], []>} : vector<8x128xf32>, vector<128x128xf32>, vector<8x128xf32> -> vector<8x128xf32>
    %58 = arith.addf %51, %57 : vector<8x128xf32>
    %59 = vector.extract_strided_slice %36 {offsets = [48, 0], sizes = [8, 64], strides = [1, 1]} : vector<400x64xf32> to vector<8x64xf32>
    %60 = vector.extract_strided_slice %36 {offsets = [56, 0], sizes = [8, 64], strides = [1, 1]} : vector<400x64xf32> to vector<8x64xf32>
    %61 = tpu.concatenate %59, %60 in 1 : vector<8x64xf32>, vector<8x64xf32> -> vector<8x128xf32>
    %c3 = arith.constant 3 : index
    %c0_25 = arith.constant 0 : index
    %c0_26 = arith.constant 0 : index
    %62 = vector.load %arg6[%c3, %c0_25, %c0_26] : memref<25x128x128xf32, #tpu.memory_space<vmem>>, vector<1x128x128xf32>
    %63 = vector.shape_cast %62 : vector<1x128x128xf32> to vector<128x128xf32>
    %cst_27 = arith.constant dense<0.000000e+00> : vector<8x128xf32>
    %64 = tpu.matmul %61, %63, %cst_27 {dimension_numbers = #tpu.dot_dimension_numbers<[1], [0], [0], [1], [0, 0, 1, 1], [], []>} : vector<8x128xf32>, vector<128x128xf32>, vector<8x128xf32> -> vector<8x128xf32>
    %65 = arith.addf %58, %64 : vector<8x128xf32>
    %66 = vector.extract_strided_slice %36 {offsets = [64, 0], sizes = [8, 64], strides = [1, 1]} : vector<400x64xf32> to vector<8x64xf32>
    %67 = vector.extract_strided_slice %36 {offsets = [72, 0], sizes = [8, 64], strides = [1, 1]} : vector<400x64xf32> to vector<8x64xf32>
    %68 = tpu.concatenate %66, %67 in 1 : vector<8x64xf32>, vector<8x64xf32> -> vector<8x128xf32>
    %c4 = arith.constant 4 : index
    %c0_28 = arith.constant 0 : index
    %c0_29 = arith.constant 0 : index
    %69 = vector.load %arg6[%c4, %c0_28, %c0_29] : memref<25x128x128xf32, #tpu.memory_space<vmem>>, vector<1x128x128xf32>
    %70 = vector.shape_cast %69 : vector<1x128x128xf32> to vector<128x128xf32>
    %cst_30 = arith.constant dense<0.000000e+00> : vector<8x128xf32>
    %71 = tpu.matmul %68, %70, %cst_30 {dimension_numbers = #tpu.dot_dimension_numbers<[1], [0], [0], [1], [0, 0, 1, 1], [], []>} : vector<8x128xf32>, vector<128x128xf32>, vector<8x128xf32> -> vector<8x128xf32>
    %72 = arith.addf %65, %71 : vector<8x128xf32>
    %73 = vector.extract_strided_slice %36 {offsets = [80, 0], sizes = [8, 64], strides = [1, 1]} : vector<400x64xf32> to vector<8x64xf32>
    %74 = vector.extract_strided_slice %36 {offsets = [88, 0], sizes = [8, 64], strides = [1, 1]} : vector<400x64xf32> to vector<8x64xf32>
    %75 = tpu.concatenate %73, %74 in 1 : vector<8x64xf32>, vector<8x64xf32> -> vector<8x128xf32>
    %c5 = arith.constant 5 : index
    %c0_31 = arith.constant 0 : index
    %c0_32 = arith.constant 0 : index
    %76 = vector.load %arg6[%c5, %c0_31, %c0_32] : memref<25x128x128xf32, #tpu.memory_space<vmem>>, vector<1x128x128xf32>
    %77 = vector.shape_cast %76 : vector<1x128x128xf32> to vector<128x128xf32>
    %cst_33 = arith.constant dense<0.000000e+00> : vector<8x128xf32>
    %78 = tpu.matmul %75, %77, %cst_33 {dimension_numbers = #tpu.dot_dimension_numbers<[1], [0], [0], [1], [0, 0, 1, 1], [], []>} : vector<8x128xf32>, vector<128x128xf32>, vector<8x128xf32> -> vector<8x128xf32>
    %79 = arith.addf %72, %78 : vector<8x128xf32>
    %80 = vector.extract_strided_slice %36 {offsets = [96, 0], sizes = [8, 64], strides = [1, 1]} : vector<400x64xf32> to vector<8x64xf32>
    %81 = vector.extract_strided_slice %36 {offsets = [104, 0], sizes = [8, 64], strides = [1, 1]} : vector<400x64xf32> to vector<8x64xf32>
    %82 = tpu.concatenate %80, %81 in 1 : vector<8x64xf32>, vector<8x64xf32> -> vector<8x128xf32>
    %c6 = arith.constant 6 : index
    %c0_34 = arith.constant 0 : index
    %c0_35 = arith.constant 0 : index
    %83 = vector.load %arg6[%c6, %c0_34, %c0_35] : memref<25x128x128xf32, #tpu.memory_space<vmem>>, vector<1x128x128xf32>
    %84 = vector.shape_cast %83 : vector<1x128x128xf32> to vector<128x128xf32>
    %cst_36 = arith.constant dense<0.000000e+00> : vector<8x128xf32>
    %85 = tpu.matmul %82, %84, %cst_36 {dimension_numbers = #tpu.dot_dimension_numbers<[1], [0], [0], [1], [0, 0, 1, 1], [], []>} : vector<8x128xf32>, vector<128x128xf32>, vector<8x128xf32> -> vector<8x128xf32>
    %86 = arith.addf %79, %85 : vector<8x128xf32>
    %87 = vector.extract_strided_slice %36 {offsets = [112, 0], sizes = [8, 64], strides = [1, 1]} : vector<400x64xf32> to vector<8x64xf32>
    %88 = vector.extract_strided_slice %36 {offsets = [120, 0], sizes = [8, 64], strides = [1, 1]} : vector<400x64xf32> to vector<8x64xf32>
    %89 = tpu.concatenate %87, %88 in 1 : vector<8x64xf32>, vector<8x64xf32> -> vector<8x128xf32>
    %c7 = arith.constant 7 : index
    %c0_37 = arith.constant 0 : index
    %c0_38 = arith.constant 0 : index
    %90 = vector.load %arg6[%c7, %c0_37, %c0_38] : memref<25x128x128xf32, #tpu.memory_space<vmem>>, vector<1x128x128xf32>
    %91 = vector.shape_cast %90 : vector<1x128x128xf32> to vector<128x128xf32>
    %cst_39 = arith.constant dense<0.000000e+00> : vector<8x128xf32>
    %92 = tpu.matmul %89, %91, %cst_39 {dimension_numbers = #tpu.dot_dimension_numbers<[1], [0], [0], [1], [0, 0, 1, 1], [], []>} : vector<8x128xf32>, vector<128x128xf32>, vector<8x128xf32> -> vector<8x128xf32>
    %93 = arith.addf %86, %92 : vector<8x128xf32>
    %94 = vector.extract_strided_slice %36 {offsets = [128, 0], sizes = [8, 64], strides = [1, 1]} : vector<400x64xf32> to vector<8x64xf32>
    %95 = vector.extract_strided_slice %36 {offsets = [136, 0], sizes = [8, 64], strides = [1, 1]} : vector<400x64xf32> to vector<8x64xf32>
    %96 = tpu.concatenate %94, %95 in 1 : vector<8x64xf32>, vector<8x64xf32> -> vector<8x128xf32>
    %c8 = arith.constant 8 : index
    %c0_40 = arith.constant 0 : index
    %c0_41 = arith.constant 0 : index
    %97 = vector.load %arg6[%c8, %c0_40, %c0_41] : memref<25x128x128xf32, #tpu.memory_space<vmem>>, vector<1x128x128xf32>
    %98 = vector.shape_cast %97 : vector<1x128x128xf32> to vector<128x128xf32>
    %cst_42 = arith.constant dense<0.000000e+00> : vector<8x128xf32>
    %99 = tpu.matmul %96, %98, %cst_42 {dimension_numbers = #tpu.dot_dimension_numbers<[1], [0], [0], [1], [0, 0, 1, 1], [], []>} : vector<8x128xf32>, vector<128x128xf32>, vector<8x128xf32> -> vector<8x128xf32>
    %100 = arith.addf %93, %99 : vector<8x128xf32>
    %101 = vector.extract_strided_slice %36 {offsets = [144, 0], sizes = [8, 64], strides = [1, 1]} : vector<400x64xf32> to vector<8x64xf32>
    %102 = vector.extract_strided_slice %36 {offsets = [152, 0], sizes = [8, 64], strides = [1, 1]} : vector<400x64xf32> to vector<8x64xf32>
    %103 = tpu.concatenate %101, %102 in 1 : vector<8x64xf32>, vector<8x64xf32> -> vector<8x128xf32>
    %c9 = arith.constant 9 : index
    %c0_43 = arith.constant 0 : index
    %c0_44 = arith.constant 0 : index
    %104 = vector.load %arg6[%c9, %c0_43, %c0_44] : memref<25x128x128xf32, #tpu.memory_space<vmem>>, vector<1x128x128xf32>
    %105 = vector.shape_cast %104 : vector<1x128x128xf32> to vector<128x128xf32>
    %cst_45 = arith.constant dense<0.000000e+00> : vector<8x128xf32>
    %106 = tpu.matmul %103, %105, %cst_45 {dimension_numbers = #tpu.dot_dimension_numbers<[1], [0], [0], [1], [0, 0, 1, 1], [], []>} : vector<8x128xf32>, vector<128x128xf32>, vector<8x128xf32> -> vector<8x128xf32>
    %107 = arith.addf %100, %106 : vector<8x128xf32>
    %108 = vector.extract_strided_slice %36 {offsets = [160, 0], sizes = [8, 64], strides = [1, 1]} : vector<400x64xf32> to vector<8x64xf32>
    %109 = vector.extract_strided_slice %36 {offsets = [168, 0], sizes = [8, 64], strides = [1, 1]} : vector<400x64xf32> to vector<8x64xf32>
    %110 = tpu.concatenate %108, %109 in 1 : vector<8x64xf32>, vector<8x64xf32> -> vector<8x128xf32>
    %c10 = arith.constant 10 : index
    %c0_46 = arith.constant 0 : index
    %c0_47 = arith.constant 0 : index
    %111 = vector.load %arg6[%c10, %c0_46, %c0_47] : memref<25x128x128xf32, #tpu.memory_space<vmem>>, vector<1x128x128xf32>
    %112 = vector.shape_cast %111 : vector<1x128x128xf32> to vector<128x128xf32>
    %cst_48 = arith.constant dense<0.000000e+00> : vector<8x128xf32>
    %113 = tpu.matmul %110, %112, %cst_48 {dimension_numbers = #tpu.dot_dimension_numbers<[1], [0], [0], [1], [0, 0, 1, 1], [], []>} : vector<8x128xf32>, vector<128x128xf32>, vector<8x128xf32> -> vector<8x128xf32>
    %114 = arith.addf %107, %113 : vector<8x128xf32>
    %115 = vector.extract_strided_slice %36 {offsets = [176, 0], sizes = [8, 64], strides = [1, 1]} : vector<400x64xf32> to vector<8x64xf32>
    %116 = vector.extract_strided_slice %36 {offsets = [184, 0], sizes = [8, 64], strides = [1, 1]} : vector<400x64xf32> to vector<8x64xf32>
    %117 = tpu.concatenate %115, %116 in 1 : vector<8x64xf32>, vector<8x64xf32> -> vector<8x128xf32>
    %c11 = arith.constant 11 : index
    %c0_49 = arith.constant 0 : index
    %c0_50 = arith.constant 0 : index
    %118 = vector.load %arg6[%c11, %c0_49, %c0_50] : memref<25x128x128xf32, #tpu.memory_space<vmem>>, vector<1x128x128xf32>
    %119 = vector.shape_cast %118 : vector<1x128x128xf32> to vector<128x128xf32>
    %cst_51 = arith.constant dense<0.000000e+00> : vector<8x128xf32>
    %120 = tpu.matmul %117, %119, %cst_51 {dimension_numbers = #tpu.dot_dimension_numbers<[1], [0], [0], [1], [0, 0, 1, 1], [], []>} : vector<8x128xf32>, vector<128x128xf32>, vector<8x128xf32> -> vector<8x128xf32>
    %121 = arith.addf %114, %120 : vector<8x128xf32>
    %122 = vector.extract_strided_slice %36 {offsets = [192, 0], sizes = [8, 64], strides = [1, 1]} : vector<400x64xf32> to vector<8x64xf32>
    %123 = vector.extract_strided_slice %36 {offsets = [200, 0], sizes = [8, 64], strides = [1, 1]} : vector<400x64xf32> to vector<8x64xf32>
    %124 = tpu.concatenate %122, %123 in 1 : vector<8x64xf32>, vector<8x64xf32> -> vector<8x128xf32>
    %c12 = arith.constant 12 : index
    %c0_52 = arith.constant 0 : index
    %c0_53 = arith.constant 0 : index
    %125 = vector.load %arg6[%c12, %c0_52, %c0_53] : memref<25x128x128xf32, #tpu.memory_space<vmem>>, vector<1x128x128xf32>
    %126 = vector.shape_cast %125 : vector<1x128x128xf32> to vector<128x128xf32>
    %cst_54 = arith.constant dense<0.000000e+00> : vector<8x128xf32>
    %127 = tpu.matmul %124, %126, %cst_54 {dimension_numbers = #tpu.dot_dimension_numbers<[1], [0], [0], [1], [0, 0, 1, 1], [], []>} : vector<8x128xf32>, vector<128x128xf32>, vector<8x128xf32> -> vector<8x128xf32>
    %128 = arith.addf %121, %127 : vector<8x128xf32>
    %129 = vector.extract_strided_slice %36 {offsets = [208, 0], sizes = [8, 64], strides = [1, 1]} : vector<400x64xf32> to vector<8x64xf32>
    %130 = vector.extract_strided_slice %36 {offsets = [216, 0], sizes = [8, 64], strides = [1, 1]} : vector<400x64xf32> to vector<8x64xf32>
    %131 = tpu.concatenate %129, %130 in 1 : vector<8x64xf32>, vector<8x64xf32> -> vector<8x128xf32>
    %c13 = arith.constant 13 : index
    %c0_55 = arith.constant 0 : index
    %c0_56 = arith.constant 0 : index
    %132 = vector.load %arg6[%c13, %c0_55, %c0_56] : memref<25x128x128xf32, #tpu.memory_space<vmem>>, vector<1x128x128xf32>
    %133 = vector.shape_cast %132 : vector<1x128x128xf32> to vector<128x128xf32>
    %cst_57 = arith.constant dense<0.000000e+00> : vector<8x128xf32>
    %134 = tpu.matmul %131, %133, %cst_57 {dimension_numbers = #tpu.dot_dimension_numbers<[1], [0], [0], [1], [0, 0, 1, 1], [], []>} : vector<8x128xf32>, vector<128x128xf32>, vector<8x128xf32> -> vector<8x128xf32>
    %135 = arith.addf %128, %134 : vector<8x128xf32>
    %136 = vector.extract_strided_slice %36 {offsets = [224, 0], sizes = [8, 64], strides = [1, 1]} : vector<400x64xf32> to vector<8x64xf32>
    %137 = vector.extract_strided_slice %36 {offsets = [232, 0], sizes = [8, 64], strides = [1, 1]} : vector<400x64xf32> to vector<8x64xf32>
    %138 = tpu.concatenate %136, %137 in 1 : vector<8x64xf32>, vector<8x64xf32> -> vector<8x128xf32>
    %c14 = arith.constant 14 : index
    %c0_58 = arith.constant 0 : index
    %c0_59 = arith.constant 0 : index
    %139 = vector.load %arg6[%c14, %c0_58, %c0_59] : memref<25x128x128xf32, #tpu.memory_space<vmem>>, vector<1x128x128xf32>
    %140 = vector.shape_cast %139 : vector<1x128x128xf32> to vector<128x128xf32>
    %cst_60 = arith.constant dense<0.000000e+00> : vector<8x128xf32>
    %141 = tpu.matmul %138, %140, %cst_60 {dimension_numbers = #tpu.dot_dimension_numbers<[1], [0], [0], [1], [0, 0, 1, 1], [], []>} : vector<8x128xf32>, vector<128x128xf32>, vector<8x128xf32> -> vector<8x128xf32>
    %142 = arith.addf %135, %141 : vector<8x128xf32>
    %143 = vector.extract_strided_slice %36 {offsets = [240, 0], sizes = [8, 64], strides = [1, 1]} : vector<400x64xf32> to vector<8x64xf32>
    %144 = vector.extract_strided_slice %36 {offsets = [248, 0], sizes = [8, 64], strides = [1, 1]} : vector<400x64xf32> to vector<8x64xf32>
    %145 = tpu.concatenate %143, %144 in 1 : vector<8x64xf32>, vector<8x64xf32> -> vector<8x128xf32>
    %c15 = arith.constant 15 : index
    %c0_61 = arith.constant 0 : index
    %c0_62 = arith.constant 0 : index
    %146 = vector.load %arg6[%c15, %c0_61, %c0_62] : memref<25x128x128xf32, #tpu.memory_space<vmem>>, vector<1x128x128xf32>
    %147 = vector.shape_cast %146 : vector<1x128x128xf32> to vector<128x128xf32>
    %cst_63 = arith.constant dense<0.000000e+00> : vector<8x128xf32>
    %148 = tpu.matmul %145, %147, %cst_63 {dimension_numbers = #tpu.dot_dimension_numbers<[1], [0], [0], [1], [0, 0, 1, 1], [], []>} : vector<8x128xf32>, vector<128x128xf32>, vector<8x128xf32> -> vector<8x128xf32>
    %149 = arith.addf %142, %148 : vector<8x128xf32>
    %150 = vector.extract_strided_slice %36 {offsets = [256, 0], sizes = [8, 64], strides = [1, 1]} : vector<400x64xf32> to vector<8x64xf32>
    %151 = vector.extract_strided_slice %36 {offsets = [264, 0], sizes = [8, 64], strides = [1, 1]} : vector<400x64xf32> to vector<8x64xf32>
    %152 = tpu.concatenate %150, %151 in 1 : vector<8x64xf32>, vector<8x64xf32> -> vector<8x128xf32>
    %c16 = arith.constant 16 : index
    %c0_64 = arith.constant 0 : index
    %c0_65 = arith.constant 0 : index
    %153 = vector.load %arg6[%c16, %c0_64, %c0_65] : memref<25x128x128xf32, #tpu.memory_space<vmem>>, vector<1x128x128xf32>
    %154 = vector.shape_cast %153 : vector<1x128x128xf32> to vector<128x128xf32>
    %cst_66 = arith.constant dense<0.000000e+00> : vector<8x128xf32>
    %155 = tpu.matmul %152, %154, %cst_66 {dimension_numbers = #tpu.dot_dimension_numbers<[1], [0], [0], [1], [0, 0, 1, 1], [], []>} : vector<8x128xf32>, vector<128x128xf32>, vector<8x128xf32> -> vector<8x128xf32>
    %156 = arith.addf %149, %155 : vector<8x128xf32>
    %157 = vector.extract_strided_slice %36 {offsets = [272, 0], sizes = [8, 64], strides = [1, 1]} : vector<400x64xf32> to vector<8x64xf32>
    %158 = vector.extract_strided_slice %36 {offsets = [280, 0], sizes = [8, 64], strides = [1, 1]} : vector<400x64xf32> to vector<8x64xf32>
    %159 = tpu.concatenate %157, %158 in 1 : vector<8x64xf32>, vector<8x64xf32> -> vector<8x128xf32>
    %c17 = arith.constant 17 : index
    %c0_67 = arith.constant 0 : index
    %c0_68 = arith.constant 0 : index
    %160 = vector.load %arg6[%c17, %c0_67, %c0_68] : memref<25x128x128xf32, #tpu.memory_space<vmem>>, vector<1x128x128xf32>
    %161 = vector.shape_cast %160 : vector<1x128x128xf32> to vector<128x128xf32>
    %cst_69 = arith.constant dense<0.000000e+00> : vector<8x128xf32>
    %162 = tpu.matmul %159, %161, %cst_69 {dimension_numbers = #tpu.dot_dimension_numbers<[1], [0], [0], [1], [0, 0, 1, 1], [], []>} : vector<8x128xf32>, vector<128x128xf32>, vector<8x128xf32> -> vector<8x128xf32>
    %163 = arith.addf %156, %162 : vector<8x128xf32>
    %164 = vector.extract_strided_slice %36 {offsets = [288, 0], sizes = [8, 64], strides = [1, 1]} : vector<400x64xf32> to vector<8x64xf32>
    %165 = vector.extract_strided_slice %36 {offsets = [296, 0], sizes = [8, 64], strides = [1, 1]} : vector<400x64xf32> to vector<8x64xf32>
    %166 = tpu.concatenate %164, %165 in 1 : vector<8x64xf32>, vector<8x64xf32> -> vector<8x128xf32>
    %c18 = arith.constant 18 : index
    %c0_70 = arith.constant 0 : index
    %c0_71 = arith.constant 0 : index
    %167 = vector.load %arg6[%c18, %c0_70, %c0_71] : memref<25x128x128xf32, #tpu.memory_space<vmem>>, vector<1x128x128xf32>
    %168 = vector.shape_cast %167 : vector<1x128x128xf32> to vector<128x128xf32>
    %cst_72 = arith.constant dense<0.000000e+00> : vector<8x128xf32>
    %169 = tpu.matmul %166, %168, %cst_72 {dimension_numbers = #tpu.dot_dimension_numbers<[1], [0], [0], [1], [0, 0, 1, 1], [], []>} : vector<8x128xf32>, vector<128x128xf32>, vector<8x128xf32> -> vector<8x128xf32>
    %170 = arith.addf %163, %169 : vector<8x128xf32>
    %171 = vector.extract_strided_slice %36 {offsets = [304, 0], sizes = [8, 64], strides = [1, 1]} : vector<400x64xf32> to vector<8x64xf32>
    %172 = vector.extract_strided_slice %36 {offsets = [312, 0], sizes = [8, 64], strides = [1, 1]} : vector<400x64xf32> to vector<8x64xf32>
    %173 = tpu.concatenate %171, %172 in 1 : vector<8x64xf32>, vector<8x64xf32> -> vector<8x128xf32>
    %c19 = arith.constant 19 : index
    %c0_73 = arith.constant 0 : index
    %c0_74 = arith.constant 0 : index
    %174 = vector.load %arg6[%c19, %c0_73, %c0_74] : memref<25x128x128xf32, #tpu.memory_space<vmem>>, vector<1x128x128xf32>
    %175 = vector.shape_cast %174 : vector<1x128x128xf32> to vector<128x128xf32>
    %cst_75 = arith.constant dense<0.000000e+00> : vector<8x128xf32>
    %176 = tpu.matmul %173, %175, %cst_75 {dimension_numbers = #tpu.dot_dimension_numbers<[1], [0], [0], [1], [0, 0, 1, 1], [], []>} : vector<8x128xf32>, vector<128x128xf32>, vector<8x128xf32> -> vector<8x128xf32>
    %177 = arith.addf %170, %176 : vector<8x128xf32>
    %178 = vector.extract_strided_slice %36 {offsets = [320, 0], sizes = [8, 64], strides = [1, 1]} : vector<400x64xf32> to vector<8x64xf32>
    %179 = vector.extract_strided_slice %36 {offsets = [328, 0], sizes = [8, 64], strides = [1, 1]} : vector<400x64xf32> to vector<8x64xf32>
    %180 = tpu.concatenate %178, %179 in 1 : vector<8x64xf32>, vector<8x64xf32> -> vector<8x128xf32>
    %c20 = arith.constant 20 : index
    %c0_76 = arith.constant 0 : index
    %c0_77 = arith.constant 0 : index
    %181 = vector.load %arg6[%c20, %c0_76, %c0_77] : memref<25x128x128xf32, #tpu.memory_space<vmem>>, vector<1x128x128xf32>
    %182 = vector.shape_cast %181 : vector<1x128x128xf32> to vector<128x128xf32>
    %cst_78 = arith.constant dense<0.000000e+00> : vector<8x128xf32>
    %183 = tpu.matmul %180, %182, %cst_78 {dimension_numbers = #tpu.dot_dimension_numbers<[1], [0], [0], [1], [0, 0, 1, 1], [], []>} : vector<8x128xf32>, vector<128x128xf32>, vector<8x128xf32> -> vector<8x128xf32>
    %184 = arith.addf %177, %183 : vector<8x128xf32>
    %185 = vector.extract_strided_slice %36 {offsets = [336, 0], sizes = [8, 64], strides = [1, 1]} : vector<400x64xf32> to vector<8x64xf32>
    %186 = vector.extract_strided_slice %36 {offsets = [344, 0], sizes = [8, 64], strides = [1, 1]} : vector<400x64xf32> to vector<8x64xf32>
    %187 = tpu.concatenate %185, %186 in 1 : vector<8x64xf32>, vector<8x64xf32> -> vector<8x128xf32>
    %c21 = arith.constant 21 : index
    %c0_79 = arith.constant 0 : index
    %c0_80 = arith.constant 0 : index
    %188 = vector.load %arg6[%c21, %c0_79, %c0_80] : memref<25x128x128xf32, #tpu.memory_space<vmem>>, vector<1x128x128xf32>
    %189 = vector.shape_cast %188 : vector<1x128x128xf32> to vector<128x128xf32>
    %cst_81 = arith.constant dense<0.000000e+00> : vector<8x128xf32>
    %190 = tpu.matmul %187, %189, %cst_81 {dimension_numbers = #tpu.dot_dimension_numbers<[1], [0], [0], [1], [0, 0, 1, 1], [], []>} : vector<8x128xf32>, vector<128x128xf32>, vector<8x128xf32> -> vector<8x128xf32>
    %191 = arith.addf %184, %190 : vector<8x128xf32>
    %192 = vector.extract_strided_slice %36 {offsets = [352, 0], sizes = [8, 64], strides = [1, 1]} : vector<400x64xf32> to vector<8x64xf32>
    %193 = vector.extract_strided_slice %36 {offsets = [360, 0], sizes = [8, 64], strides = [1, 1]} : vector<400x64xf32> to vector<8x64xf32>
    %194 = tpu.concatenate %192, %193 in 1 : vector<8x64xf32>, vector<8x64xf32> -> vector<8x128xf32>
    %c22 = arith.constant 22 : index
    %c0_82 = arith.constant 0 : index
    %c0_83 = arith.constant 0 : index
    %195 = vector.load %arg6[%c22, %c0_82, %c0_83] : memref<25x128x128xf32, #tpu.memory_space<vmem>>, vector<1x128x128xf32>
    %196 = vector.shape_cast %195 : vector<1x128x128xf32> to vector<128x128xf32>
    %cst_84 = arith.constant dense<0.000000e+00> : vector<8x128xf32>
    %197 = tpu.matmul %194, %196, %cst_84 {dimension_numbers = #tpu.dot_dimension_numbers<[1], [0], [0], [1], [0, 0, 1, 1], [], []>} : vector<8x128xf32>, vector<128x128xf32>, vector<8x128xf32> -> vector<8x128xf32>
    %198 = arith.addf %191, %197 : vector<8x128xf32>
    %199 = vector.extract_strided_slice %36 {offsets = [368, 0], sizes = [8, 64], strides = [1, 1]} : vector<400x64xf32> to vector<8x64xf32>
    %200 = vector.extract_strided_slice %36 {offsets = [376, 0], sizes = [8, 64], strides = [1, 1]} : vector<400x64xf32> to vector<8x64xf32>
    %201 = tpu.concatenate %199, %200 in 1 : vector<8x64xf32>, vector<8x64xf32> -> vector<8x128xf32>
    %c23 = arith.constant 23 : index
    %c0_85 = arith.constant 0 : index
    %c0_86 = arith.constant 0 : index
    %202 = vector.load %arg6[%c23, %c0_85, %c0_86] : memref<25x128x128xf32, #tpu.memory_space<vmem>>, vector<1x128x128xf32>
    %203 = vector.shape_cast %202 : vector<1x128x128xf32> to vector<128x128xf32>
    %cst_87 = arith.constant dense<0.000000e+00> : vector<8x128xf32>
    %204 = tpu.matmul %201, %203, %cst_87 {dimension_numbers = #tpu.dot_dimension_numbers<[1], [0], [0], [1], [0, 0, 1, 1], [], []>} : vector<8x128xf32>, vector<128x128xf32>, vector<8x128xf32> -> vector<8x128xf32>
    %205 = arith.addf %198, %204 : vector<8x128xf32>
    %206 = vector.extract_strided_slice %36 {offsets = [384, 0], sizes = [8, 64], strides = [1, 1]} : vector<400x64xf32> to vector<8x64xf32>
    %207 = vector.extract_strided_slice %36 {offsets = [392, 0], sizes = [8, 64], strides = [1, 1]} : vector<400x64xf32> to vector<8x64xf32>
    %208 = tpu.concatenate %206, %207 in 1 : vector<8x64xf32>, vector<8x64xf32> -> vector<8x128xf32>
    %c24 = arith.constant 24 : index
    %c0_88 = arith.constant 0 : index
    %c0_89 = arith.constant 0 : index
    %209 = vector.load %arg6[%c24, %c0_88, %c0_89] : memref<25x128x128xf32, #tpu.memory_space<vmem>>, vector<1x128x128xf32>
    %210 = vector.shape_cast %209 : vector<1x128x128xf32> to vector<128x128xf32>
    %cst_90 = arith.constant dense<0.000000e+00> : vector<8x128xf32>
    %211 = tpu.matmul %208, %210, %cst_90 {dimension_numbers = #tpu.dot_dimension_numbers<[1], [0], [0], [1], [0, 0, 1, 1], [], []>} : vector<8x128xf32>, vector<128x128xf32>, vector<8x128xf32> -> vector<8x128xf32>
    %212 = arith.addf %205, %211 : vector<8x128xf32>
    %c0_91 = arith.constant 0 : index
    %c0_92 = arith.constant 0 : index
    %213 = vector.load %arg7[%c0_91, %c0_92] : memref<1x128xf32, #tpu.memory_space<vmem>>, vector<1x128xf32>
    %214 = vector.broadcast %213 : vector<1x128xf32> to vector<8x128xf32>
    %215 = arith.addf %212, %214 : vector<8x128xf32>
    %cst_93 = arith.constant 0.000000e+00 : f32
    %216 = vector.broadcast %cst_93 : f32 to vector<8x128xf32>
    %217 = arith.maximumf %215, %216 : vector<8x128xf32>
    %c0_94 = arith.constant 0 : index
    %c0_95 = arith.constant 0 : index
    %218 = vector.load %arg8[%c0_94, %c0_95] : memref<1x128xf32, #tpu.memory_space<vmem>>, vector<1x128xf32>
    %219 = vector.broadcast %218 : vector<1x128xf32> to vector<8x128xf32>
    %220 = arith.mulf %217, %219 : vector<8x128xf32>
    %cst_96 = arith.constant dense<0.000000e+00> : vector<8xf32>
    %221 = vector.multi_reduction <add>, %220, %cst_96 [1] : vector<8x128xf32> to vector<8xf32>
    %222 = vector.shape_cast %221 : vector<8xf32> to vector<8x1xf32>
    %c0_97 = arith.constant 0 : index
    %c0_98 = arith.constant 0 : index
    %223 = vector.load %arg9[%c0_97, %c0_98] : memref<1x1xf32, #tpu.memory_space<vmem>>, vector<1x1xf32>
    %224 = vector.broadcast %223 : vector<1x1xf32> to vector<8x1xf32>
    %225 = arith.addf %222, %224 : vector<8x1xf32>
    %cst_99 = arith.constant 0.000000e+00 : f32
    %226 = vector.broadcast %cst_99 : f32 to vector<8x1xf32>
    %227 = arith.subf %226, %225 : vector<8x1xf32>
    %228 = math.exp %227 : vector<8x1xf32>
    %cst_100 = arith.constant 1.000000e+00 : f32
    %229 = vector.broadcast %cst_100 : f32 to vector<8x1xf32>
    %230 = arith.addf %229, %228 : vector<8x1xf32>
    %cst_101 = arith.constant 1.000000e+00 : f32
    %231 = vector.broadcast %cst_101 : f32 to vector<8x1xf32>
    %232 = arith.divf %231, %230 : vector<8x1xf32>
    %c0_102 = arith.constant 0 : index
    %c0_103 = arith.constant 0 : index
    %233 = vector.load %arg10[%c0_102, %c0_103] : memref<8x1xf32, #tpu.memory_space<vmem>>, vector<8x1xf32>
    tpu.vector_store %arg10[%c0_102, %c0_103], %232 {strides = array<i32>} : memref<8x1xf32, #tpu.memory_space<vmem>>, vector<8x1xf32>,
    return
  }
  func.func @transform_0(%arg0: i32) -> (i32, i32, i32) {
    %c0_i32 = arith.constant 0 : i32
    %c0_i32_0 = arith.constant 0 : i32
    %c0_i32_1 = arith.constant 0 : i32
    return %c0_i32, %arg0, %c0_i32_0 : i32, i32, i32
  }
  func.func @transform_1(%arg0: i32) -> (i32, i32) {
    %c0_i32 = arith.constant 0 : i32
    %c0_i32_0 = arith.constant 0 : i32
    %c0_i32_1 = arith.constant 0 : i32
    return %c0_i32, %c0_i32_0 : i32, i32
  }
  func.func @transform_2(%arg0: i32) -> (i32, i32) {
    %c0_i32 = arith.constant 0 : i32
    %c0_i32_0 = arith.constant 0 : i32
    %c0_i32_1 = arith.constant 0 : i32
    return %c0_i32, %c0_i32_0 : i32, i32
  }
  func.func @transform_3(%arg0: i32) -> (i32, i32) {
    %c0_i32 = arith.constant 0 : i32
    %c0_i32_0 = arith.constant 0 : i32
    %c0_i32_1 = arith.constant 0 : i32
    return %c0_i32, %c0_i32_0 : i32, i32
  }
  func.func @transform_4(%arg0: i32) -> (i32, i32) {
    %c0_i32 = arith.constant 0 : i32
    %c0_i32_0 = arith.constant 0 : i32
    %c0_i32_1 = arith.constant 0 : i32
    return %c0_i32, %c0_i32_0 : i32, i32
  }
  func.func @transform_5(%arg0: i32) -> (i32, i32, i32) {
    %c0_i32 = arith.constant 0 : i32
    %c0_i32_0 = arith.constant 0 : i32
    %c0_i32_1 = arith.constant 0 : i32
    %c0_i32_2 = arith.constant 0 : i32
    return %c0_i32, %c0_i32_0, %c0_i32_1 : i32, i32, i32
  }
  func.func @transform_6(%arg0: i32) -> (i32, i32) {
    %c0_i32 = arith.constant 0 : i32
    %c0_i32_0 = arith.constant 0 : i32
    %c0_i32_1 = arith.constant 0 : i32
    return %c0_i32, %c0_i32_0 : i32, i32
  }
  func.func @transform_7(%arg0: i32) -> (i32, i32) {
    %c0_i32 = arith.constant 0 : i32
    %c0_i32_0 = arith.constant 0 : i32
    %c0_i32_1 = arith.constant 0 : i32
    return %c0_i32, %c0_i32_0 : i32, i32
  }
  func.func @transform_8(%arg0: i32) -> (i32, i32) {
    %c0_i32 = arith.constant 0 : i32
    %c0_i32_0 = arith.constant 0 : i32
    %c0_i32_1 = arith.constant 0 : i32
    return %c0_i32, %c0_i32_0 : i32, i32
  }
  func.func @transform_9(%arg0: i32) -> (i32, i32) {
    %c0_i32 = arith.constant 0 : i32
    %c0_i32_0 = arith.constant 0 : i32
    return %arg0, %c0_i32 : i32, i32
  }
}

</mosaic_0001>

<bundles_post_ra>
// kernel: tile.8
= control target key start
LH: loop header
LB: loop body
LE: loop exit
PB: predicated region body
PF: predicated region fallthrough
CT: control target
= control target key end

     0   :  { %s22_s0 = inlined_call_operand.vmem [shape: f32[32], index: 0, kind: input, shape index: {}]   ;;  %s23_s1 = inlined_call_operand.vmem [shape: f32[8,32], index: 1, kind: output, shape index: {}]  }
   0x1   :  { %v4_v0 = vld [vmem:[%s22_s0] ss:$0 sm:$0xff] }
   0x2   :  { %5 = vst [vmem:[%s23_s1] sm:$0xff] %v4_v0 }

// kernel: tile.9
= control target key start
LH: loop header
LB: loop body
LE: loop exit
PB: predicated region body
PF: predicated region fallthrough
CT: control target
= control target key end

     0   :  { %s7_s6 = smov 3  ;;  %s46_s9 = smov 96   ;;  %vm4_vm0 = vcmask 261120   ;;  %vm11_vm1 = vcmask 1048320   ;;  %vm18_vm2 = vcmask 785920   ;;  %vm25_vm3 = vcmask 523520   ;;  %s77_s0 = inlined_call_operand.vmem [shape: f32[8,32], index: 0, kind: input, shape index: {}]   ;;  %s78_s1 = inlined_call_operand.vmem [shape: f32[1,256], index: 1, kind: output, shape index: {}]  }
   0x1   :  { %v39_v0 = vld [vmem:[%s77_s0 + $0x3] ss:$4 sm:%s7_s6]   ;;  %s21_s10 = smov 3  ;;  %s14_s13 = smov 3 }
   0x2   :  { %9 = vrot.lane.b32.xlu0 %v39_v0, %s46_s9  ;;  %v41_v1 = vld [vmem:[%s77_s0 + $0x1] ss:$4 sm:%s21_s10]   ;;  %s47_s14 = smov 32   ;;  %s48_s17 = smov 64  }
   0x3   :  { %23 = vrot.lane.b32.xlu1 %v41_v1, %s47_s14  ;;  %v40_v2 = vld [vmem:[%s77_s0 + $0x2] ss:$4 sm:%s14_s13]   ;;  %s2_s18 = smov 3 }
   0x4   :  { %v3_v3 = vld [vmem:[%s77_s0] ss:$4 sm:%s2_s18]  }
   0x5   :  { %5 = vst.msk [vmem:[#allocation0] ss:$8 sm:$0x3] %vm4_vm0, %v3_v3  }
   0xa   :  { %16 = vrot.lane.b32.xlu0 %v40_v2, %s48_s17 }
  0x74   :  { %v10_v4 = vpop.permute.xlu0 %9  }
  0x75   :  { %12 = vst.msk [vmem:[#allocation0] ss:$8 sm:$0x3] %vm11_vm1, %v10_v4   ;;  %v24_v5 = vpop.permute.xlu1 %23  }
  0x7c   :  { %v17_v6 = vpop.permute.xlu0 %16  }
  0x7d   :  { %19 = vst.msk [vmem:[#allocation0] ss:$8 sm:$0x3] %vm18_vm2, %v17_v6  }
  0x7e   :  { %26 = vst.msk [vmem:[#allocation0] ss:$8 sm:$0x3] %vm25_vm3, %v24_v5  }
  0x85   :  { %v29_v7 = vld [vmem:[#allocation0] sm:$0x1]  ;;  %v34_v8 = vld [vmem:[#allocation0 + $0x8] sm:$0x1] }
  0x86   :  { %32 = vst [vmem:[%s78_s1] sm:$0x1] %v29_v7 }
  0x87   :  { %42 = vst [vmem:[%s78_s1 + $0x1] sm:$0x1] %v34_v8 }

// kernel: protein_cnn_forward.1
= control target key start
LH: loop header
LB: loop body
LE: loop exit
PB: predicated region body
PF: predicated region fallthrough
CT: control target
= control target key end

     0   :  { %s6223_s0 = inlined_call_operand.vmem [shape: f32[50,16,10], index: 0, kind: input, shape index: {}]   ;;  %s6224_s1 = inlined_call_operand.vmem [shape: f32[10,256], index: 1, kind: input, shape index: {}]   ;;  %s6225_s2 = inlined_call_operand.vmem [shape: f32[1,256], index: 2, kind: input, shape index: {}]   ;;  %s6226_s3 = inlined_call_operand.vmem [shape: f32[128,128], index: 3, kind: input, shape index: {}]   ;;  %s6227_s4 = inlined_call_operand.vmem [shape: f32[1,128], index: 4, kind: input, shape index: {}]   ;;  %s6228_s5 = inlined_call_operand.vmem [shape: f32[25,128,128], index: 5, kind: input, shape index: {}]   ;;  %s6229_s6 = inlined_call_operand.vmem [shape: f32[1,128], index: 6, kind: input, shape index: {}]   ;;  %s6230_s7 = inlined_call_operand.vmem [shape: f32[1,128], index: 7, kind: input, shape index: {}]   ;;  %s6231_s8 = inlined_call_operand.<no memory space> [shape: f32[1,1], index: 8, kind: input, shape index: {}]   ;;  %s6232_s9 = inlined_call_operand.vmem [shape: f32[16,1], index: 9, kind: output, shape index: {}]  }
   0x1   :  { %v14_v0 = vstv %s6231_s8 }
   0x2   :  { %15 = vst [vmem:[#allocation2] sm:$0x1] %v14_v0 }
   0x3   :  { %s4006_s11 = smov 0   ;;  %s4008_s12 = smov 0  }
   0x4   :  { %s4010_s13 = smov 0  }
   0x5 LB: > { %s3229_s8 = sadd.s32 4294967295, %s3950_s13   ;;  %s4023_s14 = sadd.s32 1, %s3950_s13   ;;  %s3950_s13 = sphi %s4010_s13, %s6235_s13   ;;  %s3946_s12 = sphi %s4008_s12, %s6234_s12   ;;  %s3942_s11 = sphi %s4006_s11, %s6233_s11  }
   0x6   : > { %s25_s15 = ssub.s32 %s3950_s13, %s4023_s14  ;;  %s28_s16 = sadd.s32 1, %s3946_s12 }
   0x7   : > { %p26_p0 = scmp.eq.s32.totalorder %s25_s15, 0  ;;  %p35_p1 = scmp.ne.s32.totalorder %s3946_s12, %s3942_s11 }
   0x8   : > { %p36_p2 = scmp.eq.s32.totalorder %s3950_s13, 0  ;;  %p3232_p4 = scmp.ge.s32.totalorder %s3950_s13, 2 }
   0x9   : > { %s4032_s17 = scalar_select %p26_p0, %s3946_s12, %s28_s16  }
   0xa   : > { %p37_p3 = por %p36_p2, %p35_p1  ;;  %279 = sbr.rel (%p3232_p4) target bundleno = 69 (0x45), region = 48 }
   0xf   : > { %282 = sbr.rel (!%p37_p3) target bundleno = 69 (0x45), region = 52  ;;  %s284_s18 = sand.u32 (%p37_p3), 1, %s3946_s12  }
  0x10   : > { %s3233_s19 = sshll.u32 (%p37_p3), %s3950_s13, 3  ;;  %s3732_s20 = smul.u32 (%p37_p3), 400, %s284_s18 }
  0x11   : > { %s4040_s23 = scalar_lea.vmem (%p37_p3), %s6223_s0, %s3233_s19 }
  0x12   : > { %v415_v1 = vld [vmem:[%s4040_s23] sm:$0xff] (%p37_p3)  ;;  %v417_v2 = vld [vmem:[%s4040_s23 + $0x10] sm:$0xff] (%p37_p3)  ;;  %s4045_s24 = scalar_lea.vmem (%p37_p3), [#allocation3], %s3732_s20 }
  0x13   : > { %v419_v3 = vld [vmem:[%s4040_s23 + $0x20] sm:$0xff] (%p37_p3)  ;;  %416 = vst [vmem:[%s4045_s24] sm:$0xff] (%p37_p3), %v415_v1  ;;  %v421_v4 = vld [vmem:[%s4040_s23 + $0x30] sm:$0xff] (%p37_p3) }
  0x14   : > { %418 = vst [vmem:[%s4045_s24 + $0x8] sm:$0xff] %v417_v2  ;;  %v423_v5 = vld [vmem:[%s4040_s23 + $0x40] sm:$0xff]  ;;  %v425_v6 = vld [vmem:[%s4040_s23 + $0x50] sm:$0xff] }
  0x15   : > { %420 = vst [vmem:[%s4045_s24 + $0x10] sm:$0xff] %v419_v3  ;;  %v427_v7 = vld [vmem:[%s4040_s23 + $0x60] sm:$0xff]  ;;  %v429_v8 = vld [vmem:[%s4040_s23 + $0x70] sm:$0xff] }
  0x16   : > { %422 = vst [vmem:[%s4045_s24 + $0x18] sm:$0xff] %v421_v4  ;;  %v431_v9 = vld [vmem:[%s4040_s23 + $0x80] sm:$0xff]  ;;  %v433_v10 = vld [vmem:[%s4040_s23 + $0x90] sm:$0xff] }
  0x17   : > { %424 = vst [vmem:[%s4045_s24 + $0x20] sm:$0xff] %v423_v5  ;;  %v435_v11 = vld [vmem:[%s4040_s23 + $0xa0] sm:$0xff]  ;;  %v437_v12 = vld [vmem:[%s4040_s23 + $0xb0] sm:$0xff] }
  0x18   : > { %426 = vst [vmem:[%s4045_s24 + $0x28] sm:$0xff] %v425_v6  ;;  %v439_v13 = vld [vmem:[%s4040_s23 + $0xc0] sm:$0xff]  ;;  %v441_v14 = vld [vmem:[%s4040_s23 + $0xd0] sm:$0xff] }
  0x19   : > { %428 = vst [vmem:[%s4045_s24 + $0x30] sm:$0xff] %v427_v7  ;;  %v443_v15 = vld [vmem:[%s4040_s23 + $0xe0] sm:$0xff]  ;;  %v445_v16 = vld [vmem:[%s4040_s23 + $0xf0] sm:$0xff] }
  0x1a   : > { %430 = vst [vmem:[%s4045_s24 + $0x38] sm:$0xff] %v429_v8  ;;  %v447_v17 = vld [vmem:[%s4040_s23 + $0x100] sm:$0xff]  ;;  %v449_v18 = vld [vmem:[%s4040_s23 + $0x110] sm:$0xff] }
  0x1b   : > { %432 = vst [vmem:[%s4045_s24 + $0x40] sm:$0xff] %v431_v9  ;;  %v451_v19 = vld [vmem:[%s4040_s23 + $0x120] sm:$0xff]  ;;  %v453_v20 = vld [vmem:[%s4040_s23 + $0x130] sm:$0xff] }
  0x1c   : > { %434 = vst [vmem:[%s4045_s24 + $0x48] sm:$0xff] %v433_v10  ;;  %v455_v21 = vld [vmem:[%s4040_s23 + $0x140] sm:$0xff]  ;;  %v457_v22 = vld [vmem:[%s4040_s23 + $0x150] sm:$0xff] }
  0x1d   : > { %436 = vst [vmem:[%s4045_s24 + $0x50] sm:$0xff] %v435_v11  ;;  %v459_v23 = vld [vmem:[%s4040_s23 + $0x160] sm:$0xff]  ;;  %v461_v24 = vld [vmem:[%s4040_s23 + $0x170] sm:$0xff] }
  0x1e   : > { %438 = vst [vmem:[%s4045_s24 + $0x58] sm:$0xff] %v437_v12  ;;  %v463_v25 = vld [vmem:[%s4040_s23 + $0x180] sm:$0xff]  ;;  %v465_v26 = vld [vmem:[%s4040_s23 + $0x190] sm:$0xff] }
  0x1f   : > { %440 = vst [vmem:[%s4045_s24 + $0x60] sm:$0xff] %v439_v13  ;;  %v467_v27 = vld [vmem:[%s4040_s23 + $0x1a0] sm:$0xff]  ;;  %v469_v28 = vld [vmem:[%s4040_s23 + $0x1b0] sm:$0xff] }
  0x20   : > { %442 = vst [vmem:[%s4045_s24 + $0x68] sm:$0xff] %v441_v14  ;;  %v471_v29 = vld [vmem:[%s4040_s23 + $0x1c0] sm:$0xff]  ;;  %v473_v30 = vld [vmem:[%s4040_s23 + $0x1d0] sm:$0xff] }
  0x21   : > { %444 = vst [vmem:[%s4045_s24 + $0x70] sm:$0xff] %v443_v15  ;;  %v475_v31 = vld [vmem:[%s4040_s23 + $0x1e0] sm:$0xff]  ;;  %v477_v32 = vld [vmem:[%s4040_s23 + $0x1f0] sm:$0xff] }
  0x22   : > { %446 = vst [vmem:[%s4045_s24 + $0x78] sm:$0xff] %v445_v16  ;;  %v479_v33 = vld [vmem:[%s4040_s23 + $0x200] sm:$0xff]  ;;  %v481_v34 = vld [vmem:[%s4040_s23 + $0x210] sm:$0xff] }
  0x23   : > { %448 = vst [vmem:[%s4045_s24 + $0x80] sm:$0xff] %v447_v17  ;;  %v483_v35 = vld [vmem:[%s4040_s23 + $0x220] sm:$0xff]  ;;  %v485_v36 = vld [vmem:[%s4040_s23 + $0x230] sm:$0xff] }
  0x24   : > { %450 = vst [vmem:[%s4045_s24 + $0x88] sm:$0xff] %v449_v18  ;;  %v487_v37 = vld [vmem:[%s4040_s23 + $0x240] sm:$0xff]  ;;  %v489_v38 = vld [vmem:[%s4040_s23 + $0x250] sm:$0xff] }
  0x25   : > { %452 = vst [vmem:[%s4045_s24 + $0x90] sm:$0xff] %v451_v19  ;;  %v491_v39 = vld [vmem:[%s4040_s23 + $0x260] sm:$0xff]  ;;  %v493_v40 = vld [vmem:[%s4040_s23 + $0x270] sm:$0xff] }
  0x26   : > { %454 = vst [vmem:[%s4045_s24 + $0x98] sm:$0xff] %v453_v20  ;;  %v495_v41 = vld [vmem:[%s4040_s23 + $0x280] sm:$0xff]  ;;  %v497_v42 = vld [vmem:[%s4040_s23 + $0x290] sm:$0xff] }
  0x27   : > { %456 = vst [vmem:[%s4045_s24 + $0xa0] sm:$0xff] %v455_v21  ;;  %v499_v43 = vld [vmem:[%s4040_s23 + $0x2a0] sm:$0xff]  ;;  %v501_v44 = vld [vmem:[%s4040_s23 + $0x2b0] sm:$0xff] }
  0x28   : > { %458 = vst [vmem:[%s4045_s24 + $0xa8] sm:$0xff] %v457_v22  ;;  %v503_v45 = vld [vmem:[%s4040_s23 + $0x2c0] sm:$0xff]  ;;  %v505_v46 = vld [vmem:[%s4040_s23 + $0x2d0] sm:$0xff] }
  0x29   : > { %460 = vst [vmem:[%s4045_s24 + $0xb0] sm:$0xff] %v459_v23  ;;  %v507_v47 = vld [vmem:[%s4040_s23 + $0x2e0] sm:$0xff]  ;;  %v509_v48 = vld [vmem:[%s4040_s23 + $0x2f0] sm:$0xff] }
  0x2a   : > { %462 = vst [vmem:[%s4045_s24 + $0xb8] sm:$0xff] %v461_v24  ;;  %v511_v49 = vld [vmem:[%s4040_s23 + $0x300] sm:$0xff]  ;;  %v513_v50 = vld [vmem:[%s4040_s23 + $0x310] sm:$0xff] }
  0x2b   : > { %464 = vst [vmem:[%s4045_s24 + $0xc0] sm:$0xff] %v463_v25 }
  0x2c   : > { %466 = vst [vmem:[%s4045_s24 + $0xc8] sm:$0xff] %v465_v26 }
  0x2d   : > { %468 = vst [vmem:[%s4045_s24 + $0xd0] sm:$0xff] %v467_v27 }
  0x2e   : > { %470 = vst [vmem:[%s4045_s24 + $0xd8] sm:$0xff] %v469_v28 }
  0x2f   : > { %472 = vst [vmem:[%s4045_s24 + $0xe0] sm:$0xff] %v471_v29 }
  0x30   : > { %474 = vst [vmem:[%s4045_s24 + $0xe8] sm:$0xff] %v473_v30 }
  0x31   : > { %476 = vst [vmem:[%s4045_s24 + $0xf0] sm:$0xff] %v475_v31 }
  0x32   : > { %478 = vst [vmem:[%s4045_s24 + $0xf8] sm:$0xff] %v477_v32 }
  0x33   : > { %480 = vst [vmem:[%s4045_s24 + $0x100] sm:$0xff] %v479_v33 }
  0x34   : > { %482 = vst [vmem:[%s4045_s24 + $0x108] sm:$0xff] %v481_v34 }
  0x35   : > { %484 = vst [vmem:[%s4045_s24 + $0x110] sm:$0xff] %v483_v35 }
  0x36   : > { %486 = vst [vmem:[%s4045_s24 + $0x118] sm:$0xff] %v485_v36 }
  0x37   : > { %488 = vst [vmem:[%s4045_s24 + $0x120] sm:$0xff] %v487_v37 }
  0x38   : > { %490 = vst [vmem:[%s4045_s24 + $0x128] sm:$0xff] %v489_v38 }
  0x39   : > { %492 = vst [vmem:[%s4045_s24 + $0x130] sm:$0xff] %v491_v39 }
  0x3a   : > { %494 = vst [vmem:[%s4045_s24 + $0x138] sm:$0xff] %v493_v40 }
  0x3b   : > { %496 = vst [vmem:[%s4045_s24 + $0x140] sm:$0xff] %v495_v41 }
  0x3c   : > { %498 = vst [vmem:[%s4045_s24 + $0x148] sm:$0xff] %v497_v42 }
  0x3d   : > { %500 = vst [vmem:[%s4045_s24 + $0x150] sm:$0xff] %v499_v43 }
  0x3e   : > { %502 = vst [vmem:[%s4045_s24 + $0x158] sm:$0xff] %v501_v44 }
  0x3f   : > { %504 = vst [vmem:[%s4045_s24 + $0x160] sm:$0xff] %v503_v45 }
  0x40   : > { %506 = vst [vmem:[%s4045_s24 + $0x168] sm:$0xff] %v505_v46 }
  0x41   : > { %508 = vst [vmem:[%s4045_s24 + $0x170] sm:$0xff] %v507_v47 }
  0x42   : > { %510 = vst [vmem:[%s4045_s24 + $0x178] sm:$0xff] %v509_v48 }
  0x43   : > { %512 = vst [vmem:[%s4045_s24 + $0x180] sm:$0xff] %v511_v49 }
  0x44   : > { %514 = vst [vmem:[%s4045_s24 + $0x188] sm:$0xff] %v513_v50 }
  0x45 PF: > { %p3234_p5 = scmp.ge.s32.totalorder %s3950_s13, 1  ;;  %p519_p6 = scmp.lt.s32.totalorder %s3950_s13, 3 }
  0x47   : > { %p520_p7 = pnand %p3234_p5, %p519_p6 }
  0x48   : > { %s526_s29 = sand.u32 (!%p520_p7), 1, %s3942_s11   ;;  %s3952_s23 = smov (!%p520_p7), 64  }
  0x49   : > { %523 = sbr.rel (%p520_p7) target bundleno = 1342 (0x53e), region = 90  ;;  %p560_p8 = scmp.lt.s32.totalorder (!%p520_p7), %s3229_s8, 1 }
  0x4a   : > { %s3733_s30 = smul.u32 (!%p520_p7), 400, %s526_s29 }
  0x4c   : > { %s4159_s19 = scalar_lea.vmem (!%p520_p7), [#allocation3], %s3733_s30 }
  0x4e   : > { %v616_v51 = vld [vmem:[%s6224_s1 + $0x10] sm:$0x3]  ;;  %vm775_vm0 = vcmask 1041408   ;;  %v614_v52 = vld [vmem:[%s6224_s1] sm:$0xff]  ;;  %vm624_vm1 = vcmask 80896   ;;  %v615_v54 = vld [vmem:[%s6224_s1 + $0x8] sm:$0xff]  ;;  %v1267_v28 = vlaneseq }
  0x4f   : > { %3730 = vmatpush.msk.msra.mxu1 %vm775_vm0, %v616_v51  ;;  %3236 = vmatpush.msk.msra.mxu0 %vm775_vm0, %v616_v51  ;;  %v617_v53 = vld [vmem:[%s6224_s1 + $0x18] sm:$0x3]  ;;  %v1585_v3 = vld [vmem:[%s6226_s3 + $0x70] sm:$0xff]  ;;  %v1584_v5 = vld [vmem:[%s6226_s3 + $0x68] sm:$0xff]  ;;  %vm2062_vm3 = vcmask 523264   ;;  %s6237_s8 = smov (!%p560_p8, %s3229_s8), 1 }
  0x50   : > { %v4162_v55 = vld [vmem:[%s4159_s19 + $0x188] sm:$0xff]  ;;  %v564_v56 = vld [vmem:[%s4159_s19] sm:$0xff]  ;;  %v566_v58 = vld [vmem:[%s4159_s19 + $0x10] sm:$0xff]  ;;  %v4274_v33 = vand.u32 127, %v1267_v28  ;;  %s3235_s22 = sshll.u32 %s6237_s8, 3  ;;  %vm3168_vm7 = vcmask 7168  }
  0x51   : > { %3731 = vmatpush.msra.mxu1 %v614_v52  ;;  %797 = vmatpush.msra.mxu0 %v614_v52  ;;  %v565_v57 = vld [vmem:[%s4159_s19 + $0x8] sm:$0xff]  ;;  %v567_v59 = vld [vmem:[%s4159_s19 + $0x18] sm:$0xff]  ;;  %v568_v60 = vld [vmem:[%s4159_s19 + $0x20] sm:$0xff]  ;;  %s563_s25 = scalar_lea.vmem %s6232_s9, %s3235_s22 }
  0x52   : > { %3286 = vmatmul.msk.f32.vlgmr.msra.gmra.mxu1 %vm624_vm1, %v4162_v55  ;;  %3237 = vmatmul.msk.f32.vlgmr.msra.gmra.mxu0 %vm624_vm1, %v564_v56  ;;  %v569_v61 = vld [vmem:[%s4159_s19 + $0x28] sm:$0xff]  ;;  %v570_v62 = vld [vmem:[%s4159_s19 + $0x30] sm:$0xff]  ;;  %v571_v63 = vld [vmem:[%s4159_s19 + $0x38] sm:$0xff]  ;;  %vm3728_vm2 = vcmp.ge.s32.totalorder %v4274_v33, 32  ;;  %vm3729_vm4 = vcmp.lt.s32.totalorder %v4274_v33, 96 }
  0x53   : > { %3287 = vmatpush.msk.msrb.mxu1 %vm775_vm0, %v617_v53  ;;  %v572_v0 = vld [vmem:[%s4159_s19 + $0x40] sm:$0xff]  ;;  %v573_v1 = vld [vmem:[%s4159_s19 + $0x48] sm:$0xff]  ;;  %v574_v4 = vld [vmem:[%s4159_s19 + $0x50] sm:$0xff] }
  0x54   : > { %v1586_v2 = vld [vmem:[%s6226_s3 + $0x78] sm:$0xff]  ;;  %v1583_v6 = vld [vmem:[%s6226_s3 + $0x60] sm:$0xff]  ;;  %v1581_v8 = vld [vmem:[%s6226_s3 + $0x50] sm:$0xff] }
  0x55   : > { %964 = vmatpush.msrb.mxu1 %v615_v54  ;;  %1591 = vmatpush.msra.mxu2 %v1586_v2  ;;  %v1582_v7 = vld [vmem:[%s6226_s3 + $0x58] sm:$0xff]  ;;  %v1580_v10 = vld [vmem:[%s6226_s3 + $0x48] sm:$0xff]  ;;  %v1579_v11 = vld [vmem:[%s6226_s3 + $0x40] sm:$0xff] }
  0x56   : > { %v575_v9 = vld [vmem:[%s4159_s19 + $0x58] sm:$0xff]  ;;  %v576_v13 = vld [vmem:[%s4159_s19 + $0x60] sm:$0xff]  ;;  %v577_v18 = vld [vmem:[%s4159_s19 + $0x68] sm:$0xff] }
  0x57   : > { %1592 = vmatpush.msra.mxu2 %v1585_v3  ;;  %v1578_v12 = vld [vmem:[%s6226_s3 + $0x38] sm:$0xff]  ;;  %v1577_v14 = vld [vmem:[%s6226_s3 + $0x30] sm:$0xff]  ;;  %v1576_v15 = vld [vmem:[%s6226_s3 + $0x28] sm:$0xff] }
  0x58   : > { %v1575_v16 = vld [vmem:[%s6226_s3 + $0x20] sm:$0xff]  ;;  %v1574_v17 = vld [vmem:[%s6226_s3 + $0x18] sm:$0xff]  ;;  %v1573_v19 = vld [vmem:[%s6226_s3 + $0x10] sm:$0xff] }
  0x59   : > { %1593 = vmatpush.msra.mxu2 %v1584_v5  ;;  %v1572_v20 = vld [vmem:[%s6226_s3 + $0x8] sm:$0xff]  ;;  %v1571_v21 = vld [vmem:[%s6226_s3] sm:$0xff]  ;;  %v3360_v33 = vld [vmem:[%s6228_s5 + $0x110] sm:$0xff] }
  0x5a   : > { %3288 = vmatmul.msk.f32.vlgmr.msrb.gmra.mxu1 %vm624_vm1, %v564_v56  ;;  %3238 = vmatmul.msk.f32.gmra.mxu0 %vm624_vm1, %v565_v57  ;;  %v578_v22 = vld [vmem:[%s4159_s19 + $0x70] sm:$0xff]  ;;  %v579_v23 = vld [vmem:[%s4159_s19 + $0x78] sm:$0xff]  ;;  %v580_v26 = vld [vmem:[%s4159_s19 + $0x80] sm:$0xff] }
  0x5b   : > { %1594 = vmatpush.msra.mxu2 %v1583_v6  ;;  %v618_v27 = vld [vmem:[%s6225_s2] sm:$0x3] }
  0x5c   : > { %v4269_v29 = vperm.slane %v618_v27, 0  ;;  %v4271_v30 = vperm.slane %v618_v27, 1  ;;  %v581_v35 = vld [vmem:[%s4159_s19 + $0x88] sm:$0xff]  ;;  %v582_v42 = vld [vmem:[%s4159_s19 + $0x90] sm:$0xff]  ;;  %v583_v49 = vld [vmem:[%s4159_s19 + $0x98] sm:$0xff] }
  0x5d   : > { %1595 = vmatpush.msra.mxu2 %v1582_v7  ;;  %v586_v7 = vld [vmem:[%s4159_s19 + $0xb0] sm:$0xff] }
  0x5f   : > { %1596 = vmatpush.msra.mxu2 %v1581_v8 }
  0x61   : > { %1597 = vmatpush.msra.mxu2 %v1580_v10 }
  0x62   : > { %3289 = vmatmul.msk.f32.gmra.mxu1 %vm624_vm1, %v565_v57  ;;  %3239 = vmatmul.msk.f32.gmra.mxu0 %vm624_vm1, %v566_v58  ;;  %v584_v57 = vld [vmem:[%s4159_s19 + $0xa0] sm:$0xff] }
  0x63   : > { %1598 = vmatpush.msra.mxu2 %v1579_v11 }
  0x65   : > { %1599 = vmatpush.msra.mxu2 %v1578_v12 }
  0x67   : > { %1600 = vmatpush.msra.mxu2 %v1577_v14  ;;  %v587_v14 = vld [vmem:[%s4159_s19 + $0xb8] sm:$0xff] }
  0x69   : > { %1601 = vmatpush.msra.mxu2 %v1576_v15 }
  0x6a   : > { %3290 = vmatmul.msk.f32.gmra.mxu1 %vm624_vm1, %v566_v58  ;;  %3240 = vmatmul.msk.f32.gmra.mxu0 %vm624_vm1, %v567_v59 }
  0x6b   : > { %1602 = vmatpush.msra.mxu2 %v1575_v16 }
  0x6d   : > { %1603 = vmatpush.msra.mxu2 %v1574_v17 }
  0x6f   : > { %1604 = vmatpush.msra.mxu2 %v1573_v19 }
  0x71   : > { %1605 = vmatpush.msra.mxu2 %v1572_v20 }
  0x72   : > { %3291 = vmatmul.msk.f32.gmra.mxu1 %vm624_vm1, %v567_v59  ;;  %3241 = vmatmul.msk.f32.gmra.mxu0 %vm624_vm1, %v568_v60 }
  0x73   : > { %1606 = vmatpush.msra.mxu2 %v1571_v21  ;;  %v588_v21 = vld [vmem:[%s4159_s19 + $0xc0] sm:$0xff] }
  0x7a   : > { %3292 = vmatmul.msk.f32.gmra.mxu1 %vm624_vm1, %v568_v60  ;;  %3242 = vmatmul.msk.f32.gmra.mxu0 %vm624_vm1, %v569_v61 }
  0x82   : > { %3293 = vmatmul.msk.f32.gmra.mxu1 %vm624_vm1, %v569_v61  ;;  %3243 = vmatmul.msk.f32.gmra.mxu0 %vm624_vm1, %v570_v62 }
  0x8a   : > { %3294 = vmatmul.msk.f32.gmra.mxu1 %vm624_vm1, %v570_v62  ;;  %3244 = vmatmul.msk.f32.gmra.mxu0 %vm624_vm1, %v571_v63 }
  0x92   : > { %3295 = vmatmul.msk.f32.gmra.mxu1 %vm624_vm1, %v571_v63  ;;  %3245 = vmatmul.msk.f32.gmra.mxu0 %vm624_vm1, %v572_v0 }
  0x9a   : > { %3296 = vmatmul.msk.f32.gmra.mxu1 %vm624_vm1, %v572_v0  ;;  %3246 = vmatmul.msk.f32.gmra.mxu0 %vm624_vm1, %v573_v1  ;;  %v585_v0 = vld [vmem:[%s4159_s19 + $0xa8] sm:$0xff] }
  0xa2   : > { %3297 = vmatmul.msk.f32.gmra.mxu1 %vm624_vm1, %v573_v1  ;;  %3247 = vmatmul.msk.f32.gmra.mxu0 %vm624_vm1, %v574_v4 }
  0xaa   : > { %3298 = vmatmul.msk.f32.gmra.mxu1 %vm624_vm1, %v574_v4  ;;  %3248 = vmatmul.msk.f32.gmra.mxu0 %vm624_vm1, %v575_v9 }
  0xb2   : > { %3299 = vmatmul.msk.f32.gmra.mxu1 %vm624_vm1, %v575_v9  ;;  %3249 = vmatmul.msk.f32.gmra.mxu0 %vm624_vm1, %v576_v13 }
  0xba   : > { %3300 = vmatmul.msk.f32.gmra.mxu1 %vm624_vm1, %v576_v13  ;;  %3250 = vmatmul.msk.f32.gmra.mxu0 %vm624_vm1, %v577_v18 }
  0xc2   : > { %3301 = vmatmul.msk.f32.gmra.mxu1 %vm624_vm1, %v577_v18  ;;  %3251 = vmatmul.msk.f32.gmra.mxu0 %vm624_vm1, %v578_v22 }
  0xca   : > { %3302 = vmatmul.msk.f32.gmra.mxu1 %vm624_vm1, %v578_v22  ;;  %3252 = vmatmul.msk.f32.gmra.mxu0 %vm624_vm1, %v579_v23 }
  0xcf   : > { %v4261_v24 = vpop.f32.mrf.mxu1  ;;  %v799_v25 = vpop.f32.mrf.mxu0 }
  0xd0   : > { %v800_v31 = vadd.f32 %v799_v25, %v4269_v29 }
  0xd2   : > { %3303 = vmatmul.msk.f32.gmra.mxu1 %vm624_vm1, %v579_v23  ;;  %3253 = vmatmul.msk.f32.gmra.mxu0 %vm624_vm1, %v580_v26 }
  0xd7   : > { %v966_v32 = vpop.f32.mrf.mxu1  ;;  %v802_v34 = vpop.f32.mrf.mxu0 }
  0xd8   : > { %v967_v36 = vadd.f32 %v966_v32, %v4271_v30  ;;  %v803_v39 = vadd.f32 %v802_v34, %v4269_v29 }
  0xda   : > { %v1116_v37 = vmax.f32 %v800_v31, %v967_v36  ;;  %3304 = vmatmul.msk.f32.gmra.mxu1 %vm624_vm1, %v580_v26  ;;  %3254 = vmatmul.msk.f32.gmra.mxu0 %vm624_vm1, %v581_v35  ;;  %v589_v31 = vld [vmem:[%s4159_s19 + $0xc8] sm:$0xff] }
  0xdc   : > { %v1166_v38 = vmax.f32 %v1116_v37, 0.0 }
  0xde   : > { %3339 = vmatmul.msk.f32.vlgmr.msra.gmra.mxu2 %vm3728_vm2, %v1166_v38 }
  0xdf   : > { %v969_v40 = vpop.f32.mrf.mxu1  ;;  %v805_v41 = vpop.f32.mrf.mxu0 }
  0xe0   : > { %v970_v43 = vadd.f32 %v969_v40, %v4271_v30  ;;  %v806_v46 = vadd.f32 %v805_v41, %v4269_v29 }
  0xe2   : > { %3305 = vmatmul.msk.f32.gmra.mxu1 %vm624_vm1, %v581_v35  ;;  %v1117_v44 = vmax.f32 %v803_v39, %v970_v43  ;;  %3255 = vmatmul.msk.f32.gmra.mxu0 %vm624_vm1, %v582_v42  ;;  %v590_v39 = vld [vmem:[%s4159_s19 + $0xd0] sm:$0xff] }
  0xe4   : > { %v1167_v45 = vmax.f32 %v1117_v44, 0.0 }
  0xe6   : > { %1610 = vmatmul.f32.gmra.mxu2 %v1167_v45 }
  0xe7   : > { %v972_v47 = vpop.f32.mrf.mxu1  ;;  %v808_v48 = vpop.f32.mrf.mxu0 }
  0xe8   : > { %v973_v50 = vadd.f32 %v972_v47, %v4271_v30  ;;  %v809_v53 = vadd.f32 %v808_v48, %v4269_v29 }
  0xea   : > { %3306 = vmatmul.msk.f32.gmra.mxu1 %vm624_vm1, %v582_v42  ;;  %v1118_v51 = vmax.f32 %v806_v46, %v973_v50  ;;  %3256 = vmatmul.msk.f32.gmra.mxu0 %vm624_vm1, %v583_v49  ;;  %v591_v46 = vld [vmem:[%s4159_s19 + $0xd8] sm:$0xff] }
  0xec   : > { %v1168_v52 = vmax.f32 %v1118_v51, 0.0 }
  0xee   : > { %1613 = vmatmul.f32.gmra.mxu2 %v1168_v52 }
  0xef   : > { %v975_v54 = vpop.f32.mrf.mxu1  ;;  %v811_v56 = vpop.f32.mrf.mxu0 }
  0xf0   : > { %v976_v58 = vadd.f32 %v975_v54, %v4271_v30  ;;  %v812_v61 = vadd.f32 %v811_v56, %v4269_v29 }
  0xf2   : > { %3307 = vmatmul.msk.f32.gmra.mxu1 %vm624_vm1, %v583_v49  ;;  %v1119_v59 = vmax.f32 %v809_v53, %v976_v58  ;;  %3257 = vmatmul.msk.f32.gmra.mxu0 %vm624_vm1, %v584_v57  ;;  %v592_v53 = vld [vmem:[%s4159_s19 + $0xe0] sm:$0xff] }
  0xf4   : > { %v1169_v60 = vmax.f32 %v1119_v59, 0.0 }
  0xf6   : > { %1616 = vmatmul.f32.gmra.mxu2 %v1169_v60 }
  0xf7   : > { %v978_v62 = vpop.f32.mrf.mxu1  ;;  %v814_v63 = vpop.f32.mrf.mxu0 }
  0xf8   : > { %v979_v1 = vadd.f32 %v978_v62, %v4271_v30  ;;  %v815_v4 = vadd.f32 %v814_v63, %v4269_v29 }
  0xfa   : > { %3308 = vmatmul.msk.f32.gmra.mxu1 %vm624_vm1, %v584_v57  ;;  %v1120_v2 = vmax.f32 %v812_v61, %v979_v1  ;;  %3258 = vmatmul.msk.f32.gmra.mxu0 %vm624_vm1, %v585_v0  ;;  %v593_v61 = vld [vmem:[%s4159_s19 + $0xe8] sm:$0xff] }
  0xfc   : > { %v1170_v3 = vmax.f32 %v1120_v2, 0.0 }
  0xfe   : > { %1619 = vmatmul.f32.gmra.mxu2 %v1170_v3 }
  0xff   : > { %v981_v5 = vpop.f32.mrf.mxu1  ;;  %v817_v6 = vpop.f32.mrf.mxu0 }
 0x100   : > { %v982_v8 = vadd.f32 %v981_v5, %v4271_v30  ;;  %v818_v11 = vadd.f32 %v817_v6, %v4269_v29 }
 0x102   : > { %3309 = vmatmul.msk.f32.gmra.mxu1 %vm624_vm1, %v585_v0  ;;  %v1121_v9 = vmax.f32 %v815_v4, %v982_v8  ;;  %3259 = vmatmul.msk.f32.gmra.mxu0 %vm624_vm1, %v586_v7  ;;  %v594_v4 = vld [vmem:[%s4159_s19 + $0xf0] sm:$0xff] }
 0x104   : > { %v1171_v10 = vmax.f32 %v1121_v9, 0.0 }
 0x106   : > { %1622 = vmatmul.f32.gmra.mxu2 %v1171_v10 }
 0x107   : > { %v984_v12 = vpop.f32.mrf.mxu1  ;;  %v820_v13 = vpop.f32.mrf.mxu0 }
 0x108   : > { %v985_v15 = vadd.f32 %v984_v12, %v4271_v30  ;;  %v821_v18 = vadd.f32 %v820_v13, %v4269_v29 }
 0x10a   : > { %3310 = vmatmul.msk.f32.gmra.mxu1 %vm624_vm1, %v586_v7  ;;  %v1122_v16 = vmax.f32 %v818_v11, %v985_v15  ;;  %3260 = vmatmul.msk.f32.gmra.mxu0 %vm624_vm1, %v587_v14  ;;  %v595_v11 = vld [vmem:[%s4159_s19 + $0xf8] sm:$0xff] }
 0x10c   : > { %v1172_v17 = vmax.f32 %v1122_v16, 0.0 }
 0x10e   : > { %1625 = vmatmul.f32.gmra.mxu2 %v1172_v17 }
 0x10f   : > { %v987_v19 = vpop.f32.mrf.mxu1  ;;  %v823_v20 = vpop.f32.mrf.mxu0 }
 0x110   : > { %v988_v22 = vadd.f32 %v987_v19, %v4271_v30  ;;  %v824_v26 = vadd.f32 %v823_v20, %v4269_v29 }
 0x112   : > { %3311 = vmatmul.msk.f32.gmra.mxu1 %vm624_vm1, %v587_v14  ;;  %v1123_v23 = vmax.f32 %v821_v18, %v988_v22  ;;  %3261 = vmatmul.msk.f32.gmra.mxu0 %vm624_vm1, %v588_v21  ;;  %v596_v18 = vld [vmem:[%s4159_s19 + $0x100] sm:$0xff] }
 0x114   : > { %v1173_v25 = vmax.f32 %v1123_v23, 0.0 }
 0x116   : > { %1628 = vmatmul.f32.gmra.mxu2 %v1173_v25 }
 0x117   : > { %v990_v27 = vpop.f32.mrf.mxu1  ;;  %v826_v28 = vpop.f32.mrf.mxu0 }
 0x118   : > { %v991_v32 = vadd.f32 %v990_v27, %v4271_v30  ;;  %v827_v36 = vadd.f32 %v826_v28, %v4269_v29 }
 0x11a   : > { %3312 = vmatmul.msk.f32.gmra.mxu1 %vm624_vm1, %v588_v21  ;;  %v1124_v34 = vmax.f32 %v824_v26, %v991_v32  ;;  %3262 = vmatmul.msk.f32.gmra.mxu0 %vm624_vm1, %v589_v31  ;;  %v597_v26 = vld [vmem:[%s4159_s19 + $0x108] sm:$0xff] }
 0x11c   : > { %v1174_v35 = vmax.f32 %v1124_v34, 0.0 }
 0x11e   : > { %1631 = vmatmul.f32.gmra.mxu2 %v1174_v35 }
 0x11f   : > { %v993_v37 = vpop.f32.mrf.mxu1  ;;  %v829_v38 = vpop.f32.mrf.mxu0 }
 0x120   : > { %v994_v40 = vadd.f32 %v993_v37, %v4271_v30  ;;  %v830_v43 = vadd.f32 %v829_v38, %v4269_v29 }
 0x122   : > { %3313 = vmatmul.msk.f32.gmra.mxu1 %vm624_vm1, %v589_v31  ;;  %v1125_v41 = vmax.f32 %v827_v36, %v994_v40  ;;  %3263 = vmatmul.msk.f32.gmra.mxu0 %vm624_vm1, %v590_v39  ;;  %v598_v36 = vld [vmem:[%s4159_s19 + $0x110] sm:$0xff] }
 0x124   : > { %v1175_v42 = vmax.f32 %v1125_v41, 0.0 }
 0x126   : > { %1634 = vmatmul.f32.gmra.mxu2 %v1175_v42 }
 0x127   : > { %v996_v44 = vpop.f32.mrf.mxu1  ;;  %v832_v45 = vpop.f32.mrf.mxu0 }
 0x128   : > { %v997_v47 = vadd.f32 %v996_v44, %v4271_v30  ;;  %v833_v50 = vadd.f32 %v832_v45, %v4269_v29  ;;  %v599_v44 = vld [vmem:[%s4159_s19 + $0x118] sm:$0xff] }
 0x12a   : > { %3314 = vmatmul.msk.f32.gmra.mxu1 %vm624_vm1, %v590_v39  ;;  %v1126_v48 = vmax.f32 %v830_v43, %v997_v47  ;;  %3264 = vmatmul.msk.f32.gmra.mxu0 %vm624_vm1, %v591_v46 }
 0x12c   : > { %v1176_v49 = vmax.f32 %v1126_v48, 0.0 }
 0x12e   : > { %1637 = vmatmul.f32.gmra.mxu2 %v1176_v49 }
 0x12f   : > { %v999_v51 = vpop.f32.mrf.mxu1  ;;  %v835_v52 = vpop.f32.mrf.mxu0 }
 0x130   : > { %v1000_v54 = vadd.f32 %v999_v51, %v4271_v30  ;;  %v836_v58 = vadd.f32 %v835_v52, %v4269_v29  ;;  %v600_v52 = vld [vmem:[%s4159_s19 + $0x120] sm:$0xff] }
 0x132   : > { %3315 = vmatmul.msk.f32.gmra.mxu1 %vm624_vm1, %v591_v46  ;;  %v1127_v56 = vmax.f32 %v833_v50, %v1000_v54  ;;  %3265 = vmatmul.msk.f32.gmra.mxu0 %vm624_vm1, %v592_v53 }
 0x134   : > { %v1177_v57 = vmax.f32 %v1127_v56, 0.0 }
 0x136   : > { %1640 = vmatmul.f32.gmra.mxu2 %v1177_v57 }
 0x137   : > { %v1002_v59 = vpop.f32.mrf.mxu1  ;;  %v838_v60 = vpop.f32.mrf.mxu0 }
 0x138   : > { %v1003_v62 = vadd.f32 %v1002_v59, %v4271_v30  ;;  %v839_v1 = vadd.f32 %v838_v60, %v4269_v29 }
 0x13a   : > { %3316 = vmatmul.msk.f32.gmra.mxu1 %vm624_vm1, %v592_v53  ;;  %v1128_v63 = vmax.f32 %v836_v58, %v1003_v62  ;;  %3266 = vmatmul.msk.f32.gmra.mxu0 %vm624_vm1, %v593_v61  ;;  %v4383_v62 = vld [vmem:[%s6227_s4] ss:$0 sm:$0xff] }
 0x13c   : > { %v1178_v0 = vmax.f32 %v1128_v63, 0.0 }
 0x13e   : > { %1643 = vmatmul.f32.gmra.mxu2 %v1178_v0 }
 0x13f   : > { %v1005_v2 = vpop.f32.mrf.mxu1  ;;  %v841_v3 = vpop.f32.mrf.mxu0 }
 0x140   : > { %v1006_v5 = vadd.f32 %v1005_v2, %v4271_v30  ;;  %v842_v8 = vadd.f32 %v841_v3, %v4269_v29 }
 0x142   : > { %3317 = vmatmul.msk.f32.gmra.mxu1 %vm624_vm1, %v593_v61  ;;  %v1129_v6 = vmax.f32 %v839_v1, %v1006_v5  ;;  %3267 = vmatmul.msk.f32.gmra.mxu0 %vm624_vm1, %v594_v4  ;;  %v601_v61 = vld [vmem:[%s4159_s19 + $0x128] sm:$0xff] }
 0x144   : > { %v1179_v7 = vmax.f32 %v1129_v6, 0.0 }
 0x146   : > { %1646 = vmatmul.f32.gmra.mxu2 %v1179_v7  ;;  %v602_v7 = vld [vmem:[%s4159_s19 + $0x130] sm:$0xff] }
 0x147   : > { %v1008_v9 = vpop.f32.mrf.mxu1  ;;  %v844_v10 = vpop.f32.mrf.mxu0 }
 0x148   : > { %v1009_v12 = vadd.f32 %v1008_v9, %v4271_v30  ;;  %v845_v15 = vadd.f32 %v844_v10, %v4269_v29 }
 0x14a   : > { %3318 = vmatmul.msk.f32.gmra.mxu1 %vm624_vm1, %v594_v4  ;;  %v1130_v13 = vmax.f32 %v842_v8, %v1009_v12  ;;  %3268 = vmatmul.msk.f32.gmra.mxu0 %vm624_vm1, %v595_v11 }
 0x14c   : > { %v1180_v14 = vmax.f32 %v1130_v13, 0.0 }
 0x14e   : > { %1649 = vmatmul.f32.gmra.mxu2 %v1180_v14 }
 0x14f   : > { %v1011_v16 = vpop.f32.mrf.mxu1  ;;  %v847_v17 = vpop.f32.mrf.mxu0 }
 0x150   : > { %v1012_v19 = vadd.f32 %v1011_v16, %v4271_v30  ;;  %v848_v22 = vadd.f32 %v847_v17, %v4269_v29  ;;  %v603_v16 = vld [vmem:[%s4159_s19 + $0x138] sm:$0xff] }
 0x152   : > { %3319 = vmatmul.msk.f32.gmra.mxu1 %vm624_vm1, %v595_v11  ;;  %v1131_v20 = vmax.f32 %v845_v15, %v1012_v19  ;;  %3269 = vmatmul.msk.f32.gmra.mxu0 %vm624_vm1, %v596_v18 }
 0x154   : > { %v1181_v21 = vmax.f32 %v1131_v20, 0.0 }
 0x156   : > { %1652 = vmatmul.f32.gmra.mxu2 %v1181_v21 }
 0x157   : > { %v1014_v23 = vpop.f32.mrf.mxu1  ;;  %v850_v25 = vpop.f32.mrf.mxu0 }
 0x158   : > { %v1015_v27 = vadd.f32 %v1014_v23, %v4271_v30  ;;  %v851_v32 = vadd.f32 %v850_v25, %v4269_v29 }
 0x15a   : > { %3320 = vmatmul.msk.f32.gmra.mxu1 %vm624_vm1, %v596_v18  ;;  %v1132_v28 = vmax.f32 %v848_v22, %v1015_v27  ;;  %3270 = vmatmul.msk.f32.gmra.mxu0 %vm624_vm1, %v597_v26 }
 0x15c   : > { %v1182_v31 = vmax.f32 %v1132_v28, 0.0 }
 0x15e   : > { %1655 = vmatmul.f32.gmra.mxu2 %v1182_v31 }
 0x15f   : > { %v1017_v34 = vpop.f32.mrf.mxu1  ;;  %v853_v35 = vpop.f32.mrf.mxu0 }
 0x160   : > { %v1018_v37 = vadd.f32 %v1017_v34, %v4271_v30  ;;  %v854_v41 = vadd.f32 %v853_v35, %v4269_v29 }
 0x161   : > { %v4364_v38 = vpop.f32.mrf.mxu2 }
 0x162   : > { %3321 = vmatmul.msk.f32.gmra.mxu1 %vm624_vm1, %v597_v26  ;;  %v1133_v39 = vmax.f32 %v851_v32, %v1018_v37  ;;  %3271 = vmatmul.msk.f32.gmra.mxu0 %vm624_vm1, %v598_v36  ;;  %v604_v26 = vld [vmem:[%s4159_s19 + $0x140] sm:$0xff] }
 0x164   : > { %v1183_v40 = vmax.f32 %v1133_v39, 0.0  ;;  %v605_v39 = vld [vmem:[%s4159_s19 + $0x148] sm:$0xff] }
 0x166   : > { %1658 = vmatmul.f32.gmra.mxu2 %v1183_v40 }
 0x167   : > { %v1020_v42 = vpop.f32.mrf.mxu1  ;;  %v856_v43 = vpop.f32.mrf.mxu0 }
 0x168   : > { %v1021_v45 = vadd.f32 %v1020_v42, %v4271_v30  ;;  %v857_v49 = vadd.f32 %v856_v43, %v4269_v29 }
 0x169   : > { %v1611_v46 = vpop.f32.mrf.mxu2 }
 0x16a   : > { %3322 = vmatmul.msk.f32.gmra.mxu1 %vm624_vm1, %v598_v36  ;;  %v1134_v47 = vmax.f32 %v854_v41, %v1021_v45  ;;  %3272 = vmatmul.msk.f32.gmra.mxu0 %vm624_vm1, %v599_v44  ;;  %v4399_v10 = vadd.f32 %v4383_v62, %v1611_v46 }
 0x16c   : > { %v1184_v48 = vmax.f32 %v1134_v47, 0.0  ;;  %v606_v47 = vld [vmem:[%s4159_s19 + $0x150] sm:$0xff] }
 0x16e   : > { %1661 = vmatmul.f32.gmra.mxu2 %v1184_v48 }
 0x16f   : > { %v1023_v50 = vpop.f32.mrf.mxu1  ;;  %v859_v51 = vpop.f32.mrf.mxu0 }
 0x170   : > { %v1024_v53 = vadd.f32 %v1023_v50, %v4271_v30  ;;  %v860_v58 = vadd.f32 %v859_v51, %v4269_v29 }
 0x171   : > { %v1614_v54 = vpop.f32.mrf.mxu2 }
 0x172   : > { %3323 = vmatmul.msk.f32.gmra.mxu1 %vm624_vm1, %v599_v44  ;;  %v1135_v56 = vmax.f32 %v857_v49, %v1024_v53  ;;  %3273 = vmatmul.msk.f32.gmra.mxu0 %vm624_vm1, %v600_v52  ;;  %v4421_v31 = vadd.f32 %v4383_v62, %v1614_v54 }
 0x174   : > { %v1185_v57 = vmax.f32 %v1135_v56, 0.0  ;;  %v607_v56 = vld [vmem:[%s4159_s19 + $0x158] sm:$0xff] }
 0x176   : > { %1664 = vmatmul.f32.gmra.mxu2 %v1185_v57 }
 0x177   : > { %v1026_v59 = vpop.f32.mrf.mxu1  ;;  %v862_v60 = vpop.f32.mrf.mxu0 }
 0x178   : > { %v1027_v63 = vadd.f32 %v1026_v59, %v4271_v30  ;;  %v863_v4 = vadd.f32 %v862_v60, %v4269_v29  ;;  %v4446_v59 = vadd.f32 %v4383_v62, %v4364_v38 }
 0x179   : > { %v1617_v0 = vpop.f32.mrf.mxu2 }
 0x17a   : > { %3324 = vmatmul.msk.f32.gmra.mxu1 %vm624_vm1, %v600_v52  ;;  %v4388_v1 = vadd.f32 %v4383_v62, %v1617_v0  ;;  %v1136_v2 = vmax.f32 %v860_v58, %v1027_v63  ;;  %3274 = vmatmul.msk.f32.gmra.mxu0 %vm624_vm1, %v601_v61 }
 0x17c   : > { %1814 = vrot.lane.b32.xlu0 %v4388_v1, %s3952_s23  ;;  %v1186_v3 = vmax.f32 %v1136_v2, 0.0 }
 0x17e   : > { %1667 = vmatmul.f32.gmra.mxu2 %v1186_v3 }
 0x17f   : > { %v1029_v5 = vpop.f32.mrf.mxu1  ;;  %v865_v6 = vpop.f32.mrf.mxu0 }
 0x180   : > { %v1030_v8 = vadd.f32 %v1029_v5, %v4271_v30  ;;  %v866_v13 = vadd.f32 %v865_v6, %v4269_v29 }
 0x181   : > { %v4396_v9 = vpop.f32.mrf.mxu2 }
 0x182   : > { %3325 = vmatmul.msk.f32.gmra.mxu1 %vm624_vm1, %v601_v61  ;;  %v1137_v11 = vmax.f32 %v863_v4, %v1030_v8  ;;  %3275 = vmatmul.msk.f32.gmra.mxu0 %vm624_vm1, %v602_v7  ;;  %v608_v4 = vld [vmem:[%s4159_s19 + $0x160] sm:$0xff] }
 0x184   : > { %1810 = vrot.lane.b32.xlu0 %v4399_v10, %s3952_s23  ;;  %v1187_v12 = vmax.f32 %v1137_v11, 0.0 }
 0x186   : > { %1670 = vmatmul.f32.gmra.mxu2 %v1187_v12 }
 0x187   : > { %v1032_v14 = vpop.f32.mrf.mxu1  ;;  %v868_v15 = vpop.f32.mrf.mxu0 }
 0x188   : > { %v1033_v17 = vadd.f32 %v1032_v14, %v4271_v30  ;;  %v869_v22 = vadd.f32 %v868_v15, %v4269_v29  ;;  %v609_v14 = vld [vmem:[%s4159_s19 + $0x168] sm:$0xff] }
 0x189   : > { %v1623_v18 = vpop.f32.mrf.mxu2 }
 0x18a   : > { %3326 = vmatmul.msk.f32.gmra.mxu1 %vm624_vm1, %v602_v7  ;;  %v4410_v19 = vadd.f32 %v4383_v62, %v1623_v18  ;;  %v1138_v20 = vmax.f32 %v866_v13, %v1033_v17  ;;  %3276 = vmatmul.msk.f32.gmra.mxu0 %vm624_vm1, %v603_v16 }
 0x18c   : > { %1818 = vrot.lane.b32.xlu1 %v4410_v19, %s3952_s23  ;;  %v1188_v21 = vmax.f32 %v1138_v20, 0.0 }
 0x18e   : > { %1673 = vmatmul.f32.gmra.mxu2 %v1188_v21 }
 0x18f   : > { %v1035_v23 = vpop.f32.mrf.mxu1  ;;  %v871_v25 = vpop.f32.mrf.mxu0 }
 0x190   : > { %v1036_v27 = vadd.f32 %v1035_v23, %v4271_v30  ;;  %v872_v35 = vadd.f32 %v871_v25, %v4269_v29  ;;  %v610_v23 = vld [vmem:[%s4159_s19 + $0x170] sm:$0xff] }
 0x191   : > { %v4418_v28 = vpop.f32.mrf.mxu2 }
 0x192   : > { %3327 = vmatmul.msk.f32.gmra.mxu1 %vm624_vm1, %v603_v16  ;;  %v1139_v32 = vmax.f32 %v869_v22, %v1036_v27  ;;  %3277 = vmatmul.msk.f32.gmra.mxu0 %vm624_vm1, %v604_v26 }
 0x194   : > { %1812 = vrot.lane.b32.xlu1 %v4421_v31, %s3952_s23  ;;  %v1189_v34 = vmax.f32 %v1139_v32, 0.0 }
 0x196   : > { %1676 = vmatmul.f32.gmra.mxu2 %v1189_v34 }
 0x197   : > { %v1038_v36 = vpop.f32.mrf.mxu1  ;;  %v874_v37 = vpop.f32.mrf.mxu0 }
 0x198   : > { %v1039_v40 = vadd.f32 %v1038_v36, %v4271_v30  ;;  %v875_v44 = vadd.f32 %v874_v37, %v4269_v29  ;;  %v611_v37 = vld [vmem:[%s4159_s19 + $0x178] sm:$0xff] }
 0x199   : > { %v4430_v41 = vpop.f32.mrf.mxu2 }
 0x19a   : > { %v1140_v42 = vmax.f32 %v872_v35, %v1039_v40  ;;  %3328 = vmatmul.msk.f32.gmra.mxu1 %vm624_vm1, %v604_v26  ;;  %3278 = vmatmul.msk.f32.gmra.mxu0 %vm624_vm1, %v605_v39 }
 0x19c   : > { %v1190_v43 = vmax.f32 %v1140_v42, 0.0 }
 0x19e   : > { %1679 = vmatmul.f32.gmra.mxu2 %v1190_v43 }
 0x19f   : > { %v1041_v45 = vpop.f32.mrf.mxu1  ;;  %v877_v46 = vpop.f32.mrf.mxu0 }
 0x1a0   : > { %v1042_v48 = vadd.f32 %v1041_v45, %v4271_v30  ;;  %v878_v52 = vadd.f32 %v877_v46, %v4269_v29 }
 0x1a1   : > { %v4437_v49 = vpop.f32.mrf.mxu2 }
 0x1a2   : > { %v1141_v50 = vmax.f32 %v875_v44, %v1042_v48  ;;  %3329 = vmatmul.msk.f32.gmra.mxu1 %vm624_vm1, %v605_v39  ;;  %3279 = vmatmul.msk.f32.gmra.mxu0 %vm624_vm1, %v606_v47 }
 0x1a4   : > { %v1191_v51 = vmax.f32 %v1141_v50, 0.0 }
 0x1a6   : > { %1682 = vmatmul.f32.gmra.mxu2 %v1191_v51 }
 0x1a7   : > { %v1044_v53 = vpop.f32.mrf.mxu1  ;;  %v880_v54 = vpop.f32.mrf.mxu0 }
 0x1a8   : > { %v1045_v57 = vadd.f32 %v1044_v53, %v4271_v30  ;;  %v881_v2 = vadd.f32 %v880_v54, %v4269_v29 }
 0x1a9   : > { %v1635_v58 = vpop.f32.mrf.mxu2 }
 0x1aa   : > { %v1142_v60 = vmax.f32 %v878_v52, %v1045_v57  ;;  %v4449_v61 = vadd.f32 %v4383_v62, %v1635_v58  ;;  %3330 = vmatmul.msk.f32.gmra.mxu1 %vm624_vm1, %v606_v47  ;;  %3280 = vmatmul.msk.f32.gmra.mxu0 %vm624_vm1, %v607_v56  ;;  %v612_v47 = vld [vmem:[%s4159_s19 + $0x180] sm:$0xff] }
 0x1ac   : > { %v3759_v63 = vpack.i.bf16 %v4449_v61, %v4446_v59  ;;  %v1192_v0 = vmax.f32 %v1142_v60, 0.0 }
 0x1ae   : > { %1685 = vmatmul.f32.gmra.mxu2 %v1192_v0  ;;  %3760 = vrot.lane.b32.xlu0 %v3759_v63, %s3952_s23 }
 0x1af   : > { %v1047_v38 = vpop.f32.mrf.mxu1  ;;  %v883_v3 = vpop.f32.mrf.mxu0 }
 0x1b0   : > { %v1048_v5 = vadd.f32 %v1047_v38, %v4271_v30  ;;  %v884_v11 = vadd.f32 %v883_v3, %v4269_v29 }
 0x1b1   : > { %v4459_v6 = vpop.f32.mrf.mxu2 }
 0x1b2   : > { %v1143_v7 = vmax.f32 %v881_v2, %v1048_v5  ;;  %3331 = vmatmul.msk.f32.gmra.mxu1 %vm624_vm1, %v607_v56  ;;  %3281 = vmatmul.msk.f32.gmra.mxu0 %vm624_vm1, %v608_v4 }
 0x1b4   : > { %v1193_v8 = vmax.f32 %v1143_v7, 0.0 }
 0x1b6   : > { %1688 = vmatmul.f32.gmra.mxu2 %v1193_v8 }
 0x1b7   : > { %v1050_v12 = vpop.f32.mrf.mxu1  ;;  %v886_v13 = vpop.f32.mrf.mxu0 }
 0x1b8   : > { %v1051_v15 = vadd.f32 %v1050_v12, %v4271_v30  ;;  %v887_v20 = vadd.f32 %v886_v13, %v4269_v29 }
 0x1b9   : > { %v4466_v16 = vpop.f32.mrf.mxu2 }
 0x1ba   : > { %v1144_v17 = vmax.f32 %v884_v11, %v1051_v15  ;;  %3332 = vmatmul.msk.f32.gmra.mxu1 %vm624_vm1, %v608_v4  ;;  %3282 = vmatmul.msk.f32.gmra.mxu0 %vm624_vm1, %v609_v14 }
 0x1bc   : > { %v1194_v18 = vmax.f32 %v1144_v17, 0.0 }
 0x1be   : > { %1691 = vmatmul.f32.gmra.mxu2 %v1194_v18 }
 0x1bf   : > { %v1053_v21 = vpop.f32.mrf.mxu1  ;;  %v889_v22 = vpop.f32.mrf.mxu0 }
 0x1c0   : > { %v1054_v25 = vadd.f32 %v1053_v21, %v4271_v30  ;;  %v890_v34 = vadd.f32 %v889_v22, %v4269_v29 }
 0x1c1   : > { %v4473_v26 = vpop.f32.mrf.mxu2 }
 0x1c2   : > { %v1145_v27 = vmax.f32 %v887_v20, %v1054_v25  ;;  %3333 = vmatmul.msk.f32.gmra.mxu1 %vm624_vm1, %v609_v14  ;;  %3283 = vmatmul.msk.f32.gmra.mxu0 %vm624_vm1, %v610_v23 }
 0x1c4   : > { %v1195_v32 = vmax.f32 %v1145_v27, 0.0 }
 0x1c6   : > { %1694 = vmatmul.f32.gmra.mxu2 %v1195_v32 }
 0x1c7   : > { %v1056_v35 = vpop.f32.mrf.mxu1  ;;  %v892_v36 = vpop.f32.mrf.mxu0 }
 0x1c8   : > { %v1057_v39 = vadd.f32 %v1056_v35, %v4271_v30  ;;  %v893_v44 = vadd.f32 %v892_v36, %v4269_v29 }
 0x1c9   : > { %v4480_v40 = vpop.f32.mrf.mxu2 }
 0x1ca   : > { %v1146_v42 = vmax.f32 %v890_v34, %v1057_v39  ;;  %3334 = vmatmul.msk.f32.gmra.mxu1 %vm624_vm1, %v610_v23  ;;  %3284 = vmatmul.msk.f32.gmra.mxu0 %vm624_vm1, %v611_v37 }
 0x1cc   : > { %v1196_v43 = vmax.f32 %v1146_v42, 0.0 }
 0x1ce   : > { %1697 = vmatmul.f32.gmra.mxu2 %v1196_v43  ;;  %v4517_v43 = vadd.f32 %v4383_v62, %v4430_v41  ;;  %v4530_v41 = vadd.f32 %v4383_v62, %v4418_v28 }
 0x1cf   : > { %v1059_v45 = vpop.f32.mrf.mxu1  ;;  %v895_v46 = vpop.f32.mrf.mxu0 }
 0x1d0   : > { %v1060_v48 = vadd.f32 %v1059_v45, %v4271_v30  ;;  %v896_v53 = vadd.f32 %v895_v46, %v4269_v29 }
 0x1d1   : > { %v4487_v50 = vpop.f32.mrf.mxu2 }
 0x1d2   : > { %v1147_v51 = vmax.f32 %v893_v44, %v1060_v48  ;;  %3335 = vmatmul.msk.f32.gmra.mxu1 %vm624_vm1, %v611_v37  ;;  %3285 = vmatmul.msk.f32.gmra.mxu0 %vm624_vm1, %v612_v47  ;;  %v3356_v48 = vld [vmem:[%s6228_s5 + $0xf0] sm:$0xff] }
 0x1d4   : > { %v1197_v52 = vmax.f32 %v1147_v51, 0.0  ;;  %v4534_v51 = vadd.f32 %v4383_v62, %v4466_v16  ;;  %v3354_v16 = vld [vmem:[%s6228_s5 + $0xe0] sm:$0xff] }
 0x1d6   : > { %1700 = vmatmul.f32.gmra.mxu2 %v1197_v52 }
 0x1d7   : > { %v1062_v54 = vpop.f32.mrf.mxu1  ;;  %v898_v56 = vpop.f32.mrf.mxu0 }
 0x1d8   : > { %v1063_v57 = vadd.f32 %v1062_v54, %v4271_v30  ;;  %v899_v0 = vadd.f32 %v898_v56, %v4269_v29  ;;  %v3355_v54 = vld [vmem:[%s6228_s5 + $0xe8] sm:$0xff] }
 0x1d9   : > { %v4493_v58 = vpop.f32.mrf.mxu2 }
 0x1da   : > { %v1148_v60 = vmax.f32 %v896_v53, %v1063_v57  ;;  %3336 = vmatmul.msk.f32.gmra.mxu1 %vm624_vm1, %v612_v47  ;;  %v3357_v47 = vld [vmem:[%s6228_s5 + $0xf8] sm:$0xff] }
 0x1db   : > { %2102 = vmatpush.msra.mxu3 %v3357_v47 }
 0x1dc   : > { %v1198_v63 = vmax.f32 %v1148_v60, 0.0 }
 0x1dd   : > { %2103 = vmatpush.msra.mxu3 %v3356_v48 }
 0x1de   : > { %1703 = vmatmul.f32.gmra.mxu2 %v1198_v63  ;;  %v4547_v63 = vadd.f32 %v4383_v62, %v4396_v9  ;;  %v3352_v9 = vld [vmem:[%s6228_s5 + $0xd0] sm:$0xff] }
 0x1df   : > { %v1065_v2 = vpop.f32.mrf.mxu1  ;;  %v901_v38 = vpop.f32.mrf.mxu0  ;;  %2104 = vmatpush.msra.mxu3 %v3355_v54 }
 0x1e0   : > { %v1066_v3 = vadd.f32 %v1065_v2, %v4271_v30  ;;  %v902_v8 = vadd.f32 %v901_v38, %v4269_v29 }
 0x1e1   : > { %v4498_v4 = vpop.f32.mrf.mxu2  ;;  %2105 = vmatpush.msra.mxu3 %v3354_v16 }
 0x1e2   : > { %v1149_v5 = vmax.f32 %v899_v0, %v1066_v3  ;;  %3337 = vmatmul.msk.f32.gmra.mxu1 %vm624_vm1, %v4162_v55  ;;  %v3764_v0 = vpack.i.bf16 %v4530_v41, %v4534_v51  ;;  %v3353_v3 = vld [vmem:[%s6228_s5 + $0xd8] sm:$0xff] }
 0x1e3   : > { %2106 = vmatpush.msra.mxu3 %v3353_v3 }
 0x1e4   : > { %v1199_v7 = vmax.f32 %v1149_v5, 0.0 }
 0x1e5   : > { %2107 = vmatpush.msra.mxu3 %v3352_v9 }
 0x1e6   : > { %1706 = vmatmul.f32.gmra.mxu2 %v1199_v7  ;;  %v4565_v7 = vadd.f32 %v4383_v62, %v4459_v6  ;;  %v3350_v6 = vld [vmem:[%s6228_s5 + $0xc0] sm:$0xff] }
 0x1e7   : > { %v1068_v11 = vpop.f32.mrf.mxu1  ;;  %v904_v12 = vpop.f32.mrf.mxu0 }
 0x1e8   : > { %v1069_v13 = vadd.f32 %v1068_v11, %v4271_v30  ;;  %v905_v20 = vadd.f32 %v904_v12, %v4269_v29  ;;  %v3351_v12 = vld [vmem:[%s6228_s5 + $0xc8] sm:$0xff] }
 0x1e9   : > { %v4504_v14 = vpop.f32.mrf.mxu2  ;;  %2108 = vmatpush.msra.mxu3 %v3351_v12 }
 0x1ea   : > { %v1150_v15 = vmax.f32 %v902_v8, %v1069_v13  ;;  %v4569_v8 = vadd.f32 %v4383_v62, %v4493_v58 }
 0x1eb   : > { %2109 = vmatpush.msra.mxu3 %v3350_v6  ;;  %v2075_v6 = vld [vmem:[%s6228_s5 + $0x58] sm:$0xff] }
 0x1ec   : > { %v1200_v17 = vmax.f32 %v1150_v15, 0.0  ;;  %v3779_v58 = vpack.i.bf16 %v4565_v7, %v4569_v8 }
 0x1ee   : > { %1709 = vmatmul.f32.gmra.mxu2 %v1200_v17  ;;  %v1815_v18 = vpop.permute.xlu0 %1814 }
 0x1ef   : > { %v1961_v21 = vmax.f32 %v4388_v1, %v1815_v18  ;;  %v1071_v22 = vpop.f32.mrf.mxu1  ;;  %v907_v55 = vpop.f32.mrf.mxu0 }
 0x1f0   : > { %v1072_v23 = vadd.f32 %v1071_v22, %v4271_v30  ;;  %v908_v36 = vadd.f32 %v907_v55, %v4269_v29  ;;  %v4588_v22 = vadd.f32 %v4383_v62, %v4487_v50  ;;  %v3347_v50 = vld [vmem:[%s6228_s5 + $0xa8] sm:$0xff] }
 0x1f1   : > { %v2011_v25 = vmax.f32 %v1961_v21, 0.0  ;;  %v4509_v27 = vpop.f32.mrf.mxu2  ;;  %v3349_v21 = vld [vmem:[%s6228_s5 + $0xb8] sm:$0xff] }
 0x1f2   : > { %v1151_v32 = vmax.f32 %v905_v20, %v1072_v23  ;;  %2110 = vmatpush.msra.mxu3 %v3349_v21  ;;  %v2074_v21 = vld [vmem:[%s6228_s5 + $0x50] sm:$0xff] }
 0x1f3   : > { %2081 = vrot.lane.b32.xlu2 %v2011_v25, %s3952_s23  ;;  %v3348_v25 = vld [vmem:[%s6228_s5 + $0xb0] sm:$0xff] }
 0x1f4   : > { %v1201_v34 = vmax.f32 %v1151_v32, 0.0  ;;  %2111 = vmatpush.msra.mxu3 %v3348_v25  ;;  %v2073_v25 = vld [vmem:[%s6228_s5 + $0x48] sm:$0xff] }
 0x1f6   : > { %1712 = vmatmul.f32.gmra.mxu2 %v1201_v34  ;;  %v1811_v35 = vpop.permute.xlu0 %1810  ;;  %2112 = vmatpush.msra.mxu3 %v3347_v50 }
 0x1f7   : > { %v1959_v37 = vmax.f32 %v4399_v10, %v1811_v35  ;;  %v1074_v39 = vpop.f32.mrf.mxu1  ;;  %v910_v42 = vpop.f32.mrf.mxu0 }
 0x1f8   : > { %v1075_v1 = vadd.f32 %v1074_v39, %v4271_v30  ;;  %v911_v53 = vadd.f32 %v910_v42, %v4269_v29  ;;  %v3346_v39 = vld [vmem:[%s6228_s5 + $0xa0] sm:$0xff] }
 0x1f9   : > { %v2009_v44 = vmax.f32 %v1959_v37, 0.0  ;;  %v1665_v45 = vpop.f32.mrf.mxu2  ;;  %2113 = vmatpush.msra.mxu3 %v3346_v39 }
 0x1fa   : > { %v1152_v46 = vmax.f32 %v908_v36, %v1075_v1  ;;  %v4591_v55 = vadd.f32 %v4383_v62, %v1665_v45 }
 0x1fb   : > { %1822 = vrot.lane.b32.xlu2 %v4517_v43, %s3952_s23  ;;  %2059 = vrot.lane.b32.xlu1 %v2009_v44, %s3952_s23  ;;  %v3345_v44 = vld [vmem:[%s6228_s5 + $0x98] sm:$0xff] }
 0x1fc   : > { %v1202_v10 = vmax.f32 %v1152_v46, 0.0  ;;  %v3794_v34 = vpack.i.bf16 %v4588_v22, %v4591_v55  ;;  %2114 = vmatpush.msra.mxu3 %v3345_v44  ;;  %v3344_v46 = vld [vmem:[%s6228_s5 + $0x90] sm:$0xff] }
 0x1fe   : > { %1715 = vmatmul.f32.gmra.mxu2 %v1202_v10  ;;  %v1819_v52 = vpop.permute.xlu1 %1818  ;;  %2115 = vmatpush.msra.mxu3 %v3344_v46  ;;  %v3343_v10 = vld [vmem:[%s6228_s5 + $0x88] sm:$0xff] }
 0x1ff   : > { %v1963_v56 = vmax.f32 %v4410_v19, %v1819_v52  ;;  %v1077_v57 = vpop.f32.mrf.mxu1  ;;  %v913_v60 = vpop.f32.mrf.mxu0 }
 0x200   : > { %v1078_v28 = vadd.f32 %v1077_v57, %v4271_v30  ;;  %v914_v11 = vadd.f32 %v913_v60, %v4269_v29  ;;  %2116 = vmatpush.msra.mxu3 %v3343_v10  ;;  %v2079_v60 = vld [vmem:[%s6228_s5 + $0x78] sm:$0xff] }
 0x201   : > { %v2013_v2 = vmax.f32 %v1963_v56, 0.0  ;;  %v4551_v38 = vpop.f32.mrf.mxu2  ;;  %v3342_v56 = vld [vmem:[%s6228_s5 + $0x80] sm:$0xff] }
 0x202   : > { %v1153_v19 = vmax.f32 %v911_v53, %v1078_v28  ;;  %v4622_v53 = vadd.f32 %v4383_v62, %v4509_v27  ;;  %2117 = vmatpush.msra.mxu3 %v3342_v56  ;;  %v2078_v27 = vld [vmem:[%s6228_s5 + $0x70] sm:$0xff] }
 0x203   : > { %1816 = vrot.lane.b32.xlu2 %v4547_v63, %s3952_s23  ;;  %3765 = vrot.lane.b32.xlu1 %v3764_v0, %s3952_s23 }
 0x204   : > { %v1203_v5 = vmax.f32 %v1153_v19, 0.0  ;;  %2143 = vrot.lane.b32.xlu0 %v2013_v2, %s3952_s23  ;;  %2122 = vmatpush.msrb.mxu3 %v2079_v60  ;;  %v2077_v19 = vld [vmem:[%s6228_s5 + $0x68] sm:$0xff]  ;;  %v2067_v60 = vld [vmem:[%s6228_s5 + $0x18] sm:$0xff] }
 0x206   : > { %1718 = vmatmul.f32.gmra.mxu2 %v1203_v5  ;;  %2123 = vmatpush.msrb.mxu3 %v2078_v27  ;;  %v2066_v27 = vld [vmem:[%s6228_s5 + $0x10] sm:$0xff] }
 0x207   : > { %v1080_v13 = vpop.f32.mrf.mxu1  ;;  %v916_v15 = vpop.f32.mrf.mxu0 }
 0x208   : > { %v1081_v17 = vadd.f32 %v1080_v13, %v4271_v30  ;;  %v917_v32 = vadd.f32 %v916_v15, %v4269_v29  ;;  %2124 = vmatpush.msrb.mxu3 %v2077_v19 }
 0x209   : > { %v4581_v18 = vpop.f32.mrf.mxu2 }
 0x20a   : > { %v1154_v20 = vmax.f32 %v914_v11, %v1081_v17  ;;  %v2076_v11 = vld [vmem:[%s6228_s5 + $0x60] sm:$0xff] }
 0x20b   : > { %3780 = vrot.lane.b32.xlu1 %v3779_v58, %s3952_s23  ;;  %2125 = vmatpush.msrb.mxu3 %v2076_v11  ;;  %v4707_v11 = vadd.f32 %v4383_v62, %v4551_v38 }
 0x20c   : > { %v1204_v23 = vmax.f32 %v1154_v20, 0.0 }
 0x20d   : > { %2126 = vmatpush.msrb.mxu3 %v2075_v6 }
 0x20e   : > { %1721 = vmatmul.f32.gmra.mxu2 %v1204_v23 }
 0x20f   : > { %v1083_v35 = vpop.f32.mrf.mxu1  ;;  %v919_v36 = vpop.f32.mrf.mxu0  ;;  %2127 = vmatpush.msrb.mxu3 %v2074_v21 }
 0x210   : > { %v1084_v37 = vadd.f32 %v1083_v35, %v4271_v30  ;;  %v920_v47 = vadd.f32 %v919_v36, %v4269_v29 }
 0x211   : > { %v4607_v42 = vpop.f32.mrf.mxu2  ;;  %2128 = vmatpush.msrb.mxu3 %v2073_v25 }
 0x212   : > { %v1155_v1 = vmax.f32 %v917_v32, %v1084_v37  ;;  %v4665_v32 = vadd.f32 %v4383_v62, %v4437_v49  ;;  %v2072_v37 = vld [vmem:[%s6228_s5 + $0x40] sm:$0xff]  ;;  %v2071_v49 = vld [vmem:[%s6228_s5 + $0x38] sm:$0xff] }
 0x213   : > { %3795 = vrot.lane.b32.xlu1 %v3794_v34, %s3952_s23  ;;  %2129 = vmatpush.msrb.mxu3 %v2072_v37  ;;  %v1813_v37 = vpop.permute.xlu1 %1812 }
 0x214   : > { %v1205_v45 = vmax.f32 %v1155_v1, 0.0 }
 0x215   : > { %2130 = vmatpush.msrb.mxu3 %v2071_v49  ;;  %v3549_v49 = vld [vmem:[%s6228_s5 + $0x6f8] sm:$0xff] }
 0x216   : > { %1724 = vmatmul.f32.gmra.mxu2 %v1205_v45  ;;  %v2070_v45 = vld [vmem:[%s6228_s5 + $0x30] sm:$0xff]  ;;  %2637 = vmatpush.msra.mxu1 %v3549_v49 }
 0x217   : > { %v1086_v48 = vpop.f32.mrf.mxu1  ;;  %v922_v52 = vpop.f32.mrf.mxu0  ;;  %2131 = vmatpush.msrb.mxu3 %v2070_v45  ;;  %v1960_v45 = vmax.f32 %v4421_v31, %v1813_v37 }
 0x218   : > { %v1087_v54 = vadd.f32 %v1086_v48, %v4271_v30  ;;  %v923_v3 = vadd.f32 %v922_v52, %v4269_v29 }
 0x219   : > { %v1677_v57 = vpop.f32.mrf.mxu2 }
 0x21a   : > { %v1156_v28 = vmax.f32 %v920_v47, %v1087_v54  ;;  %v4632_v16 = vadd.f32 %v4383_v62, %v1677_v57  ;;  %v2069_v47 = vld [vmem:[%s6228_s5 + $0x28] sm:$0xff]  ;;  %v2068_v54 = vld [vmem:[%s6228_s5 + $0x20] sm:$0xff] }
 0x21b   : > { %2132 = vmatpush.msrb.mxu3 %v2069_v47 }
 0x21c   : > { %v1206_v0 = vmax.f32 %v1156_v28, 0.0  ;;  %v3809_v2 = vpack.i.bf16 %v4622_v53, %v4632_v16 }
 0x21d   : > { %2133 = vmatpush.msrb.mxu3 %v2068_v54  ;;  %v2010_v54 = vmax.f32 %v1960_v45, 0.0  ;;  %v3365_v45 = vld [vmem:[%s6228_s5 + $0x138] sm:$0xff] }
 0x21e   : > { %1727 = vmatmul.f32.gmra.mxu2 %v1206_v0  ;;  %3810 = vrot.lane.b32.xlu1 %v3809_v2, %s3952_s23  ;;  %v2065_v2 = vld [vmem:[%s6228_s5 + $0x8] sm:$0xff] }
 0x21f   : > { %v1089_v5 = vpop.f32.mrf.mxu1  ;;  %v925_v9 = vpop.f32.mrf.mxu0  ;;  %2134 = vmatpush.msrb.mxu3 %v2067_v60 }
 0x220   : > { %v1090_v12 = vadd.f32 %v1089_v5, %v4271_v30  ;;  %v4648_v13 = vpop.permute.xlu0 %3760  ;;  %v926_v34 = vadd.f32 %v925_v9, %v4269_v29  ;;  %v2064_v9 = vld [vmem:[%s6228_s5] sm:$0xff] }
 0x221   : > { %v3763_v15 = vunpack.i.h.bf16 %v4648_v13  ;;  %v4651_v17 = vpop.f32.mrf.mxu2  ;;  %2135 = vmatpush.msrb.mxu3 %v2066_v27 }
 0x222   : > { %v1157_v58 = vmax.f32 %v923_v3, %v1090_v12 }
 0x223   : > { %v1967_v20 = vmax.f32 %v4449_v61, %v3763_v15  ;;  %2136 = vmatpush.msrb.mxu3 %v2065_v2  ;;  %v3372_v2 = vld [vmem:[%s6228_s5 + $0x170] sm:$0xff] }
 0x224   : > { %v1207_v23 = vmax.f32 %v1157_v58, 0.0 }
 0x225   : > { %v2017_v50 = vmax.f32 %v1967_v20, 0.0  ;;  %2137 = vmatpush.msrb.mxu3 %v2064_v9 }
 0x226   : > { %1730 = vmatmul.f32.gmra.mxu2 %v1207_v23 }
 0x227   : > { %v1092_v61 = vpop.f32.mrf.mxu1  ;;  %v3774_v35 = vpack.i.bf16 %v2017_v50, %v4665_v32  ;;  %v928_v36 = vpop.f32.mrf.mxu0 }
 0x228   : > { %v1093_v39 = vadd.f32 %v1092_v61, %v4271_v30  ;;  %v929_v10 = vadd.f32 %v928_v36, %v4269_v29  ;;  %v3581_v36 = vld [vmem:[%s6228_s5 + $0x7f8] sm:$0xff] }
 0x229   : > { %v4673_v1 = vpop.f32.mrf.mxu2  ;;  %3775 = vrot.lane.b32.xlu0 %v3774_v35, %s3952_s23  ;;  %2723 = vmatpush.msrb.mxu2 %v3581_v36 }
 0x22a   : > { %v1158_v44 = vmax.f32 %v926_v34, %v1093_v39 }
 0x22c   : > { %v1208_v46 = vmax.f32 %v1158_v44, 0.0 }
 0x22e   : > { %1733 = vmatmul.f32.gmra.mxu2 %v1208_v46 }
 0x22f   : > { %v1095_v48 = vpop.f32.mrf.mxu1  ;;  %v931_v52 = vpop.f32.mrf.mxu0 }
 0x230   : > { %v1096_v56 = vadd.f32 %v1095_v48, %v4271_v30  ;;  %v932_v19 = vadd.f32 %v931_v52, %v4269_v29  ;;  %v3533_v52 = vld [vmem:[%s6228_s5 + $0x678] sm:$0xff] }
 0x231   : > { %v4690_v57 = vpop.f32.mrf.mxu2  ;;  %2594 = vmatpush.msrb.mxu0 %v3533_v52 }
 0x232   : > { %v1159_v28 = vmax.f32 %v929_v10, %v1096_v56 }
 0x234   : > { %v1209_v0 = vmax.f32 %v1159_v28, 0.0  ;;  %v3373_v28 = vld [vmem:[%s6228_s5 + $0x178] sm:$0xff] }
 0x236   : > { %1736 = vmatmul.f32.gmra.mxu2 %v1209_v0 }
 0x237   : > { %v1098_v3 = vpop.f32.mrf.mxu1  ;;  %v934_v5 = vpop.f32.mrf.mxu0 }
 0x238   : > { %v1099_v12 = vadd.f32 %v1098_v3, %v4271_v30  ;;  %v935_v23 = vadd.f32 %v934_v5, %v4269_v29  ;;  %v3371_v5 = vld [vmem:[%s6228_s5 + $0x168] sm:$0xff] }
 0x239   : > { %v1689_v15 = vpop.f32.mrf.mxu2 }
 0x23a   : > { %v1160_v6 = vmax.f32 %v932_v19, %v1099_v12  ;;  %v4711_v58 = vadd.f32 %v4383_v62, %v1689_v15  ;;  %v3370_v15 = vld [vmem:[%s6228_s5 + $0x160] sm:$0xff] }
 0x23c   : > { %v1210_v20 = vmax.f32 %v1160_v6, 0.0  ;;  %v3824_v21 = vpack.i.bf16 %v4707_v11, %v4711_v58 }
 0x23e   : > { %1739 = vmatmul.f32.gmra.mxu2 %v1210_v20  ;;  %3825 = vrot.lane.b32.xlu1 %v3824_v21, %s3952_s23  ;;  %v3369_v21 = vld [vmem:[%s6228_s5 + $0x158] sm:$0xff] }
 0x23f   : > { %v1101_v25 = vpop.f32.mrf.mxu1  ;;  %v937_v38 = vpop.f32.mrf.mxu0 }
 0x240   : > { %v1102_v50 = vadd.f32 %v1101_v25, %v4271_v30  ;;  %v938_v39 = vadd.f32 %v937_v38, %v4269_v29 }
 0x241   : > { %v4718_v34 = vpop.f32.mrf.mxu2 }
 0x242   : > { %v1161_v61 = vmax.f32 %v935_v23, %v1102_v50  ;;  %v3368_v50 = vld [vmem:[%s6228_s5 + $0x150] sm:$0xff] }
 0x244   : > { %v1211_v35 = vmax.f32 %v1161_v61, 0.0  ;;  %v4761_v61 = vadd.f32 %v4383_v62, %v4480_v40 }
 0x246   : > { %1742 = vmatmul.f32.gmra.mxu2 %v1211_v35 }
 0x247   : > { %v1104_v44 = vpop.f32.mrf.mxu1  ;;  %v940_v10 = vpop.f32.mrf.mxu0 }
 0x248   : > { %v1105_v46 = vadd.f32 %v1104_v44, %v4271_v30  ;;  %v941_v31 = vadd.f32 %v940_v10, %v4269_v29  ;;  %v3366_v44 = vld [vmem:[%s6228_s5 + $0x140] sm:$0xff]  ;;  %v3364_v10 = vld [vmem:[%s6228_s5 + $0x130] sm:$0xff] }
 0x249   : > { %v4729_v47 = vpop.f32.mrf.mxu2 }
 0x24a   : > { %v1162_v48 = vmax.f32 %v938_v39, %v1105_v46 }
 0x24c   : > { %v1212_v56 = vmax.f32 %v1162_v48, 0.0  ;;  %v947_v48 = vadd.f32 %v4261_v24, %v4269_v29  ;;  %v3362_v24 = vld [vmem:[%s6228_s5 + $0x120] sm:$0xff] }
 0x24d   : > { %v2082_v60 = vpop.permute.xlu2 %2081 }
 0x24e   : > { %1745 = vmatmul.f32.gmra.mxu2 %v1212_v56  ;;  %v2084_v27 = vsel %vm2062_vm3, %v2010_v54, %v2082_v60  ;;  %v3363_v56 = vld [vmem:[%s6228_s5 + $0x128] sm:$0xff] }
 0x24f   : > { %v1107_v0 = vpop.f32.mrf.mxu1  ;;  %2118 = vmatmul.f32.vlgmr.msra.gmra.mxu3 %v2084_v27  ;;  %v943_v12 = vpop.f32.mrf.mxu0  ;;  %v3361_v27 = vld [vmem:[%s6228_s5 + $0x118] sm:$0xff] }
 0x250   : > { %v1108_v19 = vadd.f32 %v1107_v0, %v4271_v30  ;;  %2164 = vmatpush.msra.mxu3 %v3373_v28  ;;  %v944_v25 = vadd.f32 %v943_v12, %v4269_v29  ;;  %v3580_v28 = vld [vmem:[%s6228_s5 + $0x7f0] sm:$0xff]  ;;  %v3762_v29 = vunpack.i.l.bf16 %v4648_v13  ;;  %v3359_v13 = vld [vmem:[%s6228_s5 + $0x108] sm:$0xff]  ;;  %v3389_v12 = vld [vmem:[%s6228_s5 + $0x1f8] sm:$0xff] }
 0x251   : > { %v4743_v3 = vpop.f32.mrf.mxu2  ;;  %2724 = vmatpush.msrb.mxu2 %v3580_v28 }
 0x252   : > { %v1163_v9 = vmax.f32 %v941_v31, %v1108_v19  ;;  %2165 = vmatpush.msra.mxu3 %v3372_v2  ;;  %v3548_v31 = vld [vmem:[%s6228_s5 + $0x6f0] sm:$0xff]  ;;  %v1958_v0 = vmax.f32 %v4446_v59, %v3762_v29 }
 0x253   : > { %2638 = vmatpush.msra.mxu1 %v3548_v31  ;;  %v3532_v19 = vld [vmem:[%s6228_s5 + $0x670] sm:$0xff] }
 0x254   : > { %v1213_v6 = vmax.f32 %v1163_v9, 0.0  ;;  %2166 = vmatpush.msra.mxu3 %v3371_v5  ;;  %v3358_v5 = vld [vmem:[%s6228_s5 + $0x100] sm:$0xff]  ;;  %2595 = vmatpush.msrb.mxu0 %v3532_v19  ;;  %v2008_v9 = vmax.f32 %v1958_v0, 0.0  ;;  %v4889_v0 = vadd.f32 %v4383_v62, %v4581_v18 }
 0x255   : > { %v1823_v20 = vpop.permute.xlu2 %1822  ;;  %v4905_v18 = vld [vmem:[%s6227_s4] ss:$0 sm:$0xff] }
 0x256   : > { %v1965_v23 = vmax.f32 %v4517_v43, %v1823_v20  ;;  %1748 = vmatmul.f32.gmra.mxu2 %v1213_v6  ;;  %2167 = vmatpush.msra.mxu3 %v3370_v15  ;;  %v3367_v43 = vld [vmem:[%s6228_s5 + $0x148] sm:$0xff]  ;;  %v3388_v20 = vld [vmem:[%s6228_s5 + $0x1f0] sm:$0xff] }
 0x257   : > { %v1110_v38 = vpop.f32.mrf.mxu1 }
 0x258   : > { %v2015_v35 = vmax.f32 %v1965_v23, 0.0  ;;  %v1111_v36 = vadd.f32 %v1110_v38, %v4271_v30  ;;  %2168 = vmatpush.msra.mxu3 %v3369_v21  ;;  %v3386_v38 = vld [vmem:[%s6228_s5 + $0x1e0] sm:$0xff] }
 0x259   : > { %v4764_v37 = vpop.f32.mrf.mxu2 }
 0x25a   : > { %v3769_v39 = vpack.i.bf16 %v2015_v35, %v4761_v61  ;;  %v1164_v49 = vmax.f32 %v944_v25, %v1111_v36  ;;  %2169 = vmatpush.msra.mxu3 %v3368_v50  ;;  %v3387_v25 = vld [vmem:[%s6228_s5 + $0x1e8] sm:$0xff] }
 0x25b   : > { %v3579_v36 = vld [vmem:[%s6228_s5 + $0x7e8] sm:$0xff] }
 0x25c   : > { %v1214_v40 = vmax.f32 %v1164_v49, 0.0  ;;  %3770 = vrot.lane.b32.xlu2 %v3769_v39, %s3952_s23  ;;  %2170 = vmatpush.msra.mxu3 %v3367_v43  ;;  %v3385_v39 = vld [vmem:[%s6228_s5 + $0x1d8] sm:$0xff] }
 0x25d   : > { %v1817_v15 = vpop.permute.xlu2 %1816  ;;  %2725 = vmatpush.msrb.mxu2 %v3579_v36 }
 0x25e   : > { %1751 = vmatmul.f32.gmra.mxu2 %v1214_v40  ;;  %2171 = vmatpush.msra.mxu3 %v3366_v44  ;;  %v1962_v21 = vmax.f32 %v4547_v63, %v1817_v15  ;;  %v3384_v40 = vld [vmem:[%s6228_s5 + $0x1d0] sm:$0xff] }
 0x25f   : > { %v1113_v46 = vpop.f32.mrf.mxu1  ;;  %v3376_v15 = vld [vmem:[%s6228_s5 + $0x190] sm:$0xff] }
 0x260   : > { %v1114_v52 = vadd.f32 %v1113_v46, %v4271_v30  ;;  %2172 = vmatpush.msra.mxu3 %v3365_v45  ;;  %v2012_v50 = vmax.f32 %v1962_v21, 0.0  ;;  %v4849_v46 = vadd.f32 %v4383_v62, %v4504_v14  ;;  %v3382_v14 = vld [vmem:[%s6228_s5 + $0x1c0] sm:$0xff] }
 0x261   : > { %v4783_v54 = vpop.f32.mrf.mxu2  ;;  %v3374_v21 = vld [vmem:[%s6228_s5 + $0x180] sm:$0xff] }
 0x262   : > { %v1165_v60 = vmax.f32 %v947_v48, %v1114_v52  ;;  %2173 = vmatpush.msra.mxu3 %v3364_v10  ;;  %v4853_v10 = vadd.f32 %v4383_v62, %v4607_v42  ;;  %v3547_v42 = vld [vmem:[%s6228_s5 + $0x6e8] sm:$0xff] }
 0x263   : > { %2639 = vmatpush.msra.mxu1 %v3547_v42  ;;  %v3397_v42 = vld [vmem:[%s6228_s5 + $0x238] sm:$0xff] }
 0x264   : > { %v1215_v30 = vmax.f32 %v1165_v60, 0.0  ;;  %2174 = vmatpush.msra.mxu3 %v3363_v56 }
 0x266   : > { %3341 = vmatmul.msk.f32.gmra.mxu2 %vm3729_vm4, %v1215_v30  ;;  %2175 = vmatpush.msra.mxu3 %v3362_v24  ;;  %v3381_v24 = vld [vmem:[%s6228_s5 + $0x1b8] sm:$0xff]  ;;  %v3380_v30 = vld [vmem:[%s6228_s5 + $0x1b0] sm:$0xff] }
 0x268   : > { %2176 = vmatpush.msra.mxu3 %v3361_v27  ;;  %v3531_v27 = vld [vmem:[%s6228_s5 + $0x668] sm:$0xff] }
 0x269   : > { %v4806_v2 = vpop.f32.mrf.mxu2  ;;  %2596 = vmatpush.msrb.mxu0 %v3531_v27  ;;  %v3393_v27 = vld [vmem:[%s6228_s5 + $0x218] sm:$0xff] }
 0x26a   : > { %2177 = vmatpush.msra.mxu3 %v3360_v33 }
 0x26c   : > { %2178 = vmatpush.msra.mxu3 %v3359_v13 }
 0x26d   : > { %v2060_v59 = vpop.permute.xlu1 %2059 }
 0x26e   : > { %v2063_v6 = vsel %vm2062_vm3, %v2008_v9, %v2060_v59  ;;  %2179 = vmatpush.msra.mxu3 %v3358_v5  ;;  %v3378_v5 = vld [vmem:[%s6228_s5 + $0x1a0] sm:$0xff]  ;;  %v4909_v9 = vadd.f32 %v4905_v18, %v4673_v1  ;;  %v4913_v59 = vadd.f32 %v4905_v18, %v4729_v47 }
 0x26f   : > { %2138 = vmatmul.f32.vlgmr.msrb.gmra.mxu3 %v2063_v6  ;;  %v3578_v1 = vld [vmem:[%s6228_s5 + $0x7e0] sm:$0xff] }
 0x270   : > { %2207 = vmatpush.msrb.mxu3 %v3389_v12  ;;  %v3814_v47 = vpack.i.bf16 %v4909_v9, %v4913_v59  ;;  %2726 = vmatpush.msrb.mxu2 %v3578_v1 }
 0x271   : > { %v4825_v23 = vpop.f32.mrf.mxu2 }
 0x272   : > { %2208 = vmatpush.msrb.mxu3 %v3388_v20  ;;  %v3375_v20 = vld [vmem:[%s6228_s5 + $0x188] sm:$0xff] }
 0x274   : > { %2209 = vmatpush.msrb.mxu3 %v3387_v25  ;;  %v3405_v25 = vld [vmem:[%s6228_s5 + $0x278] sm:$0xff] }
 0x275   : > { %v4833_v35 = vpop.permute.xlu1 %3765 }
 0x276   : > { %v3767_v63 = vunpack.i.l.bf16 %v4833_v35  ;;  %v2144_v43 = vpop.permute.xlu0 %2143  ;;  %2210 = vmatpush.msrb.mxu3 %v3386_v38  ;;  %v3404_v38 = vld [vmem:[%s6228_s5 + $0x270] sm:$0xff]  ;;  %v3768_v1 = vunpack.i.h.bf16 %v4833_v35 }
 0x277   : > { %v2146_v49 = vsel %vm2062_vm3, %v2012_v50, %v2144_v43  ;;  %v3403_v43 = vld [vmem:[%s6228_s5 + $0x268] sm:$0xff] }
 0x278   : > { %v1969_v44 = vmax.f32 %v4534_v51, %v3767_v63  ;;  %2180 = vmatmul.f32.vlgmr.msra.gmra.mxu3 %v2146_v49  ;;  %v3383_v51 = vld [vmem:[%s6228_s5 + $0x1c8] sm:$0xff]  ;;  %v3402_v49 = vld [vmem:[%s6228_s5 + $0x260] sm:$0xff] }
 0x279   : > { %v1713_v45 = vpop.f32.mrf.mxu2  ;;  %2211 = vmatpush.msrb.mxu3 %v3385_v39 }
 0x27a   : > { %v2019_v48 = vmax.f32 %v1969_v44, 0.0  ;;  %v4856_v52 = vadd.f32 %v4383_v62, %v1713_v45  ;;  %v3377_v62 = vld [vmem:[%s6228_s5 + $0x198] sm:$0xff]  ;;  %v4954_v44 = vadd.f32 %v4905_v18, %v4718_v34 }
 0x27b   : > { %2212 = vmatpush.msrb.mxu3 %v3384_v40  ;;  %v3401_v45 = vld [vmem:[%s6228_s5 + $0x258] sm:$0xff] }
 0x27c   : > { %v3839_v56 = vpack.i.bf16 %v4853_v10, %v4856_v52  ;;  %v3784_v60 = vpack.i.bf16 %v2019_v48, %v4849_v46  ;;  %v3546_v48 = vld [vmem:[%s6228_s5 + $0x6e0] sm:$0xff] }
 0x27d   : > { %v4870_v28 = vpop.permute.xlu1 %3780  ;;  %2213 = vmatpush.msrb.mxu3 %v3383_v51  ;;  %2640 = vmatpush.msra.mxu1 %v3546_v48  ;;  %v3400_v51 = vld [vmem:[%s6228_s5 + $0x250] sm:$0xff] }
 0x27e   : > { %v3782_v31 = vunpack.i.l.bf16 %v4870_v28  ;;  %3840 = vrot.lane.b32.xlu1 %v3839_v56, %s3952_s23  ;;  %3785 = vrot.lane.b32.xlu2 %v3784_v60, %s3952_s23  ;;  %v3399_v56 = vld [vmem:[%s6228_s5 + $0x248] sm:$0xff]  ;;  %v3398_v60 = vld [vmem:[%s6228_s5 + $0x240] sm:$0xff] }
 0x27f   : > { %2214 = vmatpush.msrb.mxu3 %v3382_v14  ;;  %v3530_v14 = vld [vmem:[%s6228_s5 + $0x660] sm:$0xff] }
 0x280   : > { %v1973_v29 = vmax.f32 %v4569_v8, %v3782_v31  ;;  %v3379_v8 = vld [vmem:[%s6228_s5 + $0x1a8] sm:$0xff]  ;;  %2597 = vmatpush.msrb.mxu0 %v3530_v14  ;;  %v3396_v31 = vld [vmem:[%s6228_s5 + $0x230] sm:$0xff]  ;;  %v3418_v14 = vld [vmem:[%s6228_s5 + $0x2e0] sm:$0xff] }
 0x281   : > { %v4885_v33 = vpop.f32.mrf.mxu2  ;;  %2215 = vmatpush.msrb.mxu3 %v3381_v24 }
 0x282   : > { %v2023_v13 = vmax.f32 %v1973_v29, 0.0  ;;  %v3395_v29 = vld [vmem:[%s6228_s5 + $0x228] sm:$0xff] }
 0x283   : > { %2216 = vmatpush.msrb.mxu3 %v3380_v30  ;;  %v3394_v30 = vld [vmem:[%s6228_s5 + $0x220] sm:$0xff] }
 0x284   : > { %v3799_v19 = vpack.i.bf16 %v2023_v13, %v4889_v0  ;;  %v3392_v13 = vld [vmem:[%s6228_s5 + $0x210] sm:$0xff] }
 0x285   : > { %2217 = vmatpush.msrb.mxu3 %v3379_v8  ;;  %v4915_v12 = vpop.permute.xlu1 %3795 }
 0x286   : > { %3800 = vrot.lane.b32.xlu2 %v3799_v19, %s3952_s23  ;;  %v3391_v19 = vld [vmem:[%s6228_s5 + $0x208] sm:$0xff] }
 0x287   : > { %2218 = vmatpush.msrb.mxu3 %v3378_v5  ;;  %v3390_v5 = vld [vmem:[%s6228_s5 + $0x200] sm:$0xff] }
 0x289   : > { %v4920_v6 = vpop.f32.mrf.mxu2  ;;  %2219 = vmatpush.msrb.mxu3 %v3377_v62  ;;  %v3577_v62 = vld [vmem:[%s6228_s5 + $0x7d8] sm:$0xff] }
 0x28a   : > { %2727 = vmatpush.msrb.mxu2 %v3577_v62 }
 0x28b   : > { %2220 = vmatpush.msrb.mxu3 %v3376_v15  ;;  %v3545_v15 = vld [vmem:[%s6228_s5 + $0x6d8] sm:$0xff] }
 0x28c   : > { %2641 = vmatpush.msra.mxu1 %v3545_v15  ;;  %v3413_v15 = vld [vmem:[%s6228_s5 + $0x2b8] sm:$0xff] }
 0x28d   : > { %2221 = vmatpush.msrb.mxu3 %v3375_v20  ;;  %v3529_v20 = vld [vmem:[%s6228_s5 + $0x658] sm:$0xff] }
 0x28e   : > { %3815 = vrot.lane.b32.xlu2 %v3814_v47, %s3952_s23  ;;  %2598 = vmatpush.msrb.mxu0 %v3529_v20  ;;  %v3412_v20 = vld [vmem:[%s6228_s5 + $0x2b0] sm:$0xff] }
 0x28f   : > { %2222 = vmatpush.msrb.mxu3 %v3374_v21  ;;  %v1964_v21 = vmax.f32 %v4530_v41, %v3768_v1  ;;  %v3420_v41 = vld [vmem:[%s6228_s5 + $0x2f0] sm:$0xff]  ;;  %v3411_v1 = vld [vmem:[%s6228_s5 + $0x2a8] sm:$0xff] }
 0x290   : > { %v4940_v50 = vpop.permute.xlu1 %3810 }
 0x291   : > { %2250 = vmatpush.msra.mxu3 %v3405_v25  ;;  %v3812_v36 = vunpack.i.l.bf16 %v4940_v50  ;;  %v4943_v63 = vpop.f32.mrf.mxu2 }
 0x293   : > { %2251 = vmatpush.msra.mxu3 %v3404_v38  ;;  %v1981_v39 = vmax.f32 %v4632_v16, %v3812_v36 }
 0x295   : > { %2252 = vmatpush.msra.mxu3 %v3403_v43  ;;  %v2031_v40 = vmax.f32 %v1981_v39, 0.0  ;;  %v2014_v43 = vmax.f32 %v1964_v21, 0.0  ;;  %v3409_v21 = vld [vmem:[%s6228_s5 + $0x298] sm:$0xff] }
 0x297   : > { %2253 = vmatpush.msra.mxu3 %v3402_v49  ;;  %v3844_v16 = vpack.i.bf16 %v4954_v44, %v2031_v40  ;;  %v3421_v40 = vld [vmem:[%s6228_s5 + $0x2f8] sm:$0xff] }
 0x299   : > { %2254 = vmatpush.msra.mxu3 %v3401_v45  ;;  %v4966_v34 = vpop.f32.mrf.mxu2  ;;  %3845 = vrot.lane.b32.xlu1 %v3844_v16, %s3952_s23  ;;  %v5030_v16 = vadd.f32 %v4905_v18, %v4473_v26  ;;  %v3417_v26 = vld [vmem:[%s6228_s5 + $0x2d8] sm:$0xff] }
 0x29b   : > { %2255 = vmatpush.msra.mxu3 %v3400_v51  ;;  %v3776_v47 = vpop.permute.xlu0 %3775 }
 0x29c   : > { %v3777_v38 = vunpack.i.l.bf16 %v3776_v47 }
 0x29d   : > { %2256 = vmatpush.msra.mxu3 %v3399_v56  ;;  %v3419_v56 = vld [vmem:[%s6228_s5 + $0x2e8] sm:$0xff] }
 0x29e   : > { %v1966_v45 = vmax.f32 %v4665_v32, %v3777_v38  ;;  %v3783_v38 = vunpack.i.h.bf16 %v4870_v28 }
 0x29f   : > { %2257 = vmatpush.msra.mxu3 %v3398_v60 }
 0x2a0   : > { %v2016_v32 = vmax.f32 %v1966_v45, 0.0 }
 0x2a1   : > { %2258 = vmatpush.msra.mxu3 %v3397_v42  ;;  %v4984_v24 = vpop.f32.mrf.mxu2  ;;  %v3778_v42 = vunpack.i.h.bf16 %v3776_v47  ;;  %v3410_v47 = vld [vmem:[%s6228_s5 + $0x2a0] sm:$0xff] }
 0x2a3   : > { %2259 = vmatpush.msra.mxu3 %v3396_v31  ;;  %v2232_v31 = vsel %vm2062_vm3, %v2016_v32, %v3778_v42  ;;  %v3436_v42 = vld [vmem:[%s6228_s5 + $0x370] sm:$0xff] }
 0x2a5   : > { %2260 = vmatpush.msra.mxu3 %v3395_v29  ;;  %v3416_v29 = vld [vmem:[%s6228_s5 + $0x2d0] sm:$0xff] }
 0x2a7   : > { %2261 = vmatpush.msra.mxu3 %v3394_v30  ;;  %v3415_v30 = vld [vmem:[%s6228_s5 + $0x2c8] sm:$0xff] }
 0x2a9   : > { %2262 = vmatpush.msra.mxu3 %v3393_v27  ;;  %v4998_v8 = vpop.f32.mrf.mxu2  ;;  %v3576_v27 = vld [vmem:[%s6228_s5 + $0x7d0] sm:$0xff] }
 0x2aa   : > { %2728 = vmatpush.msrb.mxu2 %v3576_v27 }
 0x2ab   : > { %2263 = vmatpush.msra.mxu3 %v3392_v13  ;;  %v3544_v13 = vld [vmem:[%s6228_s5 + $0x6d0] sm:$0xff] }
 0x2ac   : > { %2642 = vmatpush.msra.mxu1 %v3544_v13 }
 0x2ad   : > { %2264 = vmatpush.msra.mxu3 %v3391_v19  ;;  %v3528_v19 = vld [vmem:[%s6228_s5 + $0x650] sm:$0xff] }
 0x2ae   : > { %2599 = vmatpush.msrb.mxu0 %v3528_v19 }
 0x2af   : > { %2265 = vmatpush.msra.mxu3 %v3390_v5  ;;  %v3414_v5 = vld [vmem:[%s6228_s5 + $0x2c0] sm:$0xff] }
 0x2b1   : > { %v5017_v25 = vpop.f32.mrf.mxu2 }
 0x2b6   : > { %v3771_v36 = vpop.permute.xlu2 %3770 }
 0x2b7   : > { %v3773_v39 = vunpack.i.h.bf16 %v3771_v36  ;;  %v3772_v49 = vunpack.i.l.bf16 %v3771_v36 }
 0x2b9   : > { %v1971_v48 = vmax.f32 %v4761_v61, %v3772_v49  ;;  %v2189_v35 = vsel %vm2062_vm3, %v2014_v43, %v3773_v39  ;;  %v5035_v60 = vpop.f32.mrf.mxu2  ;;  %v3408_v43 = vld [vmem:[%s6228_s5 + $0x290] sm:$0xff]  ;;  %v3407_v39 = vld [vmem:[%s6228_s5 + $0x288] sm:$0xff]  ;;  %v1968_v49 = vmax.f32 %v4565_v7, %v3783_v38 }
 0x2ba   : > { %2223 = vmatmul.f32.vlgmr.msrb.gmra.mxu3 %v2189_v35  ;;  %v3432_v38 = vld [vmem:[%s6228_s5 + $0x350] sm:$0xff] }
 0x2bb   : > { %v2021_v51 = vmax.f32 %v1971_v48, 0.0  ;;  %2293 = vmatpush.msrb.mxu3 %v3421_v40  ;;  %v3406_v40 = vld [vmem:[%s6228_s5 + $0x280] sm:$0xff]  ;;  %v2018_v45 = vmax.f32 %v1968_v49, 0.0  ;;  %v3798_v48 = vunpack.i.h.bf16 %v4915_v12 }
 0x2bd   : > { %v3789_v61 = vpack.i.bf16 %v2021_v51, %v5030_v16  ;;  %2294 = vmatpush.msrb.mxu3 %v3420_v41  ;;  %v3797_v51 = vunpack.i.l.bf16 %v4915_v12  ;;  %v3543_v12 = vld [vmem:[%s6228_s5 + $0x6c8] sm:$0xff] }
 0x2be   : > { %2643 = vmatpush.msra.mxu1 %v3543_v12 }
 0x2bf   : > { %3790 = vrot.lane.b32.xlu0 %v3789_v61, %s3952_s23  ;;  %2295 = vmatpush.msrb.mxu3 %v3419_v56  ;;  %v3437_v61 = vld [vmem:[%s6228_s5 + $0x378] sm:$0xff]  ;;  %v1977_v27 = vmax.f32 %v4591_v55, %v3797_v51  ;;  %v5134_v55 = vadd.f32 %v4905_v18, %v4764_v37 }
 0x2c1   : > { %2296 = vmatpush.msrb.mxu3 %v3418_v14  ;;  %v5064_v62 = vpop.f32.mrf.mxu2  ;;  %v3575_v14 = vld [vmem:[%s6228_s5 + $0x7c8] sm:$0xff] }
 0x2c2   : > { %2266 = vmatmul.f32.vlgmr.msra.gmra.mxu3 %v2232_v31  ;;  %2729 = vmatpush.msrb.mxu2 %v3575_v14  ;;  %v5174_v14 = vadd.f32 %v4905_v18, %v4920_v6  ;;  %v3427_v6 = vld [vmem:[%s6228_s5 + $0x328] sm:$0xff] }
 0x2c3   : > { %2297 = vmatpush.msrb.mxu3 %v3417_v26  ;;  %v1972_v26 = vmax.f32 %v4588_v22, %v3798_v48 }
 0x2c5   : > { %2298 = vmatpush.msrb.mxu3 %v3416_v29  ;;  %v3527_v29 = vld [vmem:[%s6228_s5 + $0x648] sm:$0xff]  ;;  %v2022_v22 = vmax.f32 %v1972_v26, 0.0 }
 0x2c6   : > { %2600 = vmatpush.msrb.mxu0 %v3527_v29  ;;  %v3574_v29 = vld [vmem:[%s6228_s5 + $0x7c0] sm:$0xff] }
 0x2c7   : > { %2299 = vmatpush.msrb.mxu3 %v3415_v30  ;;  %v3435_v30 = vld [vmem:[%s6228_s5 + $0x368] sm:$0xff]  ;;  %2730 = vmatpush.msrb.mxu2 %v3574_v29  ;;  %v3442_v29 = vld [vmem:[%s6228_s5 + $0x3a0] sm:$0xff] }
 0x2c9   : > { %2300 = vmatpush.msrb.mxu3 %v3414_v5  ;;  %v5082_v36 = vpop.f32.mrf.mxu2 }
 0x2ca   : > { %v5165_v51 = vadd.f32 %v4905_v18, %v5082_v36 }
 0x2cb   : > { %2301 = vmatpush.msrb.mxu3 %v3413_v15  ;;  %v3434_v15 = vld [vmem:[%s6228_s5 + $0x360] sm:$0xff] }
 0x2cd   : > { %2302 = vmatpush.msrb.mxu3 %v3412_v20  ;;  %v3433_v20 = vld [vmem:[%s6228_s5 + $0x358] sm:$0xff] }
 0x2cf   : > { %2303 = vmatpush.msrb.mxu3 %v3411_v1  ;;  %v2027_v1 = vmax.f32 %v1977_v27, 0.0  ;;  %v3542_v27 = vld [vmem:[%s6228_s5 + $0x6c0] sm:$0xff] }
 0x2d0   : > { %2644 = vmatpush.msra.mxu1 %v3542_v27  ;;  %v3440_v27 = vld [vmem:[%s6228_s5 + $0x390] sm:$0xff] }
 0x2d1   : > { %2304 = vmatpush.msrb.mxu3 %v3410_v47  ;;  %v5096_v56 = vpop.f32.mrf.mxu2 }
 0x2d3   : > { %2305 = vmatpush.msrb.mxu3 %v3409_v21 }
 0x2d5   : > { %2306 = vmatpush.msrb.mxu3 %v3408_v43  ;;  %v5145_v43 = vadd.f32 %v4905_v18, %v4806_v2  ;;  %v3430_v2 = vld [vmem:[%s6228_s5 + $0x340] sm:$0xff] }
 0x2d7   : > { %2307 = vmatpush.msrb.mxu3 %v3407_v39 }
 0x2d8   : > { %v3786_v28 = vpop.permute.xlu2 %3785 }
 0x2d9   : > { %v3788_v35 = vunpack.i.h.bf16 %v3786_v28  ;;  %v3787_v41 = vunpack.i.l.bf16 %v3786_v28  ;;  %2308 = vmatpush.msrb.mxu3 %v3406_v40  ;;  %v1749_v39 = vpop.f32.mrf.mxu2  ;;  %v3819_v40 = vpack.i.bf16 %v2027_v1, %v5134_v55  ;;  %v5152_v28 = vpop.permute.xlu1 %3825 }
 0x2db   : > { %v1975_v32 = vmax.f32 %v4849_v46, %v3787_v41  ;;  %v2275_v7 = vsel %vm2062_vm3, %v2018_v45, %v3788_v35  ;;  %v5114_v46 = vadd.f32 %v4905_v18, %v4498_v4  ;;  %2336 = vmatpush.msra.mxu3 %v3437_v61  ;;  %v5161_v41 = vadd.f32 %v4905_v18, %v4998_v8  ;;  %v3429_v61 = vld [vmem:[%s6228_s5 + $0x338] sm:$0xff] }
 0x2dc   : > { %2309 = vmatmul.f32.vlgmr.msrb.gmra.mxu3 %v2275_v7  ;;  %v5178_v8 = vadd.f32 %v4905_v18, %v4966_v34 }
 0x2dd   : > { %v2025_v31 = vmax.f32 %v1975_v32, 0.0  ;;  %2337 = vmatpush.msra.mxu3 %v3436_v42 }
 0x2de   : > { %v3834_v34 = vpack.i.bf16 %v5178_v8, %v5174_v14 }
 0x2df   : > { %v3804_v4 = vpack.i.bf16 %v2025_v31, %v5114_v46  ;;  %2338 = vmatpush.msra.mxu3 %v3435_v30  ;;  %v3426_v30 = vld [vmem:[%s6228_s5 + $0x320] sm:$0xff] }
 0x2e0   : > { %v3801_v13 = vpop.permute.xlu2 %3800 }
 0x2e1   : > { %v3803_v19 = vunpack.i.h.bf16 %v3801_v13  ;;  %v3802_v5 = vunpack.i.l.bf16 %v3801_v13  ;;  %3805 = vrot.lane.b32.xlu0 %v3804_v4, %s3952_s23  ;;  %2339 = vmatpush.msra.mxu3 %v3434_v15  ;;  %v5185_v12 = vpop.f32.mrf.mxu2  ;;  %v5207_v4 = vadd.f32 %v4905_v18, %v4651_v17  ;;  %v5211_v13 = vadd.f32 %v4905_v18, %v5035_v60 }
 0x2e2   : > { %v5226_v17 = vadd.f32 %v4905_v18, %v4885_v33  ;;  %v5230_v60 = vadd.f32 %v4905_v18, %v4943_v63  ;;  %v3573_v63 = vld [vmem:[%s6228_s5 + $0x7b8] sm:$0xff] }
 0x2e3   : > { %v1979_v47 = vmax.f32 %v4889_v0, %v3802_v5  ;;  %v5138_v21 = vsel %vm2062_vm3, %v2022_v22, %v3803_v19  ;;  %2340 = vmatpush.msra.mxu3 %v3433_v20  ;;  %v3431_v0 = vld [vmem:[%s6228_s5 + $0x348] sm:$0xff]  ;;  %v5214_v22 = vadd.f32 %v4905_v18, %v1749_v39  ;;  %v3526_v19 = vld [vmem:[%s6228_s5 + $0x640] sm:$0xff]  ;;  %v5222_v5 = vadd.f32 %v4905_v18, %v4743_v3  ;;  %v3425_v20 = vld [vmem:[%s6228_s5 + $0x318] sm:$0xff] }
 0x2e4   : > { %2601 = vmatpush.msrb.mxu0 %v3526_v19  ;;  %v3424_v3 = vld [vmem:[%s6228_s5 + $0x310] sm:$0xff]  ;;  %v3423_v39 = vld [vmem:[%s6228_s5 + $0x308] sm:$0xff]  ;;  %2731 = vmatpush.msrb.mxu2 %v3573_v63 }
 0x2e5   : > { %v2029_v49 = vmax.f32 %v1979_v47, 0.0  ;;  %2341 = vmatpush.msra.mxu3 %v3432_v38  ;;  %v3869_v33 = vpack.i.bf16 %v5211_v13, %v5214_v22  ;;  %v3854_v1 = vpack.i.bf16 %v5222_v5, %v5207_v4  ;;  %v3884_v47 = vpack.i.bf16 %v5230_v60, %v5226_v17  ;;  %v3439_v19 = vld [vmem:[%s6228_s5 + $0x388] sm:$0xff] }
 0x2e7   : > { %v3829_v37 = vpack.i.bf16 %v2029_v49, %v5145_v43  ;;  %2342 = vmatpush.msra.mxu3 %v3431_v0  ;;  %v3541_v49 = vld [vmem:[%s6228_s5 + $0x6b8] sm:$0xff] }
 0x2e8   : > { %v3816_v45 = vpop.permute.xlu2 %3815  ;;  %2645 = vmatpush.msra.mxu1 %v3541_v49  ;;  %v3453_v0 = vld [vmem:[%s6228_s5 + $0x3f8] sm:$0xff] }
 0x2e9   : > { %v3818_v48 = vunpack.i.h.bf16 %v3816_v45  ;;  %v3817_v35 = vunpack.i.l.bf16 %v3816_v45  ;;  %3830 = vrot.lane.b32.xlu2 %v3829_v37, %s3952_s23  ;;  %3820 = vrot.lane.b32.xlu0 %v3819_v40, %s3952_s23  ;;  %v3525_v37 = vld [vmem:[%s6228_s5 + $0x638] sm:$0xff]  ;;  %v1755_v40 = vpop.f32.mrf.mxu2 }
 0x2ea   : > { %2343 = vmatpush.msra.mxu3 %v3430_v2  ;;  %2602 = vmatpush.msrb.mxu0 %v3525_v37  ;;  %v5275_v2 = vadd.f32 %v4905_v18, %v4984_v24  ;;  %v3450_v24 = vld [vmem:[%s6228_s5 + $0x3e0] sm:$0xff]  ;;  %v3469_v49 = vld [vmem:[%s6228_s5 + $0x478] sm:$0xff] }
 0x2eb   : > { %v1983_v32 = vmax.f32 %v4909_v9, %v3818_v48  ;;  %v1987_v7 = vmax.f32 %v4913_v59, %v3817_v35  ;;  %v3428_v9 = vld [vmem:[%s6228_s5 + $0x330] sm:$0xff]  ;;  %v3849_v59 = vpack.i.bf16 %v5161_v41, %v5165_v51  ;;  %v5268_v48 = vadd.f32 %v4905_v18, %v1755_v40 }
 0x2ec   : > { %2344 = vmatpush.msra.mxu3 %v3429_v61  ;;  %v3452_v35 = vld [vmem:[%s6228_s5 + $0x3f0] sm:$0xff] }
 0x2ed   : > { %v2033_v42 = vmax.f32 %v1983_v32, 0.0  ;;  %v2037_v36 = vmax.f32 %v1987_v7, 0.0  ;;  %v5279_v32 = vadd.f32 %v4905_v18, %v4690_v57  ;;  %v3451_v7 = vld [vmem:[%s6228_s5 + $0x3e8] sm:$0xff]  ;;  %v3449_v57 = vld [vmem:[%s6228_s5 + $0x3d8] sm:$0xff]  ;;  %v3468_v40 = vld [vmem:[%s6228_s5 + $0x470] sm:$0xff] }
 0x2ee   : > { %2345 = vmatpush.msra.mxu3 %v3428_v9  ;;  %v3447_v9 = vld [vmem:[%s6228_s5 + $0x3c8] sm:$0xff] }
 0x2ef   : > { %v3859_v26 = vpack.i.bf16 %v2033_v42, %v2037_v36  ;;  %v3874_v42 = vpack.i.bf16 %v5279_v32, %v5268_v48  ;;  %v3448_v36 = vld [vmem:[%s6228_s5 + $0x3d0] sm:$0xff] }
 0x2f0   : > { %v5192_v31 = vpop.permute.xlu1 %3840  ;;  %2346 = vmatpush.msra.mxu3 %v3427_v6  ;;  %v3444_v6 = vld [vmem:[%s6228_s5 + $0x3b0] sm:$0xff] }
 0x2f1   : > { %3860 = vrot.lane.b32.xlu1 %v3859_v26, %s3952_s23  ;;  %3850 = vrot.lane.b32.xlu2 %v3849_v59, %s3952_s23  ;;  %v3842_v15 = vunpack.i.l.bf16 %v5192_v31  ;;  %v3446_v59 = vld [vmem:[%s6228_s5 + $0x3c0] sm:$0xff]  ;;  %v3445_v26 = vld [vmem:[%s6228_s5 + $0x3b8] sm:$0xff] }
 0x2f2   : > { %3835 = vrot.lane.b32.xlu0 %v3834_v34, %s3952_s23  ;;  %2347 = vmatpush.msra.mxu3 %v3426_v30  ;;  %v3443_v34 = vld [vmem:[%s6228_s5 + $0x3a8] sm:$0xff]  ;;  %v3441_v30 = vld [vmem:[%s6228_s5 + $0x398] sm:$0xff] }
 0x2f3   : > { %v1993_v38 = vmax.f32 %v4856_v52, %v3842_v15  ;;  %v3422_v52 = vld [vmem:[%s6228_s5 + $0x300] sm:$0xff] }
 0x2f4   : > { %2348 = vmatpush.msra.mxu3 %v3425_v20  ;;  %v3438_v15 = vld [vmem:[%s6228_s5 + $0x380] sm:$0xff]  ;;  %v3572_v20 = vld [vmem:[%s6228_s5 + $0x7b0] sm:$0xff] }
 0x2f5   : > { %v2043_v45 = vmax.f32 %v1993_v38, 0.0  ;;  %2732 = vmatpush.msrb.mxu2 %v3572_v20  ;;  %v5399_v20 = vadd.f32 %v4905_v18, %v4783_v54  ;;  %v3458_v54 = vld [vmem:[%s6228_s5 + $0x420] sm:$0xff] }
 0x2f6   : > { %2349 = vmatpush.msra.mxu3 %v3424_v3  ;;  %v3540_v3 = vld [vmem:[%s6228_s5 + $0x6b0] sm:$0xff] }
 0x2f7   : > { %v3889_v61 = vpack.i.bf16 %v5275_v2, %v2043_v45  ;;  %2646 = vmatpush.msra.mxu1 %v3540_v3  ;;  %v3466_v45 = vld [vmem:[%s6228_s5 + $0x460] sm:$0xff] }
 0x2f8   : > { %2350 = vmatpush.msra.mxu3 %v3423_v39 }
 0x2f9   : > { %3885 = vrot.lane.b32.xlu1 %v3884_v47, %s3952_s23  ;;  %3855 = vrot.lane.b32.xlu2 %v3854_v1, %s3952_s23 }
 0x2fa   : > { %3870 = vrot.lane.b32.xlu0 %v3869_v33, %s3952_s23  ;;  %2351 = vmatpush.msra.mxu3 %v3422_v52  ;;  %v3524_v33 = vld [vmem:[%s6228_s5 + $0x630] sm:$0xff]  ;;  %v3467_v52 = vld [vmem:[%s6228_s5 + $0x468] sm:$0xff] }
 0x2fb   : > { %2603 = vmatpush.msrb.mxu0 %v3524_v33 }
 0x2fc   : > { %2379 = vmatpush.msrb.mxu3 %v3453_v0  ;;  %v3523_v0 = vld [vmem:[%s6228_s5 + $0x628] sm:$0xff] }
 0x2fd   : > { %2604 = vmatpush.msrb.mxu0 %v3523_v0  ;;  %v3827_v0 = vunpack.i.l.bf16 %v5152_v28 }
 0x2fe   : > { %2380 = vmatpush.msrb.mxu3 %v3452_v35  ;;  %v3522_v35 = vld [vmem:[%s6228_s5 + $0x620] sm:$0xff] }
 0x2ff   : > { %2605 = vmatpush.msrb.mxu0 %v3522_v35 }
 0x300   : > { %2381 = vmatpush.msrb.mxu3 %v3451_v7  ;;  %v3465_v7 = vld [vmem:[%s6228_s5 + $0x458] sm:$0xff] }
 0x301   : > { %3890 = vrot.lane.b32.xlu1 %v3889_v61, %s3952_s23 }
 0x302   : > { %3875 = vrot.lane.b32.xlu0 %v3874_v42, %s3952_s23  ;;  %2382 = vmatpush.msrb.mxu3 %v3450_v24  ;;  %v3571_v42 = vld [vmem:[%s6228_s5 + $0x7a8] sm:$0xff]  ;;  %v3521_v24 = vld [vmem:[%s6228_s5 + $0x618] sm:$0xff] }
 0x303   : > { %2733 = vmatpush.msrb.mxu2 %v3571_v42  ;;  %2606 = vmatpush.msrb.mxu0 %v3521_v24 }
 0x304   : > { %2383 = vmatpush.msrb.mxu3 %v3449_v57  ;;  %v3464_v57 = vld [vmem:[%s6228_s5 + $0x450] sm:$0xff] }
 0x306   : > { %2384 = vmatpush.msrb.mxu3 %v3448_v36  ;;  %v3520_v36 = vld [vmem:[%s6228_s5 + $0x610] sm:$0xff] }
 0x307   : > { %2607 = vmatpush.msrb.mxu0 %v3520_v36 }
 0x308   : > { %2385 = vmatpush.msrb.mxu3 %v3447_v9 }
 0x30a   : > { %2386 = vmatpush.msrb.mxu3 %v3446_v59 }
 0x30b   : > { %v5443_v24 = vpop.permute.xlu1 %3845 }
 0x30c   : > { %2387 = vmatpush.msrb.mxu3 %v3445_v26 }
 0x30e   : > { %2388 = vmatpush.msrb.mxu3 %v3444_v6 }
 0x310   : > { %2389 = vmatpush.msrb.mxu3 %v3443_v34  ;;  %v3519_v34 = vld [vmem:[%s6228_s5 + $0x608] sm:$0xff] }
 0x311   : > { %2608 = vmatpush.msrb.mxu0 %v3519_v34 }
 0x312   : > { %2390 = vmatpush.msrb.mxu3 %v3442_v29  ;;  %v3462_v29 = vld [vmem:[%s6228_s5 + $0x440] sm:$0xff] }
 0x314   : > { %2391 = vmatpush.msrb.mxu3 %v3441_v30 }
 0x316   : > { %2392 = vmatpush.msrb.mxu3 %v3440_v27  ;;  %v3518_v27 = vld [vmem:[%s6228_s5 + $0x600] sm:$0xff] }
 0x317   : > { %2609 = vmatpush.msrb.mxu0 %v3518_v27 }
 0x318   : > { %2393 = vmatpush.msrb.mxu3 %v3439_v19 }
 0x31a   : > { %2394 = vmatpush.msrb.mxu3 %v3438_v15  ;;  %v3461_v15 = vld [vmem:[%s6228_s5 + $0x438] sm:$0xff] }
 0x331   : > { %v3791_v63 = vpop.permute.xlu0 %3790 }
 0x332   : > { %v3792_v1 = vunpack.i.l.bf16 %v3791_v63  ;;  %v3793_v38 = vunpack.i.h.bf16 %v3791_v63  ;;  %v3459_v63 = vld [vmem:[%s6228_s5 + $0x428] sm:$0xff] }
 0x334   : > { %v1970_v47 = vmax.f32 %v5030_v16, %v3792_v1  ;;  %v3828_v16 = vunpack.i.h.bf16 %v5152_v28  ;;  %v3570_v28 = vld [vmem:[%s6228_s5 + $0x7a0] sm:$0xff] }
 0x335   : > { %2734 = vmatpush.msrb.mxu2 %v3570_v28 }
 0x336   : > { %v2020_v39 = vmax.f32 %v1970_v47, 0.0  ;;  %v1978_v61 = vmax.f32 %v4707_v11, %v3828_v16  ;;  %v3539_v11 = vld [vmem:[%s6228_s5 + $0x6a8] sm:$0xff]  ;;  %v3457_v47 = vld [vmem:[%s6228_s5 + $0x418] sm:$0xff] }
 0x337   : > { %2647 = vmatpush.msra.mxu1 %v3539_v11  ;;  %v3485_v16 = vld [vmem:[%s6228_s5 + $0x4f8] sm:$0xff]  ;;  %v1985_v11 = vmax.f32 %v4711_v58, %v3827_v0  ;;  %v5491_v0 = vadd.f32 %v4905_v18, %v5064_v62 }
 0x338   : > { %v2318_v37 = vsel %vm2062_vm3, %v2020_v39, %v3793_v38  ;;  %v2028_v59 = vmax.f32 %v1978_v61, 0.0  ;;  %v3456_v38 = vld [vmem:[%s6228_s5 + $0x410] sm:$0xff]  ;;  %v3481_v58 = vld [vmem:[%s6228_s5 + $0x4d8] sm:$0xff] }
 0x339   : > { %2352 = vmatmul.f32.vlgmr.msra.gmra.mxu3 %v2318_v37 }
 0x33a   : > { %2422 = vmatpush.msra.mxu3 %v3469_v49  ;;  %v3455_v49 = vld [vmem:[%s6228_s5 + $0x408] sm:$0xff] }
 0x33c   : > { %2423 = vmatpush.msra.mxu3 %v3468_v40  ;;  %v3454_v40 = vld [vmem:[%s6228_s5 + $0x400] sm:$0xff] }
 0x33e   : > { %2424 = vmatpush.msra.mxu3 %v3467_v52 }
 0x340   : > { %2425 = vmatpush.msra.mxu3 %v3466_v45 }
 0x341   : > { %2395 = vmatmul.f32.vlgmr.msrb.gmra.mxu3 %v5138_v21  ;;  %v3463_v21 = vld [vmem:[%s6228_s5 + $0x448] sm:$0xff] }
 0x342   : > { %2426 = vmatpush.msra.mxu3 %v3465_v7  ;;  %v3484_v7 = vld [vmem:[%s6228_s5 + $0x4f0] sm:$0xff] }
 0x343   : > { %v3831_v9 = vpop.permute.xlu2 %3830 }
 0x344   : > { %v3833_v26 = vunpack.i.h.bf16 %v3831_v9  ;;  %v3832_v6 = vunpack.i.l.bf16 %v3831_v9  ;;  %2427 = vmatpush.msra.mxu3 %v3464_v57 }
 0x346   : > { %v1991_v30 = vmax.f32 %v5145_v43, %v3832_v6  ;;  %2428 = vmatpush.msra.mxu3 %v3463_v21  ;;  %v5392_v19 = vsel %vm2062_vm3, %v2028_v59, %v3833_v26  ;;  %v3460_v43 = vld [vmem:[%s6228_s5 + $0x430] sm:$0xff]  ;;  %v3482_v21 = vld [vmem:[%s6228_s5 + $0x4e0] sm:$0xff]  ;;  %v2035_v6 = vmax.f32 %v1985_v11, 0.0 }
 0x347   : > { %v3538_v59 = vld [vmem:[%s6228_s5 + $0x6a0] sm:$0xff] }
 0x348   : > { %v2041_v3 = vmax.f32 %v1991_v30, 0.0  ;;  %2429 = vmatpush.msra.mxu3 %v3462_v29  ;;  %2648 = vmatpush.msra.mxu1 %v3538_v59  ;;  %v3480_v30 = vld [vmem:[%s6228_s5 + $0x4d0] sm:$0xff]  ;;  %v5513_v59 = vadd.f32 %v4905_v18, %v5017_v25  ;;  %v3471_v25 = vld [vmem:[%s6228_s5 + $0x488] sm:$0xff] }
 0x34a   : > { %2430 = vmatpush.msra.mxu3 %v3461_v15  ;;  %v3879_v33 = vpack.i.bf16 %v2041_v3, %v5399_v20  ;;  %v3479_v15 = vld [vmem:[%s6228_s5 + $0x4c8] sm:$0xff] }
 0x34b   : > { %v5412_v1 = vpop.permute.xlu2 %3850 }
 0x34c   : > { %2431 = vmatpush.msra.mxu3 %v3460_v43  ;;  %3880 = vrot.lane.b32.xlu0 %v3879_v33, %s3952_s23 }
 0x34e   : > { %2432 = vmatpush.msra.mxu3 %v3459_v63 }
 0x350   : > { %2433 = vmatpush.msra.mxu3 %v3458_v54 }
 0x352   : > { %2434 = vmatpush.msra.mxu3 %v3457_v47 }
 0x353   : > { %v3806_v39 = vpop.permute.xlu0 %3805  ;;  %v5434_v61 = vpop.permute.xlu2 %3855 }
 0x354   : > { %v3807_v37 = vunpack.i.l.bf16 %v3806_v39  ;;  %2435 = vmatpush.msra.mxu3 %v3456_v38  ;;  %v3808_v45 = vunpack.i.h.bf16 %v3806_v39  ;;  %v3857_v36 = vunpack.i.l.bf16 %v5434_v61  ;;  %v3477_v38 = vld [vmem:[%s6228_s5 + $0x4b8] sm:$0xff]  ;;  %v3853_v39 = vunpack.i.h.bf16 %v5412_v1 }
 0x356   : > { %v1974_v52 = vmax.f32 %v5114_v46, %v3807_v37  ;;  %2436 = vmatpush.msra.mxu3 %v3455_v49  ;;  %v3483_v46 = vld [vmem:[%s6228_s5 + $0x4e8] sm:$0xff]  ;;  %v1982_v34 = vmax.f32 %v5207_v4, %v3857_v36  ;;  %v3478_v4 = vld [vmem:[%s6228_s5 + $0x4c0] sm:$0xff]  ;;  %v3852_v49 = vunpack.i.l.bf16 %v5412_v1 }
 0x358   : > { %v2024_v35 = vmax.f32 %v1974_v52, 0.0  ;;  %2437 = vmatpush.msra.mxu3 %v3454_v40  ;;  %v2032_v3 = vmax.f32 %v1982_v34, 0.0  ;;  %v3476_v52 = vld [vmem:[%s6228_s5 + $0x4b0] sm:$0xff] }
 0x35a   : > { %2465 = vmatpush.msrb.mxu3 %v3485_v16  ;;  %v2404_v42 = vsel %vm2062_vm3, %v2024_v35, %v3808_v45  ;;  %v5487_v16 = vadd.f32 %v4905_v18, %v4825_v23  ;;  %v3475_v23 = vld [vmem:[%s6228_s5 + $0x4a8] sm:$0xff] }
 0x35b   : > { %v5445_v57 = vpop.permute.xlu0 %3820  ;;  %2438 = vmatmul.f32.vlgmr.msra.gmra.mxu3 %v2404_v42 }
 0x35c   : > { %2466 = vmatpush.msrb.mxu3 %v3484_v7  ;;  %v3822_v9 = vunpack.i.l.bf16 %v5445_v57 }
 0x35e   : > { %2467 = vmatpush.msrb.mxu3 %v3483_v46  ;;  %v1989_v26 = vmax.f32 %v5134_v55, %v3822_v9 }
 0x360   : > { %2468 = vmatpush.msrb.mxu3 %v3482_v21  ;;  %v2039_v29 = vmax.f32 %v1989_v26, 0.0  ;;  %v3473_v21 = vld [vmem:[%s6228_s5 + $0x498] sm:$0xff]  ;;  %v5517_v26 = vadd.f32 %v4905_v18, %v5096_v56 }
 0x362   : > { %2469 = vmatpush.msrb.mxu3 %v3481_v58  ;;  %v3864_v27 = vpack.i.bf16 %v2035_v6, %v2039_v29  ;;  %v3899_v56 = vpack.i.bf16 %v5513_v59, %v5517_v26  ;;  %v3823_v29 = vunpack.i.h.bf16 %v5445_v57  ;;  %v3537_v57 = vld [vmem:[%s6228_s5 + $0x698] sm:$0xff] }
 0x363   : > { %v5467_v55 = vpop.permute.xlu1 %3860  ;;  %2649 = vmatpush.msra.mxu1 %v3537_v57  ;;  %v3583_v57 = vld [vmem:[%s6228_s5 + $0x808] sm:$0xff] }
 0x364   : > { %2470 = vmatpush.msrb.mxu3 %v3480_v30  ;;  %v3863_v43 = vunpack.i.h.bf16 %v5467_v55  ;;  %v3836_v33 = vpop.permute.xlu0 %3835  ;;  %3865 = vrot.lane.b32.xlu2 %v3864_v27, %s3952_s23  ;;  %v3569_v27 = vld [vmem:[%s6228_s5 + $0x798] sm:$0xff] }
 0x365   : > { %v3838_v63 = vunpack.i.h.bf16 %v3836_v33  ;;  %v3837_v54 = vunpack.i.l.bf16 %v3836_v33  ;;  %v3501_v33 = vld [vmem:[%s6228_s5 + $0x578] sm:$0xff]  ;;  %2735 = vmatpush.msrb.mxu2 %v3569_v27  ;;  %v3584_v27 = vld [vmem:[%s6228_s5 + $0x810] sm:$0xff] }
 0x366   : > { %2471 = vmatpush.msrb.mxu3 %v3479_v15  ;;  %v2576_v47 = vsel %vm2062_vm3, %v2032_v3, %v3863_v43  ;;  %v3470_v15 = vld [vmem:[%s6228_s5 + $0x480] sm:$0xff] }
 0x367   : > { %v1997_v37 = vmax.f32 %v5178_v8, %v3838_v63  ;;  %v1995_v40 = vmax.f32 %v5174_v14, %v3837_v54  ;;  %2610 = vmatmul.f32.vlgmr.msrb.gmra.mxu0 %v2576_v47  ;;  %v1999_v8 = vmax.f32 %v5161_v41, %v3853_v39  ;;  %v2003_v14 = vmax.f32 %v5165_v51, %v3852_v49  ;;  %v3474_v41 = vld [vmem:[%s6228_s5 + $0x4a0] sm:$0xff]  ;;  %v3500_v54 = vld [vmem:[%s6228_s5 + $0x570] sm:$0xff]  ;;  %v3499_v47 = vld [vmem:[%s6228_s5 + $0x568] sm:$0xff] }
 0x368   : > { %2472 = vmatpush.msrb.mxu3 %v3478_v4  ;;  %v3813_v51 = vunpack.i.h.bf16 %v4940_v50  ;;  %v3597_v4 = vld [vmem:[%s6228_s5 + $0x878] sm:$0xff]  ;;  %v5563_v39 = vadd.f32 %v4905_v18, %v5185_v12  ;;  %v3595_v49 = vld [vmem:[%s6228_s5 + $0x868] sm:$0xff]  ;;  %v3594_v18 = vld [vmem:[%s6228_s5 + $0x860] sm:$0xff] }
 0x369   : > { %v2047_v45 = vmax.f32 %v1997_v37, 0.0  ;;  %v2045_v1 = vmax.f32 %v1995_v40, 0.0  ;;  %v2049_v28 = vmax.f32 %v1999_v8, 0.0  ;;  %v2053_v11 = vmax.f32 %v2003_v14, 0.0  ;;  %2766 = vmatpush.msra.mxu0 %v3597_v4  ;;  %v3498_v37 = vld [vmem:[%s6228_s5 + $0x560] sm:$0xff]  ;;  %v3497_v12 = vld [vmem:[%s6228_s5 + $0x558] sm:$0xff] }
 0x36a   : > { %2473 = vmatpush.msrb.mxu3 %v3477_v38  ;;  %v3593_v40 = vld [vmem:[%s6228_s5 + $0x858] sm:$0xff]  ;;  %v3591_v8 = vld [vmem:[%s6228_s5 + $0x848] sm:$0xff]  ;;  %v3494_v14 = vld [vmem:[%s6228_s5 + $0x540] sm:$0xff] }
 0x36b   : > { %v3904_v35 = vpack.i.bf16 %v5491_v0, %v2047_v45  ;;  %v3894_v7 = vpack.i.bf16 %v2045_v1, %v5487_v16  ;;  %v3909_v34 = vpack.i.bf16 %v2049_v28, %v2053_v11  ;;  %v3592_v45 = vld [vmem:[%s6228_s5 + $0x850] sm:$0xff]  ;;  %v3495_v1 = vld [vmem:[%s6228_s5 + $0x548] sm:$0xff]  ;;  %v3642_v4 = vld [vmem:[%s6228_s5 + $0x9e0] sm:$0xff] }
 0x36c   : > { %2474 = vmatpush.msrb.mxu3 %v3476_v52  ;;  %v3871_v42 = vpop.permute.xlu0 %3870  ;;  %v3496_v52 = vld [vmem:[%s6228_s5 + $0x550] sm:$0xff]  ;;  %v3535_v28 = vld [vmem:[%s6228_s5 + $0x688] sm:$0xff] }
 0x36d   : > { %v3873_v46 = vunpack.i.h.bf16 %v3871_v42  ;;  %v3872_v62 = vunpack.i.l.bf16 %v3871_v42  ;;  %3905 = vrot.lane.b32.xlu0 %v3904_v35, %s3952_s23  ;;  %3895 = vrot.lane.b32.xlu2 %v3894_v7, %s3952_s23  ;;  %v3590_v35 = vld [vmem:[%s6228_s5 + $0x840] sm:$0xff]  ;;  %v3493_v7 = vld [vmem:[%s6228_s5 + $0x538] sm:$0xff] }
 0x36e   : > { %2475 = vmatpush.msrb.mxu3 %v3475_v23  ;;  %v3589_v23 = vld [vmem:[%s6228_s5 + $0x838] sm:$0xff]  ;;  %v3492_v42 = vld [vmem:[%s6228_s5 + $0x530] sm:$0xff]  ;;  %v3567_v11 = vld [vmem:[%s6228_s5 + $0x788] sm:$0xff] }
 0x36f   : > { %v2001_v36 = vmax.f32 %v5211_v13, %v3873_v46  ;;  %v2005_v9 = vmax.f32 %v5214_v22, %v3872_v62  ;;  %v3472_v13 = vld [vmem:[%s6228_s5 + $0x490] sm:$0xff]  ;;  %v1976_v22 = vmax.f32 %v4622_v53, %v3813_v51  ;;  %v3491_v51 = vld [vmem:[%s6228_s5 + $0x528] sm:$0xff] }
 0x370   : > { %2476 = vmatpush.msrb.mxu3 %v3474_v41  ;;  %v3536_v46 = vld [vmem:[%s6228_s5 + $0x690] sm:$0xff] }
 0x371   : > { %v2051_v50 = vmax.f32 %v2001_v36, 0.0  ;;  %v2055_v58 = vmax.f32 %v2005_v9, 0.0  ;;  %v2026_v3 = vmax.f32 %v1976_v22, 0.0  ;;  %v3568_v62 = vld [vmem:[%s6228_s5 + $0x790] sm:$0xff]  ;;  %2650 = vmatpush.msra.mxu1 %v3536_v46  ;;  %v3587_v36 = vld [vmem:[%s6228_s5 + $0x828] sm:$0xff]  ;;  %v3490_v9 = vld [vmem:[%s6228_s5 + $0x520] sm:$0xff] }
 0x372   : > { %2477 = vmatpush.msrb.mxu3 %v3473_v21  ;;  %v3588_v41 = vld [vmem:[%s6228_s5 + $0x830] sm:$0xff]  ;;  %2736 = vmatpush.msrb.mxu2 %v3568_v62  ;;  %v3534_v21 = vld [vmem:[%s6228_s5 + $0x680] sm:$0xff]  ;;  %v3613_v22 = vld [vmem:[%s6228_s5 + $0x8f8] sm:$0xff] }
 0x373   : > { %v3914_v6 = vpack.i.bf16 %v2051_v50, %v2055_v58  ;;  %v2447_v63 = vsel %vm2062_vm3, %v2026_v3, %v3823_v29  ;;  %2651 = vmatpush.msra.mxu1 %v3535_v28  ;;  %v3566_v50 = vld [vmem:[%s6228_s5 + $0x780] sm:$0xff]  ;;  %v3644_v29 = vld [vmem:[%s6228_s5 + $0x9f0] sm:$0xff]  ;;  %v3643_v3 = vld [vmem:[%s6228_s5 + $0x9e8] sm:$0xff] }
 0x374   : > { %2478 = vmatpush.msrb.mxu3 %v3472_v13  ;;  %v5529_v30 = vpop.permute.xlu0 %3875  ;;  %2737 = vmatpush.msrb.mxu2 %v3567_v11  ;;  %v3586_v58 = vld [vmem:[%s6228_s5 + $0x820] sm:$0xff]  ;;  %v3489_v13 = vld [vmem:[%s6228_s5 + $0x518] sm:$0xff]  ;;  %v3512_v62 = vld [vmem:[%s6228_s5 + $0x5d0] sm:$0xff] }
 0x375   : > { %v3877_v53 = vunpack.i.l.bf16 %v5529_v30  ;;  %3915 = vrot.lane.b32.xlu1 %v3914_v6, %s3952_s23  ;;  %3910 = vrot.lane.b32.xlu0 %v3909_v34, %s3952_s23  ;;  %v3645_v6 = vld [vmem:[%s6228_s5 + $0x9f8] sm:$0xff]  ;;  %v3656_v28 = vld [vmem:[%s6228_s5 + $0xa50] sm:$0xff] }
 0x376   : > { %3900 = vrot.lane.b32.xlu2 %v3899_v56, %s3952_s23  ;;  %2479 = vmatpush.msrb.mxu3 %v3471_v25  ;;  %v3585_v34 = vld [vmem:[%s6228_s5 + $0x818] sm:$0xff]  ;;  %v3488_v25 = vld [vmem:[%s6228_s5 + $0x510] sm:$0xff]  ;;  %v3511_v11 = vld [vmem:[%s6228_s5 + $0x5c8] sm:$0xff] }
 0x377   : > { %v2007_v43 = vmax.f32 %v5268_v48, %v3877_v53  ;;  %v3596_v48 = vld [vmem:[%s6228_s5 + $0x870] sm:$0xff]  ;;  %2652 = vmatpush.msra.mxu1 %v3534_v21  ;;  %2738 = vmatpush.msrb.mxu2 %v3566_v50  ;;  %v3487_v53 = vld [vmem:[%s6228_s5 + $0x508] sm:$0xff]  ;;  %v3657_v46 = vld [vmem:[%s6228_s5 + $0xa58] sm:$0xff] }
 0x378   : > { %2480 = vmatpush.msrb.mxu3 %v3470_v15  ;;  %2767 = vmatpush.msra.mxu0 %v3596_v48  ;;  %v3612_v56 = vld [vmem:[%s6228_s5 + $0x8f0] sm:$0xff]  ;;  %v3611_v15 = vld [vmem:[%s6228_s5 + $0x8e8] sm:$0xff]  ;;  %v3609_v48 = vld [vmem:[%s6228_s5 + $0x8d8] sm:$0xff] }
 0x379   : > { %2481 = vmatmul.f32.vlgmr.msrb.gmra.mxu3 %v2447_v63  ;;  %v2057_v38 = vmax.f32 %v2007_v43, 0.0  ;;  %2809 = vmatpush.msrb.mxu1 %v3613_v22  ;;  %v3486_v43 = vld [vmem:[%s6228_s5 + $0x500] sm:$0xff]  ;;  %v3655_v21 = vld [vmem:[%s6228_s5 + $0xa48] sm:$0xff] }
 0x37a   : > { %2508 = vmatpush.msra.mxu3 %v3501_v33  ;;  %2768 = vmatpush.msra.mxu0 %v3595_v49  ;;  %v3610_v33 = vld [vmem:[%s6228_s5 + $0x8e0] sm:$0xff]  ;;  %v3516_v49 = vld [vmem:[%s6228_s5 + $0x5f0] sm:$0xff] }
 0x37b   : > { %2895 = vmatpush.msra.mxu2 %v3645_v6  ;;  %2810 = vmatpush.msrb.mxu1 %v3612_v56  ;;  %v3582_v63 = vld [vmem:[%s6228_s5 + $0x800] sm:$0xff]  ;;  %v3509_v6 = vld [vmem:[%s6228_s5 + $0x5b8] sm:$0xff] }
 0x37c   : > { %2509 = vmatpush.msra.mxu3 %v3500_v54  ;;  %2769 = vmatpush.msra.mxu0 %v3594_v18  ;;  %v3517_v54 = vld [vmem:[%s6228_s5 + $0x5f8] sm:$0xff]  ;;  %v3640_v18 = vld [vmem:[%s6228_s5 + $0x9d0] sm:$0xff]  ;;  %v3510_v50 = vld [vmem:[%s6228_s5 + $0x5c0] sm:$0xff] }
 0x37d   : > { %3089 = vrot.lane.b32.xlu0 %v2057_v38, %s3952_s23  ;;  %2896 = vmatpush.msra.mxu2 %v3644_v29  ;;  %v3661_v38 = vld [vmem:[%s6228_s5 + $0xa78] sm:$0xff]  ;;  %v3654_v22 = vld [vmem:[%s6228_s5 + $0xa40] sm:$0xff]  ;;  %v3508_v29 = vld [vmem:[%s6228_s5 + $0x5b0] sm:$0xff] }
 0x37e   : > { %2510 = vmatpush.msra.mxu3 %v3499_v47  ;;  %1904 = vrot.lane.b32.xlu2 %v5563_v39, %s3952_s23  ;;  %v3641_v47 = vld [vmem:[%s6228_s5 + $0x9d8] sm:$0xff] }
 0x37f   : > { %2770 = vmatpush.msra.mxu0 %v3593_v40  ;;  %2811 = vmatpush.msrb.mxu1 %v3611_v15  ;;  %v3607_v40 = vld [vmem:[%s6228_s5 + $0x8c8] sm:$0xff]  ;;  %v3653_v56 = vld [vmem:[%s6228_s5 + $0xa38] sm:$0xff]  ;;  %v3652_v15 = vld [vmem:[%s6228_s5 + $0xa30] sm:$0xff] }
 0x380   : > { %2511 = vmatpush.msra.mxu3 %v3498_v37  ;;  %2897 = vmatpush.msra.mxu2 %v3643_v3  ;;  %v3608_v37 = vld [vmem:[%s6228_s5 + $0x8d0] sm:$0xff]  ;;  %v3507_v3 = vld [vmem:[%s6228_s5 + $0x5a8] sm:$0xff] }
 0x381   : > { %2771 = vmatpush.msra.mxu0 %v3592_v45  ;;  %2812 = vmatpush.msrb.mxu1 %v3610_v33  ;;  %v3659_v45 = vld [vmem:[%s6228_s5 + $0xa68] sm:$0xff] }
 0x382   : > { %2512 = vmatpush.msra.mxu3 %v3497_v12  ;;  %2898 = vmatpush.msra.mxu2 %v3642_v4  ;;  %v3660_v12 = vld [vmem:[%s6228_s5 + $0xa70] sm:$0xff]  ;;  %v3651_v33 = vld [vmem:[%s6228_s5 + $0xa28] sm:$0xff]  ;;  %v3506_v4 = vld [vmem:[%s6228_s5 + $0x5a0] sm:$0xff] }
 0x383   : > { %2772 = vmatpush.msra.mxu0 %v3591_v8  ;;  %2813 = vmatpush.msrb.mxu1 %v3609_v48  ;;  %v3606_v8 = vld [vmem:[%s6228_s5 + $0x8c0] sm:$0xff] }
 0x384   : > { %2513 = vmatpush.msra.mxu3 %v3496_v52  ;;  %2899 = vmatpush.msra.mxu2 %v3641_v47  ;;  %v3639_v52 = vld [vmem:[%s6228_s5 + $0x9c8] sm:$0xff]  ;;  %v3630_v48 = vld [vmem:[%s6228_s5 + $0x980] sm:$0xff] }
 0x385   : > { %2773 = vmatpush.msra.mxu0 %v3590_v35  ;;  %2814 = vmatpush.msrb.mxu1 %v3608_v37  ;;  %v3658_v35 = vld [vmem:[%s6228_s5 + $0xa60] sm:$0xff] }
 0x386   : > { %2514 = vmatpush.msra.mxu3 %v3495_v1  ;;  %2900 = vmatpush.msra.mxu2 %v3640_v18  ;;  %v3514_v1 = vld [vmem:[%s6228_s5 + $0x5e0] sm:$0xff]  ;;  %v3648_v18 = vld [vmem:[%s6228_s5 + $0xa10] sm:$0xff] }
 0x387   : > { %2774 = vmatpush.msra.mxu0 %v3589_v23  ;;  %2815 = vmatpush.msrb.mxu1 %v3607_v40  ;;  %v3605_v23 = vld [vmem:[%s6228_s5 + $0x8b8] sm:$0xff]  ;;  %v3650_v47 = vld [vmem:[%s6228_s5 + $0xa20] sm:$0xff]  ;;  %v3647_v40 = vld [vmem:[%s6228_s5 + $0xa08] sm:$0xff] }
 0x388   : > { %2515 = vmatpush.msra.mxu3 %v3494_v14  ;;  %2901 = vmatpush.msra.mxu2 %v3639_v52  ;;  %v3638_v14 = vld [vmem:[%s6228_s5 + $0x9c0] sm:$0xff] }
 0x389   : > { %2775 = vmatpush.msra.mxu0 %v3588_v41  ;;  %2816 = vmatpush.msrb.mxu1 %v3606_v8  ;;  %v3604_v41 = vld [vmem:[%s6228_s5 + $0x8b0] sm:$0xff]  ;;  %v3878_v8 = vunpack.i.h.bf16 %v5529_v30  ;;  %v3563_v30 = vld [vmem:[%s6228_s5 + $0x768] sm:$0xff] }
 0x38a   : > { %2516 = vmatpush.msra.mxu3 %v3493_v7  ;;  %v3513_v7 = vld [vmem:[%s6228_s5 + $0x5d8] sm:$0xff]  ;;  %2902 = vmatpush.msra.mxu2 %v3638_v14 }
 0x38b   : > { %2776 = vmatpush.msra.mxu0 %v3587_v36  ;;  %2817 = vmatpush.msrb.mxu1 %v3605_v23  ;;  %v3603_v36 = vld [vmem:[%s6228_s5 + $0x8a8] sm:$0xff]  ;;  %v3565_v14 = vld [vmem:[%s6228_s5 + $0x778] sm:$0xff]  ;;  %v1984_v23 = vmax.f32 %v5279_v32, %v3878_v8 }
 0x38c   : > { %2517 = vmatpush.msra.mxu3 %v3492_v42  ;;  %v3637_v42 = vld [vmem:[%s6228_s5 + $0x9b8] sm:$0xff] }
 0x38d   : > { %2777 = vmatpush.msra.mxu0 %v3586_v58  ;;  %2903 = vmatpush.msra.mxu2 %v3637_v42  ;;  %v3602_v58 = vld [vmem:[%s6228_s5 + $0x8a0] sm:$0xff] }
 0x38e   : > { %2518 = vmatpush.msra.mxu3 %v3491_v51  ;;  %v3636_v51 = vld [vmem:[%s6228_s5 + $0x9b0] sm:$0xff]  ;;  %2818 = vmatpush.msrb.mxu1 %v3604_v41  ;;  %v3562_v42 = vld [vmem:[%s6228_s5 + $0x760] sm:$0xff] }
 0x38f   : > { %2778 = vmatpush.msra.mxu0 %v3585_v34  ;;  %2904 = vmatpush.msra.mxu2 %v3636_v51  ;;  %v3601_v34 = vld [vmem:[%s6228_s5 + $0x898] sm:$0xff]  ;;  %v5880_v51 = vpop.permute.xlu1 %3885 }
 0x390   : > { %2519 = vmatpush.msra.mxu3 %v3490_v9  ;;  %v3635_v9 = vld [vmem:[%s6228_s5 + $0x9a8] sm:$0xff]  ;;  %2819 = vmatpush.msrb.mxu1 %v3603_v36 }
 0x391   : > { %2779 = vmatpush.msra.mxu0 %v3584_v27  ;;  %2905 = vmatpush.msra.mxu2 %v3635_v9  ;;  %v3600_v27 = vld [vmem:[%s6228_s5 + $0x890] sm:$0xff]  ;;  %v3677_v9 = vld [vmem:[%s6228_s5 + $0xaf8] sm:$0xff] }
 0x392   : > { %2520 = vmatpush.msra.mxu3 %v3489_v13  ;;  %v3634_v13 = vld [vmem:[%s6228_s5 + $0x9a0] sm:$0xff]  ;;  %2820 = vmatpush.msrb.mxu1 %v3602_v58 }
 0x393   : > { %2780 = vmatpush.msra.mxu0 %v3583_v57  ;;  %2906 = vmatpush.msra.mxu2 %v3634_v13  ;;  %v3599_v57 = vld [vmem:[%s6228_s5 + $0x888] sm:$0xff] }
 0x394   : > { %2521 = vmatpush.msra.mxu3 %v3488_v25  ;;  %v3633_v25 = vld [vmem:[%s6228_s5 + $0x998] sm:$0xff]  ;;  %2821 = vmatpush.msrb.mxu1 %v3601_v34 }
 0x395   : > { %2781 = vmatpush.msra.mxu0 %v3582_v63  ;;  %2907 = vmatpush.msra.mxu2 %v3633_v25  ;;  %v3843_v63 = vunpack.i.h.bf16 %v5192_v31  ;;  %v3649_v31 = vld [vmem:[%s6228_s5 + $0xa18] sm:$0xff]  ;;  %v3559_v25 = vld [vmem:[%s6228_s5 + $0x748] sm:$0xff] }
 0x396   : > { %2522 = vmatpush.msra.mxu3 %v3487_v53  ;;  %v3632_v53 = vld [vmem:[%s6228_s5 + $0x990] sm:$0xff]  ;;  %2822 = vmatpush.msrb.mxu1 %v3600_v27  ;;  %v3558_v27 = vld [vmem:[%s6228_s5 + $0x740] sm:$0xff] }
 0x397   : > { %2938 = vmatpush.msrb.mxu0 %v3661_v38  ;;  %2908 = vmatpush.msra.mxu2 %v3632_v53  ;;  %v3505_v38 = vld [vmem:[%s6228_s5 + $0x598] sm:$0xff]  ;;  %v1980_v37 = vmax.f32 %v4853_v10, %v3843_v63  ;;  %v3502_v10 = vld [vmem:[%s6228_s5 + $0x580] sm:$0xff] }
 0x398   : > { %2523 = vmatpush.msra.mxu3 %v3486_v43  ;;  %v3631_v43 = vld [vmem:[%s6228_s5 + $0x988] sm:$0xff]  ;;  %2823 = vmatpush.msrb.mxu1 %v3599_v57  ;;  %v3674_v57 = vld [vmem:[%s6228_s5 + $0xae0] sm:$0xff] }
 0x399   : > { %2524 = vmatmul.f32.vlgmr.msra.gmra.mxu3 %v5392_v19  ;;  %v3515_v19 = vld [vmem:[%s6228_s5 + $0x5e8] sm:$0xff]  ;;  %2939 = vmatpush.msrb.mxu0 %v3660_v12  ;;  %v2030_v52 = vmax.f32 %v1980_v37, 0.0  ;;  %v3705_v37 = vld [vmem:[%s6228_s5 + $0xbd8] sm:$0xff] }
 0x39a   : > { %2551 = vmatpush.msrb.mxu3 %v3517_v54  ;;  %2909 = vmatpush.msra.mxu2 %v3631_v43  ;;  %v3598_v54 = vld [vmem:[%s6228_s5 + $0x880] sm:$0xff]  ;;  %v3503_v12 = vld [vmem:[%s6228_s5 + $0x588] sm:$0xff]  ;;  %v3557_v43 = vld [vmem:[%s6228_s5 + $0x738] sm:$0xff] }
 0x39b   : > { %2940 = vmatpush.msrb.mxu0 %v3659_v45  ;;  %2824 = vmatpush.msrb.mxu1 %v3598_v54  ;;  %v3858_v45 = vunpack.i.h.bf16 %v5434_v61  ;;  %v3564_v61 = vld [vmem:[%s6228_s5 + $0x770] sm:$0xff]  ;;  %v3706_v54 = vld [vmem:[%s6228_s5 + $0xbe0] sm:$0xff] }
 0x39c   : > { %2552 = vmatpush.msrb.mxu3 %v3516_v49  ;;  %2910 = vmatpush.msra.mxu2 %v3630_v48  ;;  %v3504_v49 = vld [vmem:[%s6228_s5 + $0x590] sm:$0xff]  ;;  %v3673_v48 = vld [vmem:[%s6228_s5 + $0xad8] sm:$0xff] }
 0x39d   : > { %2941 = vmatpush.msrb.mxu0 %v3658_v35 }
 0x39e   : > { %2553 = vmatpush.msrb.mxu3 %v3515_v19  ;;  %v3847_v19 = vunpack.i.l.bf16 %v5443_v24 }
 0x39f   : > { %2942 = vmatpush.msrb.mxu0 %v3657_v46 }
 0x3a0   : > { %2554 = vmatpush.msrb.mxu3 %v3514_v1  ;;  %v3646_v1 = vld [vmem:[%s6228_s5 + $0xa00] sm:$0xff]  ;;  %v2533_v35 = vsel %vm2062_vm3, %v2030_v52, %v3847_v19 }
 0x3a1   : > { %2943 = vmatpush.msrb.mxu0 %v3656_v28  ;;  %v2034_v28 = vmax.f32 %v1984_v23, 0.0  ;;  %v3722_v19 = vld [vmem:[%s6228_s5 + $0xc60] sm:$0xff]  ;;  %v3720_v23 = vld [vmem:[%s6228_s5 + $0xc50] sm:$0xff] }
 0x3a2   : > { %2555 = vmatpush.msrb.mxu3 %v3513_v7  ;;  %v1988_v7 = vmax.f32 %v5222_v5, %v3858_v45  ;;  %v3561_v5 = vld [vmem:[%s6228_s5 + $0x758] sm:$0xff]  ;;  %v3554_v52 = vld [vmem:[%s6228_s5 + $0x720] sm:$0xff]  ;;  %v3671_v45 = vld [vmem:[%s6228_s5 + $0xac8] sm:$0xff] }
 0x3a3   : > { %2944 = vmatpush.msrb.mxu0 %v3655_v21 }
 0x3a4   : > { %2556 = vmatpush.msrb.mxu3 %v3512_v62  ;;  %v2038_v46 = vmax.f32 %v1988_v7, 0.0  ;;  %v3702_v7 = vld [vmem:[%s6228_s5 + $0xbc0] sm:$0xff] }
 0x3a5   : > { %2945 = vmatpush.msrb.mxu0 %v3654_v22  ;;  %v3709_v22 = vld [vmem:[%s6228_s5 + $0xbf8] sm:$0xff] }
 0x3a6   : > { %2557 = vmatpush.msrb.mxu3 %v3511_v11 }
 0x3a7   : > { %2946 = vmatpush.msrb.mxu0 %v3653_v56  ;;  %v3708_v56 = vld [vmem:[%s6228_s5 + $0xbf0] sm:$0xff] }
 0x3a8   : > { %2558 = vmatpush.msrb.mxu3 %v3510_v50  ;;  %v3560_v50 = vld [vmem:[%s6228_s5 + $0x750] sm:$0xff] }
 0x3a9   : > { %2947 = vmatpush.msrb.mxu0 %v3652_v15  ;;  %v3725_v15 = vld [vmem:[%s6228_s5 + $0xc78] sm:$0xff] }
 0x3aa   : > { %2559 = vmatpush.msrb.mxu3 %v3509_v6  ;;  %v3676_v6 = vld [vmem:[%s6228_s5 + $0xaf0] sm:$0xff] }
 0x3ab   : > { %2948 = vmatpush.msrb.mxu0 %v3651_v33 }
 0x3ac   : > { %2560 = vmatpush.msrb.mxu3 %v3508_v29  ;;  %v3675_v29 = vld [vmem:[%s6228_s5 + $0xae8] sm:$0xff] }
 0x3ad   : > { %2949 = vmatpush.msrb.mxu0 %v3650_v47  ;;  %v5937_v47 = vpop.permute.xlu1 %3890 }
 0x3ae   : > { %2561 = vmatpush.msrb.mxu3 %v3507_v3  ;;  %v3707_v3 = vld [vmem:[%s6228_s5 + $0xbe8] sm:$0xff] }
 0x3af   : > { %2950 = vmatpush.msrb.mxu0 %v3649_v31  ;;  %v3723_v31 = vld [vmem:[%s6228_s5 + $0xc68] sm:$0xff] }
 0x3b0   : > { %2562 = vmatpush.msrb.mxu3 %v3506_v4  ;;  %v3724_v4 = vld [vmem:[%s6228_s5 + $0xc70] sm:$0xff] }
 0x3b1   : > { %2951 = vmatpush.msrb.mxu0 %v3648_v18  ;;  %v3672_v18 = vld [vmem:[%s6228_s5 + $0xad0] sm:$0xff] }
 0x3b2   : > { %2563 = vmatpush.msrb.mxu3 %v3505_v38  ;;  %v3556_v38 = vld [vmem:[%s6228_s5 + $0x730] sm:$0xff] }
 0x3b3   : > { %2952 = vmatpush.msrb.mxu0 %v3647_v40 }
 0x3b4   : > { %2564 = vmatpush.msrb.mxu3 %v3504_v49 }
 0x3b5   : > { %2953 = vmatpush.msrb.mxu0 %v3646_v1  ;;  %v3848_v1 = vunpack.i.h.bf16 %v5443_v24  ;;  %v3670_v24 = vld [vmem:[%s6228_s5 + $0xac0] sm:$0xff] }
 0x3b6   : > { %2565 = vmatpush.msrb.mxu3 %v3503_v12  ;;  %v3555_v12 = vld [vmem:[%s6228_s5 + $0x728] sm:$0xff] }
 0x3b8   : > { %2566 = vmatpush.msrb.mxu3 %v3502_v10  ;;  %v3704_v10 = vld [vmem:[%s6228_s5 + $0xbd0] sm:$0xff] }
 0x3b9   : > { %2567 = vmatmul.f32.vlgmr.msrb.gmra.mxu3 %v2533_v35  ;;  %v3721_v35 = vld [vmem:[%s6228_s5 + $0xc58] sm:$0xff] }
 0x3ba   : > { %2680 = vmatpush.msra.mxu3 %v3565_v14  ;;  %v3703_v14 = vld [vmem:[%s6228_s5 + $0xbc8] sm:$0xff] }
 0x3bc   : > { %2681 = vmatpush.msra.mxu3 %v3564_v61  ;;  %v3553_v61 = vld [vmem:[%s6228_s5 + $0x718] sm:$0xff] }
 0x3be   : > { %2682 = vmatpush.msra.mxu3 %v3563_v30  ;;  %v3881_v62 = vpop.permute.xlu0 %3880  ;;  %v3866_v41 = vpop.permute.xlu2 %3865  ;;  %v3552_v30 = vld [vmem:[%s6228_s5 + $0x710] sm:$0xff] }
 0x3bf   : > { %v3882_v32 = vunpack.i.l.bf16 %v3881_v62  ;;  %v3868_v11 = vunpack.i.h.bf16 %v3866_v41  ;;  %v3867_v36 = vunpack.i.l.bf16 %v3866_v41  ;;  %v3883_v34 = vunpack.i.h.bf16 %v3881_v62  ;;  %v3701_v62 = vld [vmem:[%s6228_s5 + $0xbb8] sm:$0xff]  ;;  %v3719_v41 = vld [vmem:[%s6228_s5 + $0xc48] sm:$0xff] }
 0x3c0   : > { %2683 = vmatpush.msra.mxu3 %v3562_v42  ;;  %v3669_v42 = vld [vmem:[%s6228_s5 + $0xab8] sm:$0xff] }
 0x3c1   : > { %v1990_v21 = vmax.f32 %v5399_v20, %v3882_v32  ;;  %v2619_v58 = vsel %vm2062_vm3, %v2034_v28, %v3868_v11  ;;  %v2705_v13 = vsel %vm2062_vm3, %v2038_v46, %v3867_v36  ;;  %v1986_v46 = vmax.f32 %v4954_v44, %v3848_v1  ;;  %v3551_v28 = vld [vmem:[%s6228_s5 + $0x708] sm:$0xff]  ;;  %v3700_v32 = vld [vmem:[%s6228_s5 + $0xbb0] sm:$0xff]  ;;  %v3718_v11 = vld [vmem:[%s6228_s5 + $0xc40] sm:$0xff] }
 0x3c2   : > { %2684 = vmatpush.msra.mxu3 %v3561_v5  ;;  %2653 = vmatmul.f32.vlgmr.msra.gmra.mxu1 %v2619_v58  ;;  %v3668_v5 = vld [vmem:[%s6228_s5 + $0xab0] sm:$0xff]  ;;  %v3862_v44 = vunpack.i.l.bf16 %v5467_v55  ;;  %v3550_v36 = vld [vmem:[%s6228_s5 + $0x700] sm:$0xff] }
 0x3c3   : > { %v2040_v20 = vmax.f32 %v1990_v21, 0.0  ;;  %2739 = vmatmul.f32.vlgmr.msrb.gmra.mxu2 %v2705_v13  ;;  %2981 = vmatpush.msra.mxu1 %v3677_v9  ;;  %v3667_v9 = vld [vmem:[%s6228_s5 + $0xaa8] sm:$0xff]  ;;  %v2036_v55 = vmax.f32 %v1986_v46, 0.0  ;;  %v3666_v58 = vld [vmem:[%s6228_s5 + $0xaa0] sm:$0xff]  ;;  %v3888_v13 = vunpack.i.h.bf16 %v5880_v51 }
 0x3c4   : > { %2685 = vmatpush.msra.mxu3 %v3560_v50  ;;  %3067 = vmatpush.msrb.mxu2 %v3709_v22  ;;  %v3699_v21 = vld [vmem:[%s6228_s5 + $0xba8] sm:$0xff]  ;;  %v3629_v50 = vld [vmem:[%s6228_s5 + $0x978] sm:$0xff] }
 0x3c5   : > { %v2748_v53 = vsel %vm2062_vm3, %v2040_v20, %v3883_v34  ;;  %2982 = vmatpush.msra.mxu1 %v3676_v6  ;;  %v2662_v22 = vsel %vm2062_vm3, %v2036_v55, %v3862_v44  ;;  %v3698_v6 = vld [vmem:[%s6228_s5 + $0xba0] sm:$0xff]  ;;  %v3717_v34 = vld [vmem:[%s6228_s5 + $0xc38] sm:$0xff]  ;;  %v3628_v20 = vld [vmem:[%s6228_s5 + $0x970] sm:$0xff]  ;;  %v3887_v55 = vunpack.i.l.bf16 %v5880_v51 }
 0x3c6   : > { %2686 = vmatpush.msra.mxu3 %v3559_v25  ;;  %2782 = vmatmul.f32.vlgmr.msra.gmra.mxu0 %v2748_v53  ;;  %v3665_v25 = vld [vmem:[%s6228_s5 + $0xa98] sm:$0xff]  ;;  %v3664_v53 = vld [vmem:[%s6228_s5 + $0xa90] sm:$0xff]  ;;  %v3615_v51 = vld [vmem:[%s6228_s5 + $0x908] sm:$0xff] }
 0x3c7   : > { %v5925_v33 = vpop.permute.xlu2 %3895  ;;  %3068 = vmatpush.msrb.mxu2 %v3708_v56  ;;  %2983 = vmatpush.msra.mxu1 %v3675_v29  ;;  %v3697_v56 = vld [vmem:[%s6228_s5 + $0xb98] sm:$0xff]  ;;  %v3716_v29 = vld [vmem:[%s6228_s5 + $0xc30] sm:$0xff] }
 0x3c8   : > { %2687 = vmatpush.msra.mxu3 %v3558_v27  ;;  %v3897_v63 = vunpack.i.l.bf16 %v5925_v33  ;;  %3110 = vmatpush.msra.mxu0 %v3725_v15  ;;  %v3627_v27 = vld [vmem:[%s6228_s5 + $0x968] sm:$0xff]  ;;  %v1996_v15 = vmax.f32 %v5230_v60, %v3888_v13  ;;  %v1994_v13 = vmax.f32 %v5226_v17, %v3887_v55  ;;  %v3693_v17 = vld [vmem:[%s6228_s5 + $0xb78] sm:$0xff] }
 0x3c9   : > { %3069 = vmatpush.msrb.mxu2 %v3707_v3  ;;  %2984 = vmatpush.msra.mxu1 %v3674_v57  ;;  %v3696_v57 = vld [vmem:[%s6228_s5 + $0xb90] sm:$0xff]  ;;  %v3663_v60 = vld [vmem:[%s6228_s5 + $0xa88] sm:$0xff] }
 0x3ca   : > { %2688 = vmatpush.msra.mxu3 %v3557_v43  ;;  %v1992_v49 = vmax.f32 %v5487_v16, %v3897_v63  ;;  %3111 = vmatpush.msra.mxu0 %v3724_v4  ;;  %v3892_v16 = vunpack.i.l.bf16 %v5937_v47  ;;  %v3715_v43 = vld [vmem:[%s6228_s5 + $0xc28] sm:$0xff]  ;;  %v3626_v4 = vld [vmem:[%s6228_s5 + $0x960] sm:$0xff] }
 0x3cb   : > { %3070 = vmatpush.msrb.mxu2 %v3706_v54  ;;  %2985 = vmatpush.msra.mxu1 %v3673_v48  ;;  %v3695_v63 = vld [vmem:[%s6228_s5 + $0xb88] sm:$0xff]  ;;  %v3714_v54 = vld [vmem:[%s6228_s5 + $0xc20] sm:$0xff]  ;;  %v3893_v48 = vunpack.i.h.bf16 %v5937_v47  ;;  %v3713_v47 = vld [vmem:[%s6228_s5 + $0xc18] sm:$0xff] }
 0x3cc   : > { %v2042_v40 = vmax.f32 %v1992_v49, 0.0  ;;  %2689 = vmatpush.msra.mxu3 %v3556_v38  ;;  %3112 = vmatpush.msra.mxu0 %v3723_v31  ;;  %v3625_v31 = vld [vmem:[%s6228_s5 + $0x958] sm:$0xff] }
 0x3cd   : > { %3071 = vmatpush.msrb.mxu2 %v3705_v37  ;;  %2986 = vmatpush.msra.mxu1 %v3672_v18  ;;  %v3662_v37 = vld [vmem:[%s6228_s5 + $0xa80] sm:$0xff]  ;;  %v2046_v18 = vmax.f32 %v1996_v15, 0.0  ;;  %v3687_v15 = vld [vmem:[%s6228_s5 + $0xb48] sm:$0xff] }
 0x3ce   : > { %2690 = vmatpush.msra.mxu3 %v3555_v12  ;;  %v2791_v8 = vsel %vm2062_vm3, %v2042_v40, %v3892_v16  ;;  %3113 = vmatpush.msra.mxu0 %v3722_v19  ;;  %v3624_v16 = vld [vmem:[%s6228_s5 + $0x950] sm:$0xff]  ;;  %v3694_v40 = vld [vmem:[%s6228_s5 + $0xb80] sm:$0xff] }
 0x3cf   : > { %2825 = vmatmul.f32.vlgmr.msrb.gmra.mxu1 %v2791_v8  ;;  %3072 = vmatpush.msrb.mxu2 %v3704_v10  ;;  %v3623_v8 = vld [vmem:[%s6228_s5 + $0x948] sm:$0xff] }
 0x3d0   : > { %2691 = vmatpush.msra.mxu3 %v3554_v52  ;;  %2987 = vmatpush.msra.mxu1 %v3671_v45  ;;  %v3901_v3 = vpop.permute.xlu2 %3900  ;;  %v3712_v52 = vld [vmem:[%s6228_s5 + $0xc10] sm:$0xff]  ;;  %v1998_v45 = vmax.f32 %v5275_v2, %v3893_v48  ;;  %v3622_v2 = vld [vmem:[%s6228_s5 + $0x940] sm:$0xff] }
 0x3d1   : > { %3073 = vmatpush.msrb.mxu2 %v3703_v14  ;;  %3114 = vmatpush.msra.mxu0 %v3721_v35  ;;  %v3903_v38 = vunpack.i.h.bf16 %v3901_v3  ;;  %v3902_v12 = vunpack.i.l.bf16 %v3901_v3  ;;  %v3711_v35 = vld [vmem:[%s6228_s5 + $0xc08] sm:$0xff]  ;;  %v3686_v3 = vld [vmem:[%s6228_s5 + $0xb40] sm:$0xff]  ;;  %v3680_v48 = vld [vmem:[%s6228_s5 + $0xb10] sm:$0xff] }
 0x3d2   : > { %2692 = vmatpush.msra.mxu3 %v3553_v61  ;;  %2988 = vmatpush.msra.mxu1 %v3670_v24  ;;  %v2048_v61 = vmax.f32 %v1998_v45, 0.0 }
 0x3d3   : > { %3074 = vmatpush.msrb.mxu2 %v3702_v7  ;;  %3115 = vmatpush.msra.mxu0 %v3720_v23  ;;  %v2000_v1 = vmax.f32 %v5513_v59, %v3903_v38  ;;  %v2004_v14 = vmax.f32 %v5517_v26, %v3902_v12  ;;  %v3710_v59 = vld [vmem:[%s6228_s5 + $0xc00] sm:$0xff]  ;;  %v3621_v26 = vld [vmem:[%s6228_s5 + $0x938] sm:$0xff]  ;;  %v2119_v12 = vpop.f32.mrf.mxu3 }
 0x3d4   : > { %2693 = vmatpush.msra.mxu3 %v3552_v30  ;;  %2989 = vmatpush.msra.mxu1 %v3669_v42 }
 0x3d5   : > { %3075 = vmatpush.msrb.mxu2 %v3701_v62  ;;  %3116 = vmatpush.msra.mxu0 %v3719_v41  ;;  %v2050_v24 = vmax.f32 %v2000_v1, 0.0  ;;  %v2054_v30 = vmax.f32 %v2004_v14, 0.0 }
 0x3d6   : > { %2694 = vmatpush.msra.mxu3 %v3551_v28  ;;  %2990 = vmatpush.msra.mxu1 %v3668_v5  ;;  %v3620_v28 = vld [vmem:[%s6228_s5 + $0x930] sm:$0xff] }
 0x3d7   : > { %3076 = vmatpush.msrb.mxu2 %v3700_v32  ;;  %3117 = vmatpush.msra.mxu0 %v3718_v11  ;;  %v3619_v11 = vld [vmem:[%s6228_s5 + $0x928] sm:$0xff] }
 0x3d8   : > { %2695 = vmatpush.msra.mxu3 %v3550_v36  ;;  %2991 = vmatpush.msra.mxu1 %v3667_v9  ;;  %v1905_v41 = vpop.permute.xlu2 %1904  ;;  %v3618_v9 = vld [vmem:[%s6228_s5 + $0x920] sm:$0xff] }
 0x3d9   : > { %2696 = vmatmul.f32.vlgmr.msra.gmra.mxu3 %v2662_v22  ;;  %3077 = vmatpush.msrb.mxu2 %v3699_v21  ;;  %v2006_v36 = vmax.f32 %v5563_v39, %v1905_v41  ;;  %v3617_v21 = vld [vmem:[%s6228_s5 + $0x918] sm:$0xff]  ;;  %v3616_v39 = vld [vmem:[%s6228_s5 + $0x910] sm:$0xff] }
 0x3da   : > { %2852 = vmatpush.msrb.mxu3 %v3629_v50  ;;  %2992 = vmatpush.msra.mxu1 %v3666_v58 }
 0x3db   : > { %3078 = vmatpush.msrb.mxu2 %v3698_v6  ;;  %3118 = vmatpush.msra.mxu0 %v3717_v34  ;;  %v2056_v58 = vmax.f32 %v2006_v36, 0.0  ;;  %v3898_v6 = vunpack.i.h.bf16 %v5925_v33  ;;  %v3614_v34 = vld [vmem:[%s6228_s5 + $0x900] sm:$0xff]  ;;  %v3691_v33 = vld [vmem:[%s6228_s5 + $0xb68] sm:$0xff] }
 0x3dc   : > { %2853 = vmatpush.msrb.mxu3 %v3628_v20  ;;  %2993 = vmatpush.msra.mxu1 %v3665_v25  ;;  %v2044_v20 = vmax.f32 %v1994_v13, 0.0 }
 0x3dd   : > { %3079 = vmatpush.msrb.mxu2 %v3697_v56  ;;  %3119 = vmatpush.msra.mxu0 %v3716_v29  ;;  %v3692_v56 = vld [vmem:[%s6228_s5 + $0xb70] sm:$0xff]  ;;  %v3690_v29 = vld [vmem:[%s6228_s5 + $0xb60] sm:$0xff] }
 0x3de   : > { %2854 = vmatpush.msrb.mxu3 %v3627_v27  ;;  %2994 = vmatpush.msra.mxu1 %v3664_v53  ;;  %v2834_v25 = vsel %vm2062_vm3, %v2044_v20, %v3898_v6  ;;  %v3689_v27 = vld [vmem:[%s6228_s5 + $0xb58] sm:$0xff]  ;;  %v3688_v53 = vld [vmem:[%s6228_s5 + $0xb50] sm:$0xff] }
 0x3df   : > { %v6078_v49 = vpop.permute.xlu0 %3905  ;;  %3080 = vmatpush.msrb.mxu2 %v3696_v57  ;;  %3120 = vmatpush.msra.mxu0 %v3715_v43  ;;  %v3685_v57 = vld [vmem:[%s6228_s5 + $0xb38] sm:$0xff]  ;;  %v3684_v43 = vld [vmem:[%s6228_s5 + $0xb30] sm:$0xff] }
 0x3e0   : > { %2855 = vmatpush.msrb.mxu3 %v3626_v4  ;;  %v3907_v19 = vunpack.i.l.bf16 %v6078_v49  ;;  %2995 = vmatpush.msra.mxu1 %v3663_v60  ;;  %v3683_v4 = vld [vmem:[%s6228_s5 + $0xb28] sm:$0xff]  ;;  %v3682_v60 = vld [vmem:[%s6228_s5 + $0xb20] sm:$0xff] }
 0x3e1   : > { %3081 = vmatpush.msrb.mxu2 %v3695_v63  ;;  %3121 = vmatpush.msra.mxu0 %v3714_v54  ;;  %v3908_v63 = vunpack.i.h.bf16 %v6078_v49  ;;  %v3681_v54 = vld [vmem:[%s6228_s5 + $0xb18] sm:$0xff]  ;;  %v3678_v49 = vld [vmem:[%s6228_s5 + $0xb00] sm:$0xff] }
 0x3e2   : > { %2856 = vmatpush.msrb.mxu3 %v3625_v31  ;;  %v2877_v10 = vsel %vm2062_vm3, %v2046_v18, %v3907_v19  ;;  %2996 = vmatpush.msra.mxu1 %v3662_v37  ;;  %v3679_v31 = vld [vmem:[%s6228_s5 + $0xb08] sm:$0xff] }
 0x3e3   : > { %2911 = vmatmul.f32.vlgmr.msra.gmra.mxu2 %v2877_v10  ;;  %3122 = vmatpush.msra.mxu0 %v3713_v47  ;;  %v2002_v38 = vmax.f32 %v5491_v0, %v3908_v63  ;;  %v2139_v0 = vpop.f32.mrf.mxu3 }
 0x3e4   : > { %2857 = vmatpush.msrb.mxu3 %v3624_v16  ;;  %3082 = vmatpush.msrb.mxu2 %v3694_v40  ;;  %v2611_v41 = vpop.f32.mrf.mxu0 }
 0x3e5   : > { %3123 = vmatpush.msra.mxu0 %v3712_v52  ;;  %v2052_v18 = vmax.f32 %v2002_v38, 0.0 }
 0x3e6   : > { %2858 = vmatpush.msrb.mxu3 %v3623_v8  ;;  %v2140_v8 = vadd.f32 %v2139_v0, %v2119_v12 }
 0x3e7   : > { %v3916_v7 = vpop.permute.xlu1 %3915  ;;  %v6115_v23 = vpop.permute.xlu0 %3910  ;;  %3124 = vmatpush.msra.mxu0 %v3711_v35 }
 0x3e8   : > { %2859 = vmatpush.msrb.mxu3 %v3622_v2  ;;  %v3918_v42 = vunpack.i.h.bf16 %v3916_v7  ;;  %v3917_v46 = vunpack.i.l.bf16 %v3916_v7  ;;  %v3913_v62 = vunpack.i.h.bf16 %v6115_v23  ;;  %v3912_v37 = vunpack.i.l.bf16 %v6115_v23 }
 0x3e9   : > { %3125 = vmatpush.msra.mxu0 %v3710_v59 }
 0x3ea   : > { %2860 = vmatpush.msrb.mxu3 %v3621_v26  ;;  %v2920_v5 = vsel %vm2062_vm3, %v2048_v61, %v3913_v62  ;;  %v2963_v44 = vsel %vm2062_vm3, %v2050_v24, %v3918_v42  ;;  %v3049_v32 = vsel %vm2062_vm3, %v2054_v30, %v3917_v46  ;;  %v3006_v19 = vsel %vm2062_vm3, %v2052_v18, %v3912_v37 }
 0x3eb   : > { %2954 = vmatmul.f32.vlgmr.msrb.gmra.mxu0 %v2920_v5  ;;  %2997 = vmatmul.f32.vlgmr.msra.gmra.mxu1 %v2963_v44  ;;  %v2181_v47 = vpop.f32.mrf.mxu3 }
 0x3ec   : > { %2861 = vmatpush.msrb.mxu3 %v3620_v28  ;;  %3083 = vmatmul.f32.vlgmr.msrb.gmra.mxu2 %v3049_v32  ;;  %v2184_v35 = vadd.f32 %v2181_v47, %v2140_v8 }
 0x3ee   : > { %2862 = vmatpush.msrb.mxu3 %v3619_v11 }
 0x3ef   : > { %v3090_v50 = vpop.permute.xlu0 %3089 }
 0x3f0   : > { %2863 = vmatpush.msrb.mxu3 %v3618_v9  ;;  %v3092_v22 = vsel %vm2062_vm3, %v2056_v58, %v3090_v50 }
 0x3f2   : > { %2864 = vmatpush.msrb.mxu3 %v3617_v21 }
 0x3f3   : > { %3126 = vmatmul.f32.vlgmr.msra.gmra.mxu0 %v3092_v22  ;;  %v2224_v16 = vpop.f32.mrf.mxu3 }
 0x3f4   : > { %2865 = vmatpush.msrb.mxu3 %v3616_v39  ;;  %v2227_v2 = vadd.f32 %v2224_v16, %v2184_v35 }
 0x3f6   : > { %2866 = vmatpush.msrb.mxu3 %v3615_v51 }
 0x3f8   : > { %2867 = vmatpush.msrb.mxu3 %v3614_v34 }
 0x3f9   : > { %2868 = vmatmul.f32.vlgmr.msrb.gmra.mxu3 %v2834_v25 }
 0x3fa   : > { %3024 = vmatpush.msra.mxu3 %v3693_v17 }
 0x3fb   : > { %v2267_v40 = vpop.f32.mrf.mxu3 }
 0x3fc   : > { %3025 = vmatpush.msra.mxu3 %v3692_v56  ;;  %v2270_v59 = vadd.f32 %v2267_v40, %v2227_v2 }
 0x3fe   : > { %3026 = vmatpush.msra.mxu3 %v3691_v33 }
 0x400   : > { %3027 = vmatpush.msra.mxu3 %v3690_v29 }
 0x402   : > { %3028 = vmatpush.msra.mxu3 %v3689_v27  ;;  %v3920_v27 = vld [vmem:[%s6229_s6] ss:$0 sm:$0xff] }
 0x403   : > { %v2310_v10 = vpop.f32.mrf.mxu3 }
 0x404   : > { %3029 = vmatpush.msra.mxu3 %v3688_v53  ;;  %v2313_v61 = vadd.f32 %v2310_v10, %v2270_v59 }
 0x406   : > { %3030 = vmatpush.msra.mxu3 %v3687_v15 }
 0x408   : > { %3031 = vmatpush.msra.mxu3 %v3686_v3 }
 0x40a   : > { %3032 = vmatpush.msra.mxu3 %v3685_v57  ;;  %v3921_v57 = vld [vmem:[%s6230_s7] ss:$0 sm:$0xff] }
 0x40b   : > { %v2353_v52 = vpop.f32.mrf.mxu3 }
 0x40c   : > { %3033 = vmatpush.msra.mxu3 %v3684_v43  ;;  %v2356_v26 = vadd.f32 %v2353_v52, %v2313_v61 }
 0x40e   : > { %3034 = vmatpush.msra.mxu3 %v3683_v4 }
 0x410   : > { %3035 = vmatpush.msra.mxu3 %v3682_v60  ;;  %v3922_v60 = vld [vmem:[#allocation2] ss:$0 sm:$0xff] }
 0x412   : > { %3036 = vmatpush.msra.mxu3 %v3681_v54 }
 0x413   : > { %v2396_v45 = vpop.f32.mrf.mxu3 }
 0x414   : > { %3037 = vmatpush.msra.mxu3 %v3680_v48  ;;  %v2399_v7 = vadd.f32 %v2396_v45, %v2356_v26 }
 0x416   : > { %3038 = vmatpush.msra.mxu3 %v3679_v31 }
 0x418   : > { %3039 = vmatpush.msra.mxu3 %v3678_v49 }
 0x419   : > { %3040 = vmatmul.f32.vlgmr.msra.gmra.mxu3 %v3006_v19 }
 0x41b   : > { %v2439_v1 = vpop.f32.mrf.mxu3 }
 0x41c   : > { %v2442_v23 = vadd.f32 %v2439_v1, %v2399_v7 }
 0x423   : > { %v2482_v14 = vpop.f32.mrf.mxu3 }
 0x424   : > { %v2485_v30 = vadd.f32 %v2482_v14, %v2442_v23 }
 0x42b   : > { %v2525_v24 = vpop.f32.mrf.mxu3 }
 0x42c   : > { %v2528_v46 = vadd.f32 %v2525_v24, %v2485_v30 }
 0x43c   : > { %v2568_v42 = vpop.f32.mrf.mxu3 }
 0x43d   : > { %v2571_v62 = vadd.f32 %v2568_v42, %v2528_v46 }
 0x43f   : > { %v2654_v28 = vpop.f32.mrf.mxu1  ;;  %v2614_v5 = vadd.f32 %v2611_v41, %v2571_v62 }
 0x441   : > { %v2657_v32 = vadd.f32 %v2654_v28, %v2614_v5 }
 0x443   : > { %v2783_v55 = vpop.f32.mrf.mxu0 }
 0x446   : > { %v2740_v36 = vpop.f32.mrf.mxu2 }
 0x44c   : > { %v2826_v50 = vpop.f32.mrf.mxu1 }
 0x45c   : > { %v2697_v44 = vpop.f32.mrf.mxu3 }
 0x45d   : > { %v2700_v11 = vadd.f32 %v2697_v44, %v2657_v32 }
 0x45f   : > { %v2743_v9 = vadd.f32 %v2740_v36, %v2700_v11 }
 0x461   : > { %v2786_v21 = vadd.f32 %v2783_v55, %v2743_v9 }
 0x463   : > { %v2829_v39 = vadd.f32 %v2826_v50, %v2786_v21 }
 0x466   : > { %v2912_v22 = vpop.f32.mrf.mxu2 }
 0x468   : > { %v2955_v6 = vpop.f32.mrf.mxu0  ;;  %v2998_v20 = vpop.f32.mrf.mxu1 }
 0x46f   : > { %v3084_v33 = vpop.f32.mrf.mxu2 }
 0x470   : > { %v3127_v53 = vpop.f32.mrf.mxu0 }
 0x47c   : > { %v2869_v58 = vpop.f32.mrf.mxu3 }
 0x47d   : > { %v2872_v13 = vadd.f32 %v2869_v58, %v2829_v39 }
 0x47f   : > { %v2915_v51 = vadd.f32 %v2912_v22, %v2872_v13 }
 0x481   : > { %v2958_v34 = vadd.f32 %v2955_v6, %v2915_v51 }
 0x483   : > { %v3001_v17 = vadd.f32 %v2998_v20, %v2958_v34 }
 0x49c   : > { %v3041_v25 = vpop.f32.mrf.mxu3 }
 0x49d   : > { %v3044_v56 = vadd.f32 %v3041_v25, %v3001_v17 }
 0x49f   : > { %v3087_v29 = vadd.f32 %v3084_v33, %v3044_v56 }
 0x4a1   : > { %v3130_v15 = vadd.f32 %v3127_v53, %v3087_v29 }
 0x4a3   : > { %v3135_v3 = vadd.f32 %v3920_v27, %v3130_v15 }
 0x4a5   : > { %v3136_v43 = vmax.f32 %v3135_v3, 0.0 }
 0x4a7   : > { %v3141_v4 = vmul.f32 %v3921_v57, %v3136_v43 }
 0x4a9   : > { %3142 = vadd.xlane.f32.xlu1 %v3141_v4 }
 0x51c   : > { %v3143_v63 = vpop.xlane.xlu1 %3142 }
 0x51d   : > { %v3148_v54 = vadd.f32 %v3922_v60, %v3143_v63 }
 0x51f   : > { %v3149_v48 = vsub.f32 0.0, %v3148_v54 }
 0x521   : > { %v3150_v38 = vmul.f32 1.442695, %v3149_v48 }
 0x523   : > { %3923 = vpow2.f32 %v3150_v38 }
 0x529   : > { %v3924_v31 = vpop.eup %3923 }
 0x52a   : > { %v3152_v37 = vadd.f32 1.0, %v3924_v31 }
 0x52c   : > { %3925 = vrcp.f32 %v3152_v37  ;;  %v3164_v19 = vand.u32 2147483648, %v3152_v37  ;;  %v3162_v47 = vand.u32 2147483647, %v3152_v37  ;;  %vm3158_vm6 = vweird.f32 %v3152_v37 }
 0x52e   : > { %v3165_v40 = vor.u32 1.1754944e-38, %v3164_v19  ;;  %vm3163_vm9 = vcmp.eq.f32.partialorder %v3162_v47, 8.507059e+37 }
 0x532   : > { %v3926_v49 = vpop.eup %3925 }
 0x533   : > { %v3154_v18 = vmul.f32 %v3926_v49, %v3152_v37  ;;  %vm3159_vm5 = vweird.f32 %v3926_v49 }
 0x534   : > { %vm3160_vm8 = vmor %vm3158_vm6, %vm3159_vm5 }
 0x535   : > { %v3155_v12 = vsub.f32 1.0, %v3154_v18 }
 0x537   : > { %v3156_v0 = vmul.f32 %v3926_v49, %v3155_v12 }
 0x539   : > { %v3157_v16 = vadd.f32 %v3926_v49, %v3156_v0 }
 0x53b   : > { %v3161_v10 = vsel %vm3160_vm8, %v3926_v49, %v3157_v16 }
 0x53c   : > { %v3166_v52 = vsel %vm3163_vm9, %v3165_v40, %v3161_v10 }
 0x53d   : > { %3169 = vst.msk [vmem:[%s563_s25] sm:$0xff] %vm3168_vm7, %v3166_v52 }
 0x53e PF: > { %p18_p9 = scmp.ge.s32.totalorder %s4023_s14, 4   ;;  %s6233_s11 = smov %s3946_s12 }
 0x53f   : > { %s6234_s12 = smov %s4032_s17  ;;  %s6235_s13 = smov %s4023_s14 }
 0x540   :  { %20 = sbr.rel (!%p18_p9) target bundleno = 5 (0x5), region = 153 }

</bundles_post_ra>
